<compile_context>
chip_gen: v5e
topology: v5e:2x2
jax: 0.10.0
libtpu: 0.0.40
codegen_flags: <defaults>
</compile_context>

<pallas_src>
import functools

import numpy as np
import jax
import jax.numpy as jnp
from jax.experimental import pallas as pl
from jax.experimental.pallas import tpu as pltpu


_HALO = 16  # halo hop-blocks per tile (>= r-1, sublane aligned for f32 & bf16)


# ---------------------------------------------------------------------------
# Host-side (deterministic) parameter construction.
# ---------------------------------------------------------------------------
def _hann_window(win_length: int, n_fft: int) -> np.ndarray:
    n = np.arange(win_length, dtype=np.float64)
    w = 0.5 * (1.0 - np.cos(2.0 * np.pi * n / win_length))  # periodic hann
    out = np.zeros(n_fft, dtype=np.float64)
    left = (n_fft - win_length) // 2
    out[left:left + win_length] = w                          # centered in n_fft
    return out


def _melscale_fbanks(n_freqs: int, f_min: float, f_max: float, n_mels: int,
                     sample_rate: int) -> np.ndarray:
    # HTK mel scale, norm=None (torchaudio defaults). Shape (n_freqs, n_mels).
    all_freqs = np.linspace(0.0, sample_rate // 2, n_freqs)
    m_min = 2595.0 * np.log10(1.0 + f_min / 700.0)
    m_max = 2595.0 * np.log10(1.0 + f_max / 700.0)
    m_pts = np.linspace(m_min, m_max, n_mels + 2)
    f_pts = 700.0 * (10.0 ** (m_pts / 2595.0) - 1.0)
    f_diff = f_pts[1:] - f_pts[:-1]
    slopes = f_pts[None, :] - all_freqs[:, None]             # (n_freqs, n_mels+2)
    down = (-slopes[:, :-2]) / f_diff[:-1]
    up = slopes[:, 2:] / f_diff[1:]
    return np.maximum(0.0, np.minimum(down, up))


def _fused_windowed_dft(n_fft: int, win_length: int,
                        n_freq_pad: int) -> np.ndarray:
    """(n_fft, 2*n_freq_pad) matrix  [window*cos | window*sin]."""
    n_freqs = n_fft // 2 + 1
    w = _hann_window(win_length, n_fft)[:, None]
    n = np.arange(n_fft, dtype=np.float64)[:, None]
    k = np.arange(n_freqs, dtype=np.float64)[None, :]
    ang = 2.0 * np.pi * n * k / n_fft
    m = np.zeros((n_fft, 2 * n_freq_pad), dtype=np.float64)
    m[:, :n_freqs] = w * np.cos(ang)
    m[:, n_freq_pad:n_freq_pad + n_freqs] = w * np.sin(ang)
    return m


# ---------------------------------------------------------------------------
# Pallas kernel: in-kernel framing (hop-strided matmul sum) -> power -> mel -> log.
# ---------------------------------------------------------------------------
def _logmel_kernel(blocks_ref, halo_ref, dft_ref, fb_ref, out_ref, ext_ref, *,
                   hop, r, n_freq_pad):
    tile_t = blocks_ref.shape[0]

    # Assemble this tile's hop-block window in VMEM (both stores are aligned).
    ext_ref[:tile_t, :] = blocks_ref[...]
    ext_ref[tile_t:, :] = halo_ref[...]

    # Frame p of this tile is the concat of hop-blocks p .. p+r-1, so
    # frames @ (win*DFT) = sum_s ext[s:s+tile_t] @ dft[s*hop:(s+1)*hop].
    # The dft row-slices are sublane aligned; f32 accumulation throughout.
    y = jnp.dot(ext_ref[0:tile_t, :], dft_ref[0:hop, :],
                preferred_element_type=jnp.float32)          # (tile_t, 2*n_freq_pad)
    for s in range(1, r):
        y = y + jnp.dot(ext_ref[s:s + tile_t, :],
                        dft_ref[s * hop:(s + 1) * hop, :],
                        preferred_element_type=jnp.float32)

    re = y[:, :n_freq_pad]                                   # 128-lane aligned splits
    im = y[:, n_freq_pad:]
    power = re * re + im * im                                # |X|^2, f32

    # Mel matmul with bf16 (or f32) operands, f32 accumulation.
    mel = jnp.dot(power.astype(fb_ref.dtype), fb_ref[...],
                  preferred_element_type=jnp.float32)        # (tile_t, n_mels)

    # log, then fold the output transpose into the kernel: (n_mels, tile_t).
    logmel_t = jnp.log(mel + 1e-14).T
    out_ref[...] = logmel_t[:, :out_ref.shape[1]]


def log_mel_spec(x: jnp.ndarray,
                 sample_rate: int = 8000,
                 n_mels: int = 128,
                 win_length: int = 160,
                 hop_length: int = 80,
                 n_fft: int = 400,
                 tile_t: int = 1024,
                 matmul_dtype=jnp.bfloat16) -> jnp.ndarray:
    """x: (batch, samples) float waveform -> (batch, n_mels, n_frames) float32."""
    # TODO(synk): in-kernel framing assumes hop_length divides n_fft (true for
    # the module defaults); add a gather-based fallback for other configs.
    assert n_fft % hop_length == 0, "kernel path requires hop_length | n_fft"
    r = n_fft // hop_length
    assert r - 1 <= _HALO

    x = x.astype(jnp.float32)
    B = x.shape[0]

    # Reflect-pad (center=True) and view as hop-sized blocks. Cast to the
    # matmul dtype *before* padding so the only full-width pass is on bf16.
    pad = n_fft // 2
    xw = jnp.pad(x.astype(matmul_dtype), ((0, 0), (pad, pad)), mode="reflect")
    n_frames = 1 + (xw.shape[-1] - n_fft) // hop_length
    n_blocks = n_frames + r - 1
    blocks = xw[:, :n_blocks * hop_length].reshape(B, n_blocks, hop_length)

    # Frame tiling: tile_t frames per grid step (multiple of 128 keeps the
    # transposed output block lane dense); shrink for short audio.
    tile_t = max(128, min(tile_t, pl.cdiv(n_frames, 128) * 128))
    num_t = pl.cdiv(n_frames, tile_t)
    n_blocks_pad = num_t * tile_t + _HALO
    blocks = jnp.pad(blocks, ((0, 0), (0, n_blocks_pad - n_blocks), (0, 0)))

    n_freqs = n_fft // 2 + 1                                  # 201
    n_freq_pad = pl.cdiv(n_freqs, 128) * 128                  # 256 (lane aligned)

    dft = jnp.asarray(_fused_windowed_dft(n_fft, win_length, n_freq_pad),
                      dtype=matmul_dtype)                     # (400, 512)
    fb_np = np.zeros((n_freq_pad, n_mels), dtype=np.float64)
    fb_np[:n_freqs] = _melscale_fbanks(n_freqs, 0.0, sample_rate / 2.0,
                                       n_mels, sample_rate)
    fb = jnp.asarray(fb_np, dtype=matmul_dtype)               # bf16 mel operand

    # When a single frame tile covers everything, make the output block exactly
    # n_frames wide (block == full dim) and slice the tile inside the kernel.
    out_t = n_frames if num_t == 1 else tile_t

    bpe = np.dtype(matmul_dtype).itemsize
    cost = pl.CostEstimate(
        flops=int(2 * B * num_t * tile_t
                  * (n_fft * 2 * n_freq_pad + n_freq_pad * n_mels)
                  + 3 * B * num_t * tile_t * n_freq_pad),
        transcendentals=int(B * num_t * tile_t * n_mels),
        bytes_accessed=int(blocks.size * bpe
                           + B * num_t * _HALO * hop_length * bpe
                           + dft.size * bpe + fb.size * bpe
                           + B * n_mels * n_frames * 4))

    # NOTE(bf16 fidelity): for very low-energy bins near the 1e-14 log floor
    # (silence), bf16 operands can deviate noticeably from torchaudio; pass
    # matmul_dtype=jnp.float32 when that matters.
    out = pl.pallas_call(
        functools.partial(_logmel_kernel, hop=hop_length, r=r,
                          n_freq_pad=n_freq_pad),
        out_shape=jax.ShapeDtypeStruct((B, n_mels, n_frames), jnp.float32),
        grid=(B, num_t),
        in_specs=[
            # main hop-blocks of this frame tile
            pl.BlockSpec((None, tile_t, hop_length), lambda b, j: (b, j, 0)),
            # 16-row halo from the same blocks array (next r-1 hop-blocks)
            pl.BlockSpec((None, _HALO, hop_length),
                         lambda b, j: (b, (j + 1) * (tile_t // _HALO), 0)),
            # fused windowed DFT [win*cos | win*sin]
            pl.BlockSpec((n_fft, 2 * n_freq_pad), lambda b, j: (0, 0)),
            # mel filterbank
            pl.BlockSpec((n_freq_pad, n_mels), lambda b, j: (0, 0)),
        ],
        out_specs=pl.BlockSpec((None, n_mels, out_t), lambda b, j: (b, 0, j)),
        scratch_shapes=[pltpu.VMEM((tile_t + _HALO, hop_length), matmul_dtype)],
        compiler_params=pltpu.CompilerParams(
            dimension_semantics=("parallel", "parallel")),
        cost_estimate=cost,
    )(blocks, blocks, dft, fb)

    return out                                                # (B, n_mels, n_frames)


# ---------------------------------------------------------------------------
# Pure-JAX float32 reference (FFT path) for in-script validation.
# ---------------------------------------------------------------------------
def _frame_signal(x, n_fft, hop_length):
    pad = n_fft // 2
    xp = jnp.pad(x, ((0, 0), (pad, pad)), mode="reflect")
    n_frames = 1 + (xp.shape[-1] - n_fft) // hop_length
    idx = (jnp.arange(n_frames)[:, None] * hop_length
           + jnp.arange(n_fft)[None, :])
    return xp[:, idx]


def log_mel_spec_reference(x, sample_rate=8000, n_mels=128, win_length=160,
                           hop_length=80, n_fft=400):
    x = x.astype(jnp.float32)
    frames = _frame_signal(x, n_fft, hop_length)
    w = jnp.asarray(_hann_window(win_length, n_fft), dtype=jnp.float32)
    spec = jnp.fft.rfft(frames * w, n=n_fft, axis=-1)
    power = spec.real ** 2 + spec.imag ** 2
    n_freqs = n_fft // 2 + 1
    fb = jnp.asarray(_melscale_fbanks(n_freqs, 0.0, sample_rate / 2.0, n_mels,
                                      sample_rate), dtype=jnp.float32)
    mel = jnp.einsum("btf,fm->btm", power, fb,
                     precision=jax.lax.Precision.HIGHEST)
    return jnp.log(mel + 1e-14).transpose(0, 2, 1)


if __name__ == "__main__":
    key = jax.random.PRNGKey(0)
    batch, samples = 2, 800            # 800 samples @ hop 80 -> 11 frames
    x = jax.random.normal(key, (batch, samples), dtype=jnp.float32)
    n_frames = 1 + samples // 80

    ref = jax.block_until_ready(log_mel_spec_reference(x))

    # Full-f32 matmul path: tight check of the in-kernel framing / DFT / mel.
    y32 = jax.block_until_ready(log_mel_spec(x, matmul_dtype=jnp.float32))
    assert y32.shape == (batch, 128, n_frames), y32.shape
    assert y32.dtype == jnp.float32
    assert bool(jnp.all(jnp.isfinite(y32)))
    assert float(jnp.max(jnp.abs(y32 - ref))) < 1e-2

    # Default bf16-operand path (perf config, f32 accumulation): robust check.
    y = jax.block_until_ready(log_mel_spec(x))
    assert y.shape == (batch, 128, n_frames), y.shape
    assert y.dtype == jnp.float32
    assert bool(jnp.all(jnp.isfinite(y)))
    assert float(jnp.mean(jnp.abs(y - ref))) < 5e-2

    print("KERNEL_OK")
</pallas_src>

<mosaic_0001>
module attributes {stable_mosaic.version = 11 : i64} {
  func.func @_logmel_kernel(%arg0: i32, %arg1: i32, %arg2: memref<1x128x80xf32, #tpu.memory_space<vmem>>, %arg3: memref<1x16x80xf32, #tpu.memory_space<vmem>>, %arg4: memref<400x512xf32, #tpu.memory_space<vmem>>, %arg5: memref<256x128xf32, #tpu.memory_space<vmem>>, %arg6: memref<1x128x11xf32, #tpu.memory_space<vmem>>, %arg7: memref<144x80xf32, #tpu.memory_space<vmem>>) attributes {dimension_semantics = [#tpu.dimension_semantics<parallel>, #tpu.dimension_semantics<parallel>], iteration_bounds = array<i64: 2, 1>, scalar_prefetch = 0 : i64, scratch_operands = 1 : i64, tpu.core_type = #tpu.core_type<tc>, window_params = [{transform_indices = @transform_0, window_bounds = array<i64: 1, 128, 80>}, {transform_indices = @transform_1, window_bounds = array<i64: 1, 16, 80>}, {pipeline_mode = #tpu.pipeline_mode<synchronous>, transform_indices = @transform_2, window_bounds = array<i64: 400, 512>}, {pipeline_mode = #tpu.pipeline_mode<synchronous>, transform_indices = @transform_3, window_bounds = array<i64: 256, 128>}, {transform_indices = @transform_4, window_bounds = array<i64: 1, 128, 11>}]} {
    %c0 = arith.constant 0 : index
    %c0_0 = arith.constant 0 : index
    %c0_1 = arith.constant 0 : index
    %0 = vector.load %arg2[%c0, %c0_0, %c0_1] : memref<1x128x80xf32, #tpu.memory_space<vmem>>, vector<1x128x80xf32>
    %1 = vector.shape_cast %0 : vector<1x128x80xf32> to vector<128x80xf32>
    %c0_2 = arith.constant 0 : index
    %c0_3 = arith.constant 0 : index
    %2 = vector.load %arg7[%c0_2, %c0_3] : memref<144x80xf32, #tpu.memory_space<vmem>>, vector<128x80xf32>
    tpu.vector_store %arg7[%c0_2, %c0_3], %1 {strides = array<i32>} : memref<144x80xf32, #tpu.memory_space<vmem>>, vector<128x80xf32>,
    %c0_4 = arith.constant 0 : index
    %c0_5 = arith.constant 0 : index
    %c0_6 = arith.constant 0 : index
    %3 = vector.load %arg3[%c0_4, %c0_5, %c0_6] : memref<1x16x80xf32, #tpu.memory_space<vmem>>, vector<1x16x80xf32>
    %4 = vector.shape_cast %3 : vector<1x16x80xf32> to vector<16x80xf32>
    %c128 = arith.constant 128 : index
    %c0_7 = arith.constant 0 : index
    %5 = vector.load %arg7[%c128, %c0_7] : memref<144x80xf32, #tpu.memory_space<vmem>>, vector<16x80xf32>
    tpu.vector_store %arg7[%c128, %c0_7], %4 {strides = array<i32>} : memref<144x80xf32, #tpu.memory_space<vmem>>, vector<16x80xf32>,
    %c0_8 = arith.constant 0 : index
    %c0_9 = arith.constant 0 : index
    %6 = vector.load %arg7[%c0_8, %c0_9] : memref<144x80xf32, #tpu.memory_space<vmem>>, vector<128x80xf32>
    %c0_10 = arith.constant 0 : index
    %c0_11 = arith.constant 0 : index
    %7 = vector.load %arg4[%c0_10, %c0_11] : memref<400x512xf32, #tpu.memory_space<vmem>>, vector<80x512xf32>
    %cst = arith.constant dense<0.000000e+00> : vector<128x512xf32>
    %8 = tpu.matmul %6, %7, %cst {dimension_numbers = #tpu.dot_dimension_numbers<[1], [0], [0], [1], [0, 0, 1, 1], [], []>} : vector<128x80xf32>, vector<80x512xf32>, vector<128x512xf32> -> vector<128x512xf32>
    %c1 = arith.constant 1 : index
    %c0_12 = arith.constant 0 : index
    %9 = vector.load %arg7[%c1, %c0_12] : memref<144x80xf32, #tpu.memory_space<vmem>>, vector<128x80xf32>
    %c80 = arith.constant 80 : index
    %c0_13 = arith.constant 0 : index
    %10 = vector.load %arg4[%c80, %c0_13] : memref<400x512xf32, #tpu.memory_space<vmem>>, vector<80x512xf32>
    %cst_14 = arith.constant dense<0.000000e+00> : vector<128x512xf32>
    %11 = tpu.matmul %9, %10, %cst_14 {dimension_numbers = #tpu.dot_dimension_numbers<[1], [0], [0], [1], [0, 0, 1, 1], [], []>} : vector<128x80xf32>, vector<80x512xf32>, vector<128x512xf32> -> vector<128x512xf32>
    %12 = arith.addf %8, %11 : vector<128x512xf32>
    %c2 = arith.constant 2 : index
    %c0_15 = arith.constant 0 : index
    %13 = vector.load %arg7[%c2, %c0_15] : memref<144x80xf32, #tpu.memory_space<vmem>>, vector<128x80xf32>
    %c160 = arith.constant 160 : index
    %c0_16 = arith.constant 0 : index
    %14 = vector.load %arg4[%c160, %c0_16] : memref<400x512xf32, #tpu.memory_space<vmem>>, vector<80x512xf32>
    %cst_17 = arith.constant dense<0.000000e+00> : vector<128x512xf32>
    %15 = tpu.matmul %13, %14, %cst_17 {dimension_numbers = #tpu.dot_dimension_numbers<[1], [0], [0], [1], [0, 0, 1, 1], [], []>} : vector<128x80xf32>, vector<80x512xf32>, vector<128x512xf32> -> vector<128x512xf32>
    %16 = arith.addf %12, %15 : vector<128x512xf32>
    %c3 = arith.constant 3 : index
    %c0_18 = arith.constant 0 : index
    %17 = vector.load %arg7[%c3, %c0_18] : memref<144x80xf32, #tpu.memory_space<vmem>>, vector<128x80xf32>
    %c240 = arith.constant 240 : index
    %c0_19 = arith.constant 0 : index
    %18 = vector.load %arg4[%c240, %c0_19] : memref<400x512xf32, #tpu.memory_space<vmem>>, vector<80x512xf32>
    %cst_20 = arith.constant dense<0.000000e+00> : vector<128x512xf32>
    %19 = tpu.matmul %17, %18, %cst_20 {dimension_numbers = #tpu.dot_dimension_numbers<[1], [0], [0], [1], [0, 0, 1, 1], [], []>} : vector<128x80xf32>, vector<80x512xf32>, vector<128x512xf32> -> vector<128x512xf32>
    %20 = arith.addf %16, %19 : vector<128x512xf32>
    %c4 = arith.constant 4 : index
    %c0_21 = arith.constant 0 : index
    %21 = vector.load %arg7[%c4, %c0_21] : memref<144x80xf32, #tpu.memory_space<vmem>>, vector<128x80xf32>
    %c320 = arith.constant 320 : index
    %c0_22 = arith.constant 0 : index
    %22 = vector.load %arg4[%c320, %c0_22] : memref<400x512xf32, #tpu.memory_space<vmem>>, vector<80x512xf32>
    %cst_23 = arith.constant dense<0.000000e+00> : vector<128x512xf32>
    %23 = tpu.matmul %21, %22, %cst_23 {dimension_numbers = #tpu.dot_dimension_numbers<[1], [0], [0], [1], [0, 0, 1, 1], [], []>} : vector<128x80xf32>, vector<80x512xf32>, vector<128x512xf32> -> vector<128x512xf32>
    %24 = arith.addf %20, %23 : vector<128x512xf32>
    %25 = vector.extract_strided_slice %24 {offsets = [0, 0], sizes = [128, 256], strides = [1, 1]} : vector<128x512xf32> to vector<128x256xf32>
    %26 = vector.extract_strided_slice %24 {offsets = [0, 256], sizes = [128, 256], strides = [1, 1]} : vector<128x512xf32> to vector<128x256xf32>
    %27 = arith.mulf %25, %25 : vector<128x256xf32>
    %28 = arith.mulf %26, %26 : vector<128x256xf32>
    %29 = arith.addf %27, %28 : vector<128x256xf32>
    %c0_24 = arith.constant 0 : index
    %c0_25 = arith.constant 0 : index
    %30 = vector.load %arg5[%c0_24, %c0_25] : memref<256x128xf32, #tpu.memory_space<vmem>>, vector<256x128xf32>
    %cst_26 = arith.constant dense<0.000000e+00> : vector<128x128xf32>
    %31 = tpu.matmul %29, %30, %cst_26 {dimension_numbers = #tpu.dot_dimension_numbers<[1], [0], [0], [1], [0, 0, 1, 1], [], []>} : vector<128x256xf32>, vector<256x128xf32>, vector<128x128xf32> -> vector<128x128xf32>
    %cst_27 = arith.constant 9.99999982E-15 : f32
    %32 = vector.broadcast %cst_27 : f32 to vector<128x128xf32>
    %33 = arith.addf %31, %32 : vector<128x128xf32>
    %34 = math.log %33 : vector<128x128xf32>
    %35 = tpu.transpose %34, [1, 0] : vector<128x128xf32> -> vector<128x128xf32>
    %36 = vector.extract_strided_slice %35 {offsets = [0, 0], sizes = [128, 11], strides = [1, 1]} : vector<128x128xf32> to vector<128x11xf32>
    %c0_28 = arith.constant 0 : index
    %c0_29 = arith.constant 0 : index
    %c0_30 = arith.constant 0 : index
    %37 = vector.load %arg6[%c0_28, %c0_29, %c0_30] : memref<1x128x11xf32, #tpu.memory_space<vmem>>, vector<1x128x11xf32>
    %38 = vector.shape_cast %37 : vector<1x128x11xf32> to vector<128x11xf32>
    %39 = vector.shape_cast %36 : vector<128x11xf32> to vector<1x128x11xf32>
    tpu.vector_store %arg6[%c0_28, %c0_29, %c0_30], %39 {strides = array<i32>} : memref<1x128x11xf32, #tpu.memory_space<vmem>>, vector<1x128x11xf32>,
    return
  }
  func.func @transform_0(%arg0: i32, %arg1: i32) -> (i32, i32, i32) {
    %c0_i32 = arith.constant 0 : i32
    %c0_i32_0 = arith.constant 0 : i32
    return %arg0, %arg1, %c0_i32 : i32, i32, i32
  }
  func.func @transform_1(%arg0: i32, %arg1: i32) -> (i32, i32, i32) {
    %c1_i32 = arith.constant 1 : i32
    %0 = arith.addi %arg1, %c1_i32 : i32
    %c8_i32 = arith.constant 8 : i32
    %1 = arith.muli %0, %c8_i32 : i32
    %c0_i32 = arith.constant 0 : i32
    %c0_i32_0 = arith.constant 0 : i32
    return %arg0, %1, %c0_i32 : i32, i32, i32
  }
  func.func @transform_2(%arg0: i32, %arg1: i32) -> (i32, i32) {
    %c0_i32 = arith.constant 0 : i32
    %c0_i32_0 = arith.constant 0 : i32
    %c0_i32_1 = arith.constant 0 : i32
    return %c0_i32, %c0_i32_0 : i32, i32
  }
  func.func @transform_3(%arg0: i32, %arg1: i32) -> (i32, i32) {
    %c0_i32 = arith.constant 0 : i32
    %c0_i32_0 = arith.constant 0 : i32
    %c0_i32_1 = arith.constant 0 : i32
    return %c0_i32, %c0_i32_0 : i32, i32
  }
  func.func @transform_4(%arg0: i32, %arg1: i32) -> (i32, i32, i32) {
    %c0_i32 = arith.constant 0 : i32
    %c0_i32_0 = arith.constant 0 : i32
    return %arg0, %c0_i32, %arg1 : i32, i32, i32
  }
}

</mosaic_0001>

<bundles_post_ra>
// kernel: tpu_custom_call.1
= control target key start
LH: loop header
LB: loop body
LE: loop exit
PB: predicated region body
PF: predicated region fallthrough
CT: control target
= control target key end

     0   :  { %s5359_s0 = inlined_call_operand.hbm [shape: f32[2,144,80], index: 0, kind: input, shape index: {}]   ;;  %s5360_s1 = inlined_call_operand.hbm [shape: f32[2,144,80], index: 1, kind: input, shape index: {}]   ;;  %s5361_s2 = inlined_call_operand.hbm [shape: f32[400,512], index: 2, kind: input, shape index: {}]   ;;  %s5362_s3 = inlined_call_operand.hbm [shape: f32[256,128], index: 3, kind: input, shape index: {}]   ;;  %s5363_s4 = inlined_call_operand.vmem [shape: f32[2,128,11], index: 4, kind: output, shape index: {}]  }
   0x1   :  { %5373 = sst [smem:[#allocation136_spill]] %s5361_s2 }
   0x2   :  { %9 = vsyncpa [#allocation4], 0 }
   0x3   :  { %11 = vsyncpa [#allocation4 + $0x1], 0 }
   0x4   :  { %12 = vsyncpa [#allocation6], 0 }
   0x5   :  { %14 = vsyncpa [#allocation6 + $0x1], 0 }
   0x6   :  { %15 = vsyncpa [#allocation9], 0  ;;  %s3563_s15 = smov 0   ;;  %s3565_s16 = smov 0  }
   0x7   :  { %s3567_s17 = smov 0   ;;  %s3569_s18 = smov 0  }
   0x8   :  { %s3571_s19 = smov 0   ;;  %s3573_s20 = smov 0  }
   0x9 LB: > { %s5364_s21 = sadd.s32 4294967295, %s3530_s20   ;;  %p55_p0 = scmp.ne.s32.totalorder %s3514_s16, %s3510_s15  ;;  %s3530_s20 = sphi %s3573_s20, %s21_s20   ;;  %s3526_s19 = sphi %s3571_s19, %s5681_s19   ;;  %s3522_s18 = sphi %s3569_s18, %s5680_s18   ;;  %s3518_s17 = sphi %s3567_s17, %s5679_s17   ;;  %s3514_s16 = sphi %s3565_s16, %s5678_s16   ;;  %s3510_s15 = sphi %s3563_s15, %s5677_s15  }
   0xa   : > { %p3595_p1 = scmp.eq.s32.totalorder %s5364_s21, 0  ;;  %p2872_p2 = scmp.ge.s32.totalorder %s3530_s20, 1 }
   0xb   : > { %p168_p3 = scmp.lt.s32.totalorder %s3530_s20, 3  ;;  %s5376_s2 = sld [smem:[#allocation136_spill]] }
   0xc   : > { %p3603_p4 = por %p3595_p1, %p55_p0  ;;  %s3532_s28 = smov [#allocation7]  }
   0xd   : > { %p3610_p5 = pnand %p2872_p2, %p168_p3  ;;  %s181_s29 = sshll.u32 %s3532_s28, 4  ;;  %s182_s29 = int_to_ptr.vmem [resolvable:$true] %s181_s29 }
   0xe   : > { %s193_s6 = sshll.u32 %s5362_s3, 4  ;;  %s3533_s7 = smov 512   ;;  %s194_s6 = int_to_ptr.hbm [resolvable:$true] %s193_s6 }
   0xf   : > { %p3243_p6 = pneg %p3610_p5  ;;  %s3534_s8 = smov 32  }
  0x10   : > { %s3535_s9 = smov [#allocation8]   ;;  %s5365_s11 = smov 128  }
  0x11   : > { %s179_s26 = sshll.u32 %s5376_s2, 4  ;;  %p3244_p7 = pnand %p3243_p6, %p3595_p1  ;;  %s180_s26 = int_to_ptr.hbm [resolvable:$true] %s179_s26 }
  0x12   : > { %s195_s10 = sshll.u32 %s3535_s9, 4  ;;  %s3537_s12 = smov 8   ;;  %s196_s10 = int_to_ptr.vmem [resolvable:$true] %s195_s10 }
  0x13   : > { %3246 = dma.hbm_to_vmem [thread:$0]  (!%p3244_p7), %s180_s26, 25600, %s182_s29, [#allocation6], %s3533_s7, %s3533_s7, %s3534_s8  }
  0x14   : > { %3249 = dma.hbm_to_vmem [thread:$0]  (!%p3244_p7), %s194_s6, 4096, %s196_s10, [#allocation9], %s5365_s11, %s5365_s11, %s3537_s12  }
  0x15   : > { %s33_s13 = sadd.s32 1, %s3526_s19  ;;  %s42_s14 = sadd.s32 1, %s3518_s17 }
  0x16   : > { %p35_p8 = scmp.ge.s32.totalorder %s33_s13, 2  ;;  %p49_p9 = scmp.ne.s32.totalorder %s3518_s17, %s3514_s16 }
  0x17   : > { %p50_p10 = scmp.eq.s32.totalorder %s3530_s20, 0  ;;  %p3259_p11 = scmp.lt.s32.totalorder %s3530_s20, 2 }
  0x18   : > { %s5683_s13 = smov (%p35_p8, %s33_s13), 0  ;;  %s209_s24 = sand.u32 1, %s3518_s17  }
  0x19   : > { %p3632_p12 = por %p50_p10, %p49_p9  ;;  %s37_s25 = ssub.s32 %s3526_s19, %s5683_s13 }
  0x1a   : > { %p40_p13 = scmp.eq.s32.totalorder %s37_s25, 0  ;;  %s2876_s26 = sshll.u32 %s209_s24, 7 }
  0x1b   : > { %s3230_s28 = smul.u32 144, %s3526_s19  ;;  %s213_s7 = scalar_lea.vmem [#allocation3], %s2876_s26 }
  0x1c   : > { %s3641_s29 = scalar_select %p40_p13, %s3518_s17, %s42_s14  }
  0x1d   : > { %s226_s6 = scalar_lea.hbm %s5359_s0, %s3230_s28  ;;  %s230_s8 = sshll.u32 %s213_s7, 4  ;;  %s231_s8 = int_to_ptr.vmem [resolvable:$true] %s230_s8 }
  0x1e   : > { %s228_s9 = sshll.u32 %s226_s6, 4  ;;  %p3251_p0 = pnand %p3259_p11, %p3632_p12  ;;  %s229_s9 = int_to_ptr.hbm [resolvable:$true] %s228_s9 }
  0x1f   : > { %s240_s10 = sand.u32 1, %s3530_s20   ;;  %s2878_s21 = sshll.u32 %s209_s24, 4 }
  0x20   : > { %s210_s11 = scalar_lea.sflag [#allocation4], %s209_s24  ;;  %s5379_s25 = smov 128  }
  0x21   : > { %3253 = dma.hbm_to_vmem [thread:$0]  (!%p3251_p0), %s229_s9, 2048, %s231_s8, %s210_s11, %s5379_s25, %s5379_s25, %s3537_s12  }
  0x22   : > { %s2781_s30 = scalar_lea.hbm %s5360_s1, %s3230_s28  ;;  %s244_s26 = scalar_lea.vmem [#allocation5], %s2878_s21 }
  0x23   : > { %s2782_s5 = scalar_lea.hbm %s2781_s30, 128  ;;  %s256_s7 = sshll.u32 %s244_s26, 4  ;;  %s257_s7 = int_to_ptr.vmem [resolvable:$true] %s256_s7 }
  0x24   : > { %s254_s6 = sshll.u32 %s2782_s5, 4  ;;  %s241_s15 = scalar_lea.sflag [#allocation6], %s240_s10  ;;  %s255_s6 = int_to_ptr.hbm [resolvable:$true] %s254_s6 }
  0x25   : > { %3256 = dma.hbm_to_vmem [thread:$0]  (!%p3251_p0), %s255_s6, 256, %s257_s7, %s241_s15, %s5379_s25, %s5379_s25, %s3537_s12  }
  0x26   : > { %268 = sbr.rel (%p3610_p5) target bundleno = 1215 (0x4bf), region = 36 }
  0x2b   : > { %s270_s11 = sand.u32 1, %s3514_s16  }
  0x2c   : > { %s2881_s24 = sshll.u32 %s270_s11, 7  ;;  %s271_s2 = scalar_lea.sflag [#allocation4], %s270_s11 }
  0x2d   : > { %s3663_s28 = scalar_lea.vmem [#allocation3], %s2881_s24 }
  0x2e   : > { %3493 = dma.done.wait (%p3603_p4), %s271_s2, 2048  }
  0x2f   : > { %3495 = vsyncadd (%p3603_p4), %s271_s2, 4294965248  ;;  %s5380_s21 = sadd.s32 4294967295, %s3530_s20   ;;  %s2882_s12 = sshll.u32 %s270_s11, 4 }
  0x30   : > { %s280_s8 = sand.u32 1, %s5380_s21   ;;  %s3671_s27 = scalar_lea.vmem [#allocation5], %s2882_s12 }
  0x31   : > { %s281_s9 = scalar_lea.sflag [#allocation6], %s280_s8 }
  0x32   : > { %3497 = dma.done.wait (%p3603_p4), %s281_s9, 256  }
  0x33   : > { %3499 = vsyncadd (%p3603_p4), %s281_s9, 4294967040 }
  0x34   : > { %3501 = dma.done.wait (%p3595_p1), [#allocation6], 25600  }
  0x35   : > { %3503 = vsyncadd (%p3595_p1), [#allocation6], 4294941696 }
  0x36   : > { %3505 = dma.done.wait (%p3595_p1), [#allocation9], 4096  }
  0x37   : > { %3507 = vsyncadd (%p3595_p1), [#allocation9], 4294963200  ;;  %vm360_vm0 = vcmask 654336   ;;  %v489_v0 = vld [vmem:[#allocation7 + $0x260] sm:$0xff]  ;;  %v490_v1 = vld [vmem:[#allocation7 + $0x268] sm:$0xff]  ;;  %p336_p1 = scmp.lt.s32.totalorder %s3522_s18, 1 }
  0x38   : > { %547 = vmatpush.msra.mxu0 %v489_v0  ;;  %3210 = vmatpush.msra.mxu2 %v489_v0  ;;  %v485_v2 = vld [vmem:[#allocation7 + $0x240] sm:$0xff]  ;;  %v486_v3 = vld [vmem:[#allocation7 + $0x248] sm:$0xff]  ;;  %v346_v16 = vld [vmem:[%s3663_s28 + $0x10] sm:$0xff]  ;;  %vm2715_vm1 = vcmask 89088  }
  0x39   : > { %612 = vmatpush.msra.mxu1 %v490_v1  ;;  %3220 = vmatpush.msra.mxu3 %v490_v1  ;;  %v481_v4 = vld [vmem:[#allocation7 + $0x220] sm:$0xff]  ;;  %v482_v5 = vld [vmem:[#allocation7 + $0x228] sm:$0xff]  ;;  %v354_v18 = vld [vmem:[%s3663_s28 + $0x50] sm:$0xff]  ;;  %363 = vst.msk [vmem:[#allocation2 + $0x10] sm:$0xff] %vm360_vm0, %v346_v16  ;;  %s5685_s18 = smov (!%p336_p1, %s3522_s18), 1 }
  0x3a   : > { %548 = vmatpush.msra.mxu0 %v485_v2  ;;  %3211 = vmatpush.msra.mxu2 %v485_v2  ;;  %v477_v6 = vld [vmem:[#allocation7 + $0x200] sm:$0xff]  ;;  %v478_v7 = vld [vmem:[#allocation7 + $0x208] sm:$0xff]  ;;  %v347_v20 = vld [vmem:[%s3663_s28 + $0x18] sm:$0xff]  ;;  %371 = vst.msk [vmem:[#allocation2 + $0x50] sm:$0xff] %vm360_vm0, %v354_v18  ;;  %s3209_s22 = sshll.u32 %s5685_s18, 7 }
  0x3b   : > { %613 = vmatpush.msra.mxu1 %v486_v3  ;;  %3221 = vmatpush.msra.mxu3 %v486_v3  ;;  %v473_v8 = vld [vmem:[#allocation7 + $0x1e0] sm:$0xff]  ;;  %v474_v9 = vld [vmem:[#allocation7 + $0x1e8] sm:$0xff]  ;;  %v355_v22 = vld [vmem:[%s3663_s28 + $0x58] sm:$0xff]  ;;  %364 = vst.msk [vmem:[#allocation2 + $0x18] sm:$0xff] %vm360_vm0, %v347_v20  ;;  %s5307_s25 = scalar_lea.vmem %s5363_s4, %s3209_s22 }
  0x3c   : > { %549 = vmatpush.msra.mxu0 %v481_v4  ;;  %3212 = vmatpush.msra.mxu2 %v481_v4  ;;  %v344_v10 = vld [vmem:[%s3663_s28] sm:$0xff]  ;;  %v345_v11 = vld [vmem:[%s3663_s28 + $0x8] sm:$0xff]  ;;  %372 = vst.msk [vmem:[#allocation2 + $0x58] sm:$0xff] %vm360_vm0, %v355_v22  ;;  %v491_v34 = vld [vmem:[#allocation7 + $0x270] sm:$0xff] }
  0x3d   : > { %614 = vmatpush.msra.mxu1 %v482_v5  ;;  %3222 = vmatpush.msra.mxu3 %v482_v5  ;;  %v352_v12 = vld [vmem:[%s3663_s28 + $0x40] sm:$0xff]  ;;  %361 = vst.msk [vmem:[#allocation2] sm:$0xff] %vm360_vm0, %v344_v10  ;;  %v353_v14 = vld [vmem:[%s3663_s28 + $0x48] sm:$0xff]  ;;  %v492_v35 = vld [vmem:[#allocation7 + $0x278] sm:$0xff] }
  0x3e   : > { %550 = vmatpush.msra.mxu0 %v477_v6  ;;  %3213 = vmatpush.msra.mxu2 %v477_v6  ;;  %v469_v13 = vld [vmem:[#allocation7 + $0x1c0] sm:$0xff]  ;;  %v470_v15 = vld [vmem:[#allocation7 + $0x1c8] sm:$0xff]  ;;  %362 = vst.msk [vmem:[#allocation2 + $0x8] sm:$0xff] %vm360_vm0, %v345_v11  ;;  %v350_v36 = vld [vmem:[%s3663_s28 + $0x30] sm:$0xff] }
  0x3f   : > { %615 = vmatpush.msra.mxu1 %v478_v7  ;;  %3223 = vmatpush.msra.mxu3 %v478_v7  ;;  %v465_v17 = vld [vmem:[#allocation7 + $0x1a0] sm:$0xff]  ;;  %369 = vst.msk [vmem:[#allocation2 + $0x40] sm:$0xff] %vm360_vm0, %v352_v12  ;;  %v466_v19 = vld [vmem:[#allocation7 + $0x1a8] sm:$0xff]  ;;  %v358_v37 = vld [vmem:[%s3663_s28 + $0x70] sm:$0xff] }
  0x40   : > { %551 = vmatpush.msra.mxu0 %v473_v8  ;;  %3214 = vmatpush.msra.mxu2 %v473_v8  ;;  %370 = vst.msk [vmem:[#allocation2 + $0x48] sm:$0xff] %vm360_vm0, %v353_v14  ;;  %v461_v21 = vld [vmem:[#allocation7 + $0x180] sm:$0xff]  ;;  %v462_v23 = vld [vmem:[#allocation7 + $0x188] sm:$0xff]  ;;  %v487_v38 = vld [vmem:[#allocation7 + $0x250] sm:$0xff] }
  0x41   : > { %616 = vmatpush.msra.mxu1 %v474_v9  ;;  %3224 = vmatpush.msra.mxu3 %v474_v9  ;;  %v348_v24 = vld [vmem:[%s3663_s28 + $0x20] sm:$0xff]  ;;  %v458_v27 = vld [vmem:[#allocation7 + $0x168] sm:$0xff]  ;;  %v488_v39 = vld [vmem:[#allocation7 + $0x258] sm:$0xff]  ;;  %367 = vst.msk [vmem:[#allocation2 + $0x30] sm:$0xff] %vm360_vm0, %v350_v36 }
  0x42   : > { %552 = vmatpush.msra.mxu0 %v469_v13  ;;  %3215 = vmatpush.msra.mxu2 %v469_v13  ;;  %v457_v25 = vld [vmem:[#allocation7 + $0x160] sm:$0xff]  ;;  %v349_v28 = vld [vmem:[%s3663_s28 + $0x28] sm:$0xff]  ;;  %365 = vst.msk [vmem:[#allocation2 + $0x20] sm:$0xff] %vm360_vm0, %v348_v24  ;;  %v483_v40 = vld [vmem:[#allocation7 + $0x230] sm:$0xff] }
  0x43   : > { %617 = vmatpush.msra.mxu1 %v470_v15  ;;  %3225 = vmatpush.msra.mxu3 %v470_v15  ;;  %v356_v26 = vld [vmem:[%s3663_s28 + $0x60] sm:$0xff]  ;;  %v357_v30 = vld [vmem:[%s3663_s28 + $0x68] sm:$0xff]  ;;  %366 = vst.msk [vmem:[#allocation2 + $0x28] sm:$0xff] %vm360_vm0, %v349_v28  ;;  %v484_v41 = vld [vmem:[#allocation7 + $0x238] sm:$0xff] }
  0x44   : > { %553 = vmatpush.msra.mxu0 %v465_v17  ;;  %3216 = vmatpush.msra.mxu2 %v465_v17  ;;  %v453_v29 = vld [vmem:[#allocation7 + $0x140] sm:$0xff]  ;;  %v454_v31 = vld [vmem:[#allocation7 + $0x148] sm:$0xff]  ;;  %373 = vst.msk [vmem:[#allocation2 + $0x60] sm:$0xff] %vm360_vm0, %v356_v26  ;;  %v479_v44 = vld [vmem:[#allocation7 + $0x210] sm:$0xff] }
  0x45   : > { %618 = vmatpush.msra.mxu1 %v466_v19  ;;  %3226 = vmatpush.msra.mxu3 %v466_v19  ;;  %v3707_v32 = vld [vmem:[#allocation2 + $0x1] sm:$0xff]  ;;  %374 = vst.msk [vmem:[#allocation2 + $0x68] sm:$0xff] %vm360_vm0, %v357_v30  ;;  %v3725_v42 = vld [vmem:[#allocation2 + $0x9] sm:$0xff]  ;;  %v434_v52 = vld [vmem:[#allocation7 + $0x128] sm:$0xff] }
  0x46   : > { %554 = vmatpush.msra.mxu0 %v461_v21  ;;  %3217 = vmatpush.msra.mxu2 %v461_v21  ;;  %375 = vst.msk [vmem:[#allocation2 + $0x70] sm:$0xff] %vm360_vm0, %v358_v37  ;;  %v480_v45 = vld [vmem:[#allocation7 + $0x218] sm:$0xff]  ;;  %v475_v48 = vld [vmem:[#allocation7 + $0x1f0] sm:$0xff]  ;;  %v433_v51 = vld [vmem:[#allocation7 + $0x120] sm:$0xff] }
  0x47   : > { %619 = vmatpush.msra.mxu1 %v462_v23  ;;  %3227 = vmatpush.msra.mxu3 %v462_v23  ;;  %v3709_v33 = vld [vmem:[#allocation2 + $0x41] sm:$0xff]  ;;  %v3727_v43 = vld [vmem:[#allocation2 + $0x49] sm:$0xff]  ;;  %v430_v55 = vld [vmem:[#allocation7 + $0x108] sm:$0xff] }
  0x48   : > { %555 = vmatpush.msra.mxu0 %v457_v25  ;;  %3218 = vmatpush.msra.mxu2 %v457_v25  ;;  %v351_v46 = vld [vmem:[%s3663_s28 + $0x38] sm:$0xff]  ;;  %v471_v50 = vld [vmem:[#allocation7 + $0x1d0] sm:$0xff]  ;;  %v429_v54 = vld [vmem:[#allocation7 + $0x100] sm:$0xff] }
  0x49   : > { %620 = vmatpush.msra.mxu1 %v458_v27  ;;  %3228 = vmatpush.msra.mxu3 %v458_v27  ;;  %v359_v47 = vld [vmem:[%s3663_s28 + $0x78] sm:$0xff]  ;;  %368 = vst.msk [vmem:[#allocation2 + $0x38] sm:$0xff] %vm360_vm0, %v351_v46  ;;  %v3741_v56 = vld [vmem:[#allocation2 + $0x11] sm:$0xff]  ;;  %v467_v58 = vld [vmem:[#allocation7 + $0x1b0] sm:$0xff] }
  0x4a   : > { %556 = vmatpush.msra.mxu0 %v453_v29  ;;  %3219 = vmatpush.msra.mxu2 %v453_v29  ;;  %v476_v49 = vld [vmem:[#allocation7 + $0x1f8] sm:$0xff]  ;;  %376 = vst.msk [vmem:[#allocation2 + $0x78] sm:$0xff] %vm360_vm0, %v359_v47  ;;  %v3743_v57 = vld [vmem:[#allocation2 + $0x51] sm:$0xff]  ;;  %v463_v60 = vld [vmem:[#allocation7 + $0x190] sm:$0xff] }
  0x4b   : > { %621 = vmatpush.msra.mxu1 %v454_v31  ;;  %3229 = vmatpush.msra.mxu3 %v454_v31  ;;  %v472_v53 = vld [vmem:[#allocation7 + $0x1d8] sm:$0xff]  ;;  %v377_v61 = vld [vmem:[%s3671_s27] sm:$0xff]  ;;  %v426_v0 = vld [vmem:[#allocation7 + $0xe8] sm:$0xff] }
  0x4c   : > { %2887 = vmatmul.msk.f32.vlgmr.msra.gmra.mxu0 %vm360_vm0, %v3707_v32  ;;  %2895 = vmatmul.msk.f32.vlgmr.msra.gmra.mxu2 %vm360_vm0, %v3709_v33  ;;  %v468_v59 = vld [vmem:[#allocation7 + $0x1b8] sm:$0xff]  ;;  %v425_v63 = vld [vmem:[#allocation7 + $0xe0] sm:$0xff]  ;;  %379 = vst.msk [vmem:[#allocation2 + $0x80] sm:$0xff] %vm360_vm0, %v377_v61  ;;  %v422_v2 = vld [vmem:[#allocation7 + $0xc8] sm:$0xff] }
  0x4d   : > { %2903 = vmatmul.msk.f32.vlgmr.msra.gmra.mxu1 %vm360_vm0, %v3707_v32  ;;  %2911 = vmatmul.msk.f32.vlgmr.msra.gmra.mxu3 %vm360_vm0, %v3709_v33  ;;  %v464_v62 = vld [vmem:[#allocation7 + $0x198] sm:$0xff]  ;;  %v421_v1 = vld [vmem:[#allocation7 + $0xc0] sm:$0xff]  ;;  %v459_v3 = vld [vmem:[#allocation7 + $0x170] sm:$0xff] }
  0x4e   : > { %677 = vmatpush.msrb.mxu2 %v491_v34  ;;  %742 = vmatpush.msrb.mxu3 %v492_v35  ;;  %v460_v4 = vld [vmem:[#allocation7 + $0x178] sm:$0xff]  ;;  %v417_v5 = vld [vmem:[#allocation7 + $0xa0] sm:$0xff]  ;;  %v418_v6 = vld [vmem:[#allocation7 + $0xa8] sm:$0xff] }
  0x4f   : > { %855 = vmatpush.msrb.mxu0 %v433_v51  ;;  %920 = vmatpush.msrb.mxu1 %v434_v52  ;;  %v3755_v7 = vld [vmem:[#allocation2 + $0x19] sm:$0xff]  ;;  %v413_v9 = vld [vmem:[#allocation7 + $0x80] sm:$0xff]  ;;  %v456_v14 = vld [vmem:[#allocation7 + $0x158] sm:$0xff] }
  0x50   : > { %678 = vmatpush.msrb.mxu2 %v487_v38  ;;  %743 = vmatpush.msrb.mxu3 %v488_v39  ;;  %v3757_v8 = vld [vmem:[#allocation2 + $0x59] sm:$0xff]  ;;  %v409_v11 = vld [vmem:[#allocation7 + $0x60] sm:$0xff]  ;;  %v3767_v17 = vld [vmem:[#allocation2 + $0x21] sm:$0xff] }
  0x51   : > { %856 = vmatpush.msrb.mxu0 %v429_v54  ;;  %921 = vmatpush.msrb.mxu1 %v430_v55  ;;  %v414_v10 = vld [vmem:[#allocation7 + $0x88] sm:$0xff]  ;;  %v455_v13 = vld [vmem:[#allocation7 + $0x150] sm:$0xff]  ;;  %v405_v15 = vld [vmem:[#allocation7 + $0x40] sm:$0xff] }
  0x52   : > { %679 = vmatpush.msrb.mxu2 %v483_v40  ;;  %744 = vmatpush.msrb.mxu3 %v484_v41  ;;  %v410_v12 = vld [vmem:[#allocation7 + $0x68] sm:$0xff]  ;;  %v3769_v18 = vld [vmem:[#allocation2 + $0x61] sm:$0xff]  ;;  %v401_v19 = vld [vmem:[#allocation7 + $0x20] sm:$0xff] }
  0x53   : > { %857 = vmatpush.msrb.mxu0 %v425_v63  ;;  %922 = vmatpush.msrb.mxu1 %v426_v0  ;;  %v406_v16 = vld [vmem:[#allocation7 + $0x48] sm:$0xff]  ;;  %v397_v21 = vld [vmem:[#allocation7] sm:$0xff]  ;;  %v435_v23 = vld [vmem:[#allocation7 + $0x130] sm:$0xff] }
  0x54   : > { %2888 = vmatmul.msk.f32.gmra.mxu0 %vm360_vm0, %v3725_v42  ;;  %2896 = vmatmul.msk.f32.gmra.mxu2 %vm360_vm0, %v3727_v43  ;;  %v402_v20 = vld [vmem:[#allocation7 + $0x28] sm:$0xff]  ;;  %v436_v24 = vld [vmem:[#allocation7 + $0x138] sm:$0xff]  ;;  %v431_v27 = vld [vmem:[#allocation7 + $0x110] sm:$0xff] }
  0x55   : > { %2904 = vmatmul.msk.f32.gmra.mxu1 %vm360_vm0, %v3725_v42  ;;  %2912 = vmatmul.msk.f32.gmra.mxu3 %vm360_vm0, %v3727_v43  ;;  %v398_v22 = vld [vmem:[#allocation7 + $0x8] sm:$0xff]  ;;  %v3779_v25 = vld [vmem:[#allocation2 + $0x29] sm:$0xff]  ;;  %v427_v35 = vld [vmem:[#allocation7 + $0xf0] sm:$0xff] }
  0x56   : > { %680 = vmatpush.msrb.mxu2 %v479_v44  ;;  %745 = vmatpush.msrb.mxu3 %v480_v45  ;;  %v3781_v26 = vld [vmem:[#allocation2 + $0x69] sm:$0xff]  ;;  %v3791_v29 = vld [vmem:[#allocation2 + $0x31] sm:$0xff]  ;;  %v3803_v31 = vld [vmem:[#allocation2 + $0x39] sm:$0xff] }
  0x57   : > { %858 = vmatpush.msrb.mxu0 %v421_v1  ;;  %923 = vmatpush.msrb.mxu1 %v422_v2  ;;  %v432_v28 = vld [vmem:[#allocation7 + $0x118] sm:$0xff]  ;;  %v3793_v30 = vld [vmem:[#allocation2 + $0x71] sm:$0xff]  ;;  %v3805_v34 = vld [vmem:[#allocation2 + $0x79] sm:$0xff] }
  0x58   : > { %681 = vmatpush.msrb.mxu2 %v475_v48  ;;  %746 = vmatpush.msrb.mxu3 %v476_v49  ;;  %v428_v36 = vld [vmem:[#allocation7 + $0xf8] sm:$0xff]  ;;  %v3815_v37 = vld [vmem:[#allocation2] sm:$0xff]  ;;  %v3835_v40 = vld [vmem:[#allocation2 + $0x10] sm:$0xff] }
  0x59   : > { %859 = vmatpush.msrb.mxu0 %v417_v5  ;;  %924 = vmatpush.msrb.mxu1 %v418_v6  ;;  %v423_v38 = vld [vmem:[#allocation7 + $0xd0] sm:$0xff]  ;;  %v3825_v39 = vld [vmem:[#allocation2 + $0x8] sm:$0xff]  ;;  %v3845_v44 = vld [vmem:[#allocation2 + $0x18] sm:$0xff] }
  0x5a   : > { %682 = vmatpush.msrb.mxu2 %v471_v50  ;;  %747 = vmatpush.msrb.mxu3 %v472_v53  ;;  %v419_v41 = vld [vmem:[#allocation7 + $0xb0] sm:$0xff]  ;;  %v416_v47 = vld [vmem:[#allocation7 + $0x98] sm:$0xff]  ;;  %v3875_v49 = vld [vmem:[#allocation2 + $0x30] sm:$0xff] }
  0x5b   : > { %860 = vmatpush.msrb.mxu0 %v413_v9  ;;  %925 = vmatpush.msrb.mxu1 %v414_v10  ;;  %v3855_v45 = vld [vmem:[#allocation2 + $0x20] sm:$0xff]  ;;  %v3865_v48 = vld [vmem:[#allocation2 + $0x28] sm:$0xff]  ;;  %v3885_v52 = vld [vmem:[#allocation2 + $0x38] sm:$0xff] }
  0x5c   : > { %2889 = vmatmul.msk.f32.gmra.mxu0 %vm360_vm0, %v3741_v56  ;;  %2897 = vmatmul.msk.f32.gmra.mxu2 %vm360_vm0, %v3743_v57  ;;  %v415_v46 = vld [vmem:[#allocation7 + $0x90] sm:$0xff]  ;;  %v412_v51 = vld [vmem:[#allocation7 + $0x78] sm:$0xff]  ;;  %v1161_v5 = vld [vmem:[#allocation7 + $0x3a0] sm:$0xff] }
  0x5d   : > { %2905 = vmatmul.msk.f32.gmra.mxu1 %vm360_vm0, %v3741_v56  ;;  %2913 = vmatmul.msk.f32.gmra.mxu3 %vm360_vm0, %v3743_v57  ;;  %v411_v50 = vld [vmem:[#allocation7 + $0x70] sm:$0xff]  ;;  %v408_v54 = vld [vmem:[#allocation7 + $0x58] sm:$0xff]  ;;  %v1162_v6 = vld [vmem:[#allocation7 + $0x3a8] sm:$0xff] }
  0x5e   : > { %683 = vmatpush.msrb.mxu2 %v467_v58  ;;  %748 = vmatpush.msrb.mxu3 %v468_v59  ;;  %v407_v53 = vld [vmem:[#allocation7 + $0x50] sm:$0xff]  ;;  %v1158_v9 = vld [vmem:[#allocation7 + $0x388] sm:$0xff]  ;;  %v1153_v10 = vld [vmem:[#allocation7 + $0x360] sm:$0xff] }
  0x5f   : > { %861 = vmatpush.msrb.mxu0 %v409_v11  ;;  %926 = vmatpush.msrb.mxu1 %v410_v12  ;;  %v403_v0 = vld [vmem:[#allocation7 + $0x30] sm:$0xff]  ;;  %v1154_v11 = vld [vmem:[#allocation7 + $0x368] sm:$0xff] }
  0x60   : > { %684 = vmatpush.msrb.mxu2 %v463_v60  ;;  %749 = vmatpush.msrb.mxu3 %v464_v62  ;;  %v3915_v62 = vld [vmem:[#allocation2 + $0x48] sm:$0xff] }
  0x61   : > { %862 = vmatpush.msrb.mxu0 %v405_v15  ;;  %927 = vmatpush.msrb.mxu1 %v406_v16  ;;  %v399_v16 = vld [vmem:[#allocation7 + $0x10] sm:$0xff] }
  0x62   : > { %685 = vmatpush.msrb.mxu2 %v459_v3  ;;  %750 = vmatpush.msrb.mxu3 %v460_v4  ;;  %v3933_v4 = vld [vmem:[#allocation2 + $0x50] sm:$0xff] }
  0x63   : > { %863 = vmatpush.msrb.mxu0 %v401_v19  ;;  %928 = vmatpush.msrb.mxu1 %v402_v20  ;;  %v3951_v19 = vld [vmem:[#allocation2 + $0x58] sm:$0xff]  ;;  %v400_v20 = vld [vmem:[#allocation7 + $0x18] sm:$0xff] }
  0x64   : > { %2890 = vmatmul.msk.f32.gmra.mxu0 %vm360_vm0, %v3755_v7  ;;  %2898 = vmatmul.msk.f32.gmra.mxu2 %vm360_vm0, %v3757_v8 }
  0x65   : > { %2906 = vmatmul.msk.f32.gmra.mxu1 %vm360_vm0, %v3755_v7  ;;  %2914 = vmatmul.msk.f32.gmra.mxu3 %vm360_vm0, %v3757_v8 }
  0x66   : > { %686 = vmatpush.msrb.mxu2 %v455_v13  ;;  %751 = vmatpush.msrb.mxu3 %v456_v14  ;;  %v1149_v13 = vld [vmem:[#allocation7 + $0x340] sm:$0xff]  ;;  %v1150_v14 = vld [vmem:[#allocation7 + $0x348] sm:$0xff] }
  0x67   : > { %864 = vmatpush.msrb.mxu0 %v397_v21  ;;  %929 = vmatpush.msrb.mxu1 %v398_v22  ;;  %v1145_v21 = vld [vmem:[#allocation7 + $0x320] sm:$0xff]  ;;  %v1146_v22 = vld [vmem:[#allocation7 + $0x328] sm:$0xff] }
  0x68   : > { %985 = vmatpush.msra.mxu2 %v435_v23  ;;  %1050 = vmatpush.msra.mxu3 %v436_v24  ;;  %v1141_v23 = vld [vmem:[#allocation7 + $0x300] sm:$0xff]  ;;  %v1142_v24 = vld [vmem:[#allocation7 + $0x308] sm:$0xff] }
  0x69   : > { %1219 = vmatpush.msra.mxu0 %v1161_v5  ;;  %1284 = vmatpush.msra.mxu1 %v1162_v6 }
  0x6a   : > { %986 = vmatpush.msra.mxu2 %v431_v27  ;;  %1051 = vmatpush.msra.mxu3 %v432_v28  ;;  %v1137_v27 = vld [vmem:[#allocation7 + $0x2e0] sm:$0xff]  ;;  %v1138_v28 = vld [vmem:[#allocation7 + $0x2e8] sm:$0xff] }
  0x6b   : > { %1285 = vmatpush.msra.mxu1 %v1158_v9 }
  0x6c   : > { %2891 = vmatmul.msk.f32.gmra.mxu0 %vm360_vm0, %v3767_v17  ;;  %2899 = vmatmul.msk.f32.gmra.mxu2 %vm360_vm0, %v3769_v18 }
  0x6d   : > { %2907 = vmatmul.msk.f32.gmra.mxu1 %vm360_vm0, %v3767_v17  ;;  %2915 = vmatmul.msk.f32.gmra.mxu3 %vm360_vm0, %v3769_v18 }
  0x6e   : > { %987 = vmatpush.msra.mxu2 %v427_v35  ;;  %1052 = vmatpush.msra.mxu3 %v428_v36  ;;  %v3969_v35 = vld [vmem:[#allocation2 + $0x60] sm:$0xff]  ;;  %v1133_v36 = vld [vmem:[#allocation7 + $0x2c0] sm:$0xff] }
  0x6f   : > { %1286 = vmatpush.msra.mxu1 %v1154_v11  ;;  %v1160_v11 = vld [vmem:[#allocation7 + $0x398] sm:$0xff] }
  0x70   : > { %988 = vmatpush.msra.mxu2 %v423_v38  ;;  %v1134_v38 = vld [vmem:[#allocation7 + $0x2c8] sm:$0xff] }
  0x71   : > { %1287 = vmatpush.msra.mxu1 %v1150_v14 }
  0x72   : > { %989 = vmatpush.msra.mxu2 %v419_v41  ;;  %v1130_v41 = vld [vmem:[#allocation7 + $0x2a8] sm:$0xff] }
  0x73   : > { %1288 = vmatpush.msra.mxu1 %v1146_v22 }
  0x74   : > { %2892 = vmatmul.msk.f32.gmra.mxu0 %vm360_vm0, %v3779_v25  ;;  %2900 = vmatmul.msk.f32.gmra.mxu2 %vm360_vm0, %v3781_v26 }
  0x75   : > { %2908 = vmatmul.msk.f32.gmra.mxu1 %vm360_vm0, %v3779_v25  ;;  %2916 = vmatmul.msk.f32.gmra.mxu3 %vm360_vm0, %v3781_v26 }
  0x76   : > { %990 = vmatpush.msra.mxu2 %v415_v46  ;;  %1289 = vmatpush.msra.mxu1 %v1142_v24  ;;  %v1164_v46 = vld [vmem:[#allocation7 + $0x3b8] sm:$0xff] }
  0x78   : > { %991 = vmatpush.msra.mxu2 %v411_v50  ;;  %1290 = vmatpush.msra.mxu1 %v1138_v28  ;;  %v1125_v50 = vld [vmem:[#allocation7 + $0x280] sm:$0xff] }
  0x7a   : > { %992 = vmatpush.msra.mxu2 %v407_v53  ;;  %1291 = vmatpush.msra.mxu1 %v1134_v38 }
  0x7c   : > { %2893 = vmatmul.msk.f32.gmra.mxu0 %vm360_vm0, %v3791_v29  ;;  %2901 = vmatmul.msk.f32.gmra.mxu2 %vm360_vm0, %v3793_v30 }
  0x7d   : > { %2909 = vmatmul.msk.f32.gmra.mxu1 %vm360_vm0, %v3791_v29  ;;  %2917 = vmatmul.msk.f32.gmra.mxu3 %vm360_vm0, %v3793_v30 }
  0x7e   : > { %993 = vmatpush.msra.mxu2 %v403_v0  ;;  %1292 = vmatpush.msra.mxu1 %v1130_v41 }
  0x80   : > { %994 = vmatpush.msra.mxu2 %v399_v16  ;;  %v4023_v16 = vld [vmem:[#allocation2 + $0x78] sm:$0xff] }
  0x84   : > { %2894 = vmatmul.msk.f32.gmra.mxu0 %vm360_vm0, %v3803_v31  ;;  %2902 = vmatmul.msk.f32.gmra.mxu2 %vm360_vm0, %v3805_v34 }
  0x85   : > { %2910 = vmatmul.msk.f32.gmra.mxu1 %vm360_vm0, %v3803_v31  ;;  %2918 = vmatmul.msk.f32.gmra.mxu3 %vm360_vm0, %v3805_v34 }
  0x8c   : > { %2919 = vmatmul.msk.f32.vlgmr.msrb.gmra.mxu2 %vm360_vm0, %v3707_v32  ;;  %2951 = vmatmul.msk.f32.vlgmr.msrb.gmra.mxu0 %vm360_vm0, %v3815_v37 }
  0x8d   : > { %2935 = vmatmul.msk.f32.vlgmr.msrb.gmra.mxu3 %vm360_vm0, %v3707_v32  ;;  %2967 = vmatmul.msk.f32.vlgmr.msrb.gmra.mxu1 %vm360_vm0, %v3815_v37  ;;  %v424_v32 = vld [vmem:[#allocation7 + $0xd8] sm:$0xff] }
  0x8e   : > { %1053 = vmatpush.msra.mxu3 %v424_v32  ;;  %v1129_v32 = vld [vmem:[#allocation7 + $0x2a0] sm:$0xff] }
  0x94   : > { %2920 = vmatmul.msk.f32.gmra.mxu2 %vm360_vm0, %v3725_v42  ;;  %2952 = vmatmul.msk.f32.gmra.mxu0 %vm360_vm0, %v3825_v39 }
  0x95   : > { %2936 = vmatmul.msk.f32.gmra.mxu3 %vm360_vm0, %v3725_v42  ;;  %2968 = vmatmul.msk.f32.gmra.mxu1 %vm360_vm0, %v3825_v39  ;;  %v420_v42 = vld [vmem:[#allocation7 + $0xb8] sm:$0xff] }
  0x96   : > { %1054 = vmatpush.msra.mxu3 %v420_v42  ;;  %v1163_v42 = vld [vmem:[#allocation7 + $0x3b0] sm:$0xff] }
  0x97   : > { %1349 = vmatpush.msrb.mxu2 %v1163_v42  ;;  %v1151_v42 = vld [vmem:[#allocation7 + $0x350] sm:$0xff] }
  0x98   : > { %1055 = vmatpush.msra.mxu3 %v416_v47 }
  0x9a   : > { %1056 = vmatpush.msra.mxu3 %v412_v51  ;;  %v1126_v51 = vld [vmem:[#allocation7 + $0x288] sm:$0xff] }
  0x9b   : > { %1293 = vmatpush.msra.mxu1 %v1126_v51 }
  0x9c   : > { %2921 = vmatmul.msk.f32.gmra.mxu2 %vm360_vm0, %v3741_v56  ;;  %2953 = vmatmul.msk.f32.gmra.mxu0 %vm360_vm0, %v3835_v40 }
  0x9d   : > { %2937 = vmatmul.msk.f32.gmra.mxu3 %vm360_vm0, %v3741_v56  ;;  %2969 = vmatmul.msk.f32.gmra.mxu1 %vm360_vm0, %v3835_v40  ;;  %v3897_v56 = vld [vmem:[#allocation2 + $0x40] sm:$0xff] }
  0x9e   : > { %1057 = vmatpush.msra.mxu3 %v408_v54 }
  0xa4   : > { %2922 = vmatmul.msk.f32.gmra.mxu2 %vm360_vm0, %v3755_v7  ;;  %2954 = vmatmul.msk.f32.gmra.mxu0 %vm360_vm0, %v3845_v44 }
  0xa5   : > { %2938 = vmatmul.msk.f32.gmra.mxu3 %vm360_vm0, %v3755_v7  ;;  %2970 = vmatmul.msk.f32.gmra.mxu1 %vm360_vm0, %v3845_v44 }
  0xac   : > { %2923 = vmatmul.msk.f32.gmra.mxu2 %vm360_vm0, %v3767_v17  ;;  %2955 = vmatmul.msk.f32.gmra.mxu0 %vm360_vm0, %v3855_v45 }
  0xad   : > { %2939 = vmatmul.msk.f32.gmra.mxu3 %vm360_vm0, %v3767_v17  ;;  %2971 = vmatmul.msk.f32.gmra.mxu1 %vm360_vm0, %v3855_v45 }
  0xb4   : > { %2924 = vmatmul.msk.f32.gmra.mxu2 %vm360_vm0, %v3779_v25  ;;  %2956 = vmatmul.msk.f32.gmra.mxu0 %vm360_vm0, %v3865_v48 }
  0xb5   : > { %2940 = vmatmul.msk.f32.gmra.mxu3 %vm360_vm0, %v3779_v25  ;;  %2972 = vmatmul.msk.f32.gmra.mxu1 %vm360_vm0, %v3865_v48 }
  0xbc   : > { %2925 = vmatmul.msk.f32.gmra.mxu2 %vm360_vm0, %v3791_v29  ;;  %2957 = vmatmul.msk.f32.gmra.mxu0 %vm360_vm0, %v3875_v49 }
  0xbd   : > { %2941 = vmatmul.msk.f32.gmra.mxu3 %vm360_vm0, %v3791_v29  ;;  %2973 = vmatmul.msk.f32.gmra.mxu1 %vm360_vm0, %v3875_v49 }
  0xc4   : > { %2926 = vmatmul.msk.f32.gmra.mxu2 %vm360_vm0, %v3803_v31  ;;  %2958 = vmatmul.msk.f32.gmra.mxu0 %vm360_vm0, %v3885_v52 }
  0xc5   : > { %2942 = vmatmul.msk.f32.gmra.mxu3 %vm360_vm0, %v3803_v31  ;;  %2974 = vmatmul.msk.f32.gmra.mxu1 %vm360_vm0, %v3885_v52 }
  0xc9   : > { %v3895_v55 = vpop.f32.mrf.mxu0 }
  0xca   : > { %5381 = vst [vmem:[#allocation14_spill] sm:$0xff] %v3895_v55  ;;  %v3899_v58 = vpop.f32.mrf.mxu1 }
  0xcb   : > { %5382 = vst [vmem:[#allocation15_spill] sm:$0xff] %v3899_v58  ;;  %v4405_v58 = vld [vmem:[#allocation2 + $0x2b] sm:$0xff] }
  0xcc   : > { %2927 = vmatmul.msk.f32.gmra.mxu2 %vm360_vm0, %v3709_v33  ;;  %2959 = vmatmul.msk.f32.gmra.mxu0 %vm360_vm0, %v3897_v56 }
  0xcd   : > { %2943 = vmatmul.msk.f32.gmra.mxu3 %vm360_vm0, %v3709_v33  ;;  %2975 = vmatmul.msk.f32.gmra.mxu1 %vm360_vm0, %v3897_v56  ;;  %v404_v33 = vld [vmem:[#allocation7 + $0x38] sm:$0xff] }
  0xce   : > { %1058 = vmatpush.msra.mxu3 %v404_v33 }
  0xcf   : > { %v3909_v59 = vpop.f32.mrf.mxu2 }
  0xd0   : > { %5383 = vst [vmem:[#allocation16_spill] sm:$0xff] %v3909_v59  ;;  %v3911_v60 = vpop.f32.mrf.mxu3  ;;  %1059 = vmatpush.msra.mxu3 %v400_v20  ;;  %v4165_v59 = vld [vmem:[#allocation2 + $0x3a] sm:$0xff] }
  0xd1   : > { %5384 = vst [vmem:[#allocation17_spill] sm:$0xff] %v3911_v60  ;;  %v3913_v61 = vpop.f32.mrf.mxu0 }
  0xd2   : > { %5385 = vst [vmem:[#allocation18_spill] sm:$0xff] %v3913_v61  ;;  %v3917_v63 = vpop.f32.mrf.mxu1  ;;  %1414 = vmatpush.msrb.mxu3 %v1164_v46  ;;  %v1576_v61 = vld [vmem:[#allocation7 + $0x478] sm:$0xff] }
  0xd3   : > { %5386 = vst [vmem:[#allocation19_spill] sm:$0xff] %v3917_v63  ;;  %v4373_v63 = vld [vmem:[#allocation2 + $0x1b] sm:$0xff] }
  0xd4   : > { %2928 = vmatmul.msk.f32.gmra.mxu2 %vm360_vm0, %v3727_v43  ;;  %2960 = vmatmul.msk.f32.gmra.mxu0 %vm360_vm0, %v3915_v62 }
  0xd5   : > { %2944 = vmatmul.msk.f32.gmra.mxu3 %vm360_vm0, %v3727_v43  ;;  %2976 = vmatmul.msk.f32.gmra.mxu1 %vm360_vm0, %v3915_v62  ;;  %v1157_v43 = vld [vmem:[#allocation7 + $0x380] sm:$0xff] }
  0xd6   : > { %1220 = vmatpush.msra.mxu0 %v1157_v43  ;;  %v4005_v43 = vld [vmem:[#allocation2 + $0x70] sm:$0xff]  ;;  %1415 = vmatpush.msrb.mxu3 %v1160_v11 }
  0xd7   : > { %v3927_v1 = vpop.f32.mrf.mxu2 }
  0xd8   : > { %5387 = vst [vmem:[#allocation20_spill] sm:$0xff] %v3927_v1  ;;  %v3929_v2 = vpop.f32.mrf.mxu3  ;;  %1221 = vmatpush.msra.mxu0 %v1153_v10  ;;  %v1159_v10 = vld [vmem:[#allocation7 + $0x390] sm:$0xff]  ;;  %v1140_v1 = vld [vmem:[#allocation7 + $0x2f8] sm:$0xff] }
  0xd9   : > { %5388 = vst [vmem:[#allocation21_spill] sm:$0xff] %v3929_v2  ;;  %v3931_v3 = vpop.f32.mrf.mxu0  ;;  %1350 = vmatpush.msrb.mxu2 %v1159_v10  ;;  %v4077_v10 = vld [vmem:[#allocation2 + $0x12] sm:$0xff]  ;;  %v1139_v2 = vld [vmem:[#allocation7 + $0x2f0] sm:$0xff] }
  0xda   : > { %5389 = vst [vmem:[#allocation22_spill] sm:$0xff] %v3931_v3  ;;  %v3935_v7 = vpop.f32.mrf.mxu1  ;;  %1222 = vmatpush.msra.mxu0 %v1149_v13 }
  0xdb   : > { %5390 = vst [vmem:[#allocation23_spill] sm:$0xff] %v3935_v7 }
  0xdc   : > { %2929 = vmatmul.msk.f32.gmra.mxu2 %vm360_vm0, %v3743_v57  ;;  %2961 = vmatmul.msk.f32.gmra.mxu0 %vm360_vm0, %v3933_v4 }
  0xdd   : > { %2945 = vmatmul.msk.f32.gmra.mxu3 %vm360_vm0, %v3743_v57  ;;  %2977 = vmatmul.msk.f32.gmra.mxu1 %vm360_vm0, %v3933_v4 }
  0xde   : > { %1223 = vmatpush.msra.mxu0 %v1145_v21 }
  0xdf   : > { %v3945_v12 = vpop.f32.mrf.mxu2 }
  0xe0   : > { %5391 = vst [vmem:[#allocation24_spill] sm:$0xff] %v3945_v12  ;;  %v3947_v15 = vpop.f32.mrf.mxu3  ;;  %1224 = vmatpush.msra.mxu0 %v1141_v23  ;;  %v1156_v23 = vld [vmem:[#allocation7 + $0x378] sm:$0xff] }
  0xe1   : > { %5392 = vst [vmem:[#allocation25_spill] sm:$0xff] %v3947_v15  ;;  %v3949_v17 = vpop.f32.mrf.mxu0  ;;  %1416 = vmatpush.msrb.mxu3 %v1156_v23  ;;  %v1147_v23 = vld [vmem:[#allocation7 + $0x330] sm:$0xff] }
  0xe2   : > { %5393 = vst [vmem:[#allocation26_spill] sm:$0xff] %v3949_v17  ;;  %v3953_v57 = vpop.f32.mrf.mxu1  ;;  %1225 = vmatpush.msra.mxu0 %v1137_v27  ;;  %v4041_v27 = vld [vmem:[#allocation2 + $0x2] sm:$0xff] }
  0xe3   : > { %5394 = vst [vmem:[#allocation27_spill] sm:$0xff] %v3953_v57  ;;  %v1562_v57 = vld [vmem:[#allocation7 + $0x408] sm:$0xff] }
  0xe4   : > { %2930 = vmatmul.msk.f32.gmra.mxu2 %vm360_vm0, %v3757_v8  ;;  %2962 = vmatmul.msk.f32.gmra.mxu0 %vm360_vm0, %v3951_v19 }
  0xe5   : > { %2946 = vmatmul.msk.f32.gmra.mxu3 %vm360_vm0, %v3757_v8  ;;  %2978 = vmatmul.msk.f32.gmra.mxu1 %vm360_vm0, %v3951_v19 }
  0xe6   : > { %1226 = vmatpush.msra.mxu0 %v1133_v36 }
  0xe7   : > { %v3963_v25 = vpop.f32.mrf.mxu2 }
  0xe8   : > { %5395 = vst [vmem:[#allocation28_spill] sm:$0xff] %v3963_v25  ;;  %v3965_v29 = vpop.f32.mrf.mxu3  ;;  %1227 = vmatpush.msra.mxu0 %v1129_v32  ;;  %v4059_v32 = vld [vmem:[#allocation2 + $0xa] sm:$0xff] }
  0xe9   : > { %5396 = vst [vmem:[#allocation29_spill] sm:$0xff] %v3965_v29  ;;  %v3967_v31 = vpop.f32.mrf.mxu0  ;;  %v4131_v29 = vld [vmem:[#allocation2 + $0x2a] sm:$0xff] }
  0xea   : > { %5397 = vst [vmem:[#allocation30_spill] sm:$0xff] %v3967_v31  ;;  %v3971_v8 = vpop.f32.mrf.mxu1  ;;  %1228 = vmatpush.msra.mxu0 %v1125_v50 }
  0xeb   : > { %5398 = vst [vmem:[#allocation31_spill] sm:$0xff] %v3971_v8  ;;  %v1127_v8 = vld [vmem:[#allocation7 + $0x290] sm:$0xff] }
  0xec   : > { %2931 = vmatmul.msk.f32.gmra.mxu2 %vm360_vm0, %v3769_v18  ;;  %2963 = vmatmul.msk.f32.gmra.mxu0 %vm360_vm0, %v3969_v35 }
  0xed   : > { %2947 = vmatmul.msk.f32.gmra.mxu3 %vm360_vm0, %v3769_v18  ;;  %2979 = vmatmul.msk.f32.gmra.mxu1 %vm360_vm0, %v3969_v35  ;;  %v3987_v18 = vld [vmem:[#allocation2 + $0x68] sm:$0xff] }
  0xef   : > { %v3981_v47 = vpop.f32.mrf.mxu2 }
  0xf0   : > { %5399 = vst [vmem:[#allocation32_spill] sm:$0xff] %v3981_v47  ;;  %v3983_v53 = vpop.f32.mrf.mxu3 }
  0xf1   : > { %5400 = vst [vmem:[#allocation33_spill] sm:$0xff] %v3983_v53  ;;  %v3985_v54 = vpop.f32.mrf.mxu0 }
  0xf2   : > { %5401 = vst [vmem:[#allocation34_spill] sm:$0xff] %v3985_v54  ;;  %v3989_v0 = vpop.f32.mrf.mxu1  ;;  %v1590_v54 = vld [vmem:[#allocation7 + $0x4e8] sm:$0xff] }
  0xf3   : > { %5402 = vst [vmem:[#allocation35_spill] sm:$0xff] %v3989_v0  ;;  %v4219_v0 = vld [vmem:[#allocation2 + $0x52] sm:$0xff]  ;;  %1712 = vmatpush.msrb.mxu1 %v1590_v54 }
  0xf4   : > { %2932 = vmatmul.msk.f32.gmra.mxu2 %vm360_vm0, %v3781_v26  ;;  %2964 = vmatmul.msk.f32.gmra.mxu0 %vm360_vm0, %v3987_v18  ;;  %v1577_v54 = vld [vmem:[#allocation7 + $0x480] sm:$0xff] }
  0xf5   : > { %2948 = vmatmul.msk.f32.gmra.mxu3 %vm360_vm0, %v3781_v26  ;;  %2980 = vmatmul.msk.f32.gmra.mxu1 %vm360_vm0, %v3987_v18 }
  0xf7   : > { %v3999_v33 = vpop.f32.mrf.mxu2 }
  0xf8   : > { %5403 = vst [vmem:[#allocation36_spill] sm:$0xff] %v3999_v33  ;;  %v4001_v5 = vpop.f32.mrf.mxu3 }
  0xf9   : > { %5404 = vst [vmem:[#allocation37_spill] sm:$0xff] %v4001_v5  ;;  %v4003_v6 = vpop.f32.mrf.mxu0 }
  0xfa   : > { %5405 = vst [vmem:[#allocation38_spill] sm:$0xff] %v4003_v6  ;;  %v4007_v9 = vpop.f32.mrf.mxu1 }
  0xfb   : > { %5406 = vst [vmem:[#allocation39_spill] sm:$0xff] %v4007_v9 }
  0xfc   : > { %2933 = vmatmul.msk.f32.gmra.mxu2 %vm360_vm0, %v3793_v30  ;;  %2965 = vmatmul.msk.f32.gmra.mxu0 %vm360_vm0, %v4005_v43 }
  0xfd   : > { %2949 = vmatmul.msk.f32.gmra.mxu3 %vm360_vm0, %v3793_v30  ;;  %2981 = vmatmul.msk.f32.gmra.mxu1 %vm360_vm0, %v4005_v43  ;;  %v1155_v30 = vld [vmem:[#allocation7 + $0x370] sm:$0xff] }
  0xfe   : > { %1351 = vmatpush.msrb.mxu2 %v1155_v30 }
  0xff   : > { %v4017_v26 = vpop.f32.mrf.mxu2 }
 0x100   : > { %5407 = vst [vmem:[#allocation40_spill] sm:$0xff] %v4017_v26  ;;  %v4019_v13 = vpop.f32.mrf.mxu3  ;;  %1352 = vmatpush.msrb.mxu2 %v1151_v42  ;;  %v4113_v26 = vld [vmem:[#allocation2 + $0x22] sm:$0xff] }
 0x101   : > { %5408 = vst [vmem:[#allocation41_spill] sm:$0xff] %v4019_v13  ;;  %v4021_v14 = vpop.f32.mrf.mxu0 }
 0x102   : > { %5409 = vst [vmem:[#allocation42_spill] sm:$0xff] %v4021_v14  ;;  %v4025_v20 = vpop.f32.mrf.mxu1  ;;  %1353 = vmatpush.msrb.mxu2 %v1147_v23 }
 0x103   : > { %5410 = vst [vmem:[#allocation43_spill] sm:$0xff] %v4025_v20 }
 0x104   : > { %2934 = vmatmul.msk.f32.gmra.mxu2 %vm360_vm0, %v3805_v34  ;;  %2966 = vmatmul.msk.f32.gmra.mxu0 %vm360_vm0, %v4023_v16 }
 0x105   : > { %2950 = vmatmul.msk.f32.gmra.mxu3 %vm360_vm0, %v3805_v34  ;;  %2982 = vmatmul.msk.f32.gmra.mxu1 %vm360_vm0, %v4023_v16 }
 0x107   : > { %v4035_v21 = vpop.f32.mrf.mxu2 }
 0x108   : > { %5411 = vst [vmem:[#allocation44_spill] sm:$0xff] %v4035_v21  ;;  %v4037_v22 = vpop.f32.mrf.mxu3  ;;  %v1148_v21 = vld [vmem:[#allocation7 + $0x338] sm:$0xff] }
 0x109   : > { %5412 = vst [vmem:[#allocation45_spill] sm:$0xff] %v4037_v22  ;;  %v4039_v24 = vpop.f32.mrf.mxu0 }
 0x10a   : > { %5413 = vst [vmem:[#allocation46_spill] sm:$0xff] %v4039_v24  ;;  %v4043_v28 = vpop.f32.mrf.mxu1 }
 0x10b   : > { %5414 = vst [vmem:[#allocation47_spill] sm:$0xff] %v4043_v28  ;;  %v4391_v28 = vld [vmem:[#allocation2 + $0x23] sm:$0xff] }
 0x10c   : > { %2983 = vmatmul.msk.f32.vlgmr.msra.gmra.mxu2 %vm360_vm0, %v3815_v37  ;;  %3015 = vmatmul.msk.f32.vlgmr.msra.gmra.mxu0 %vm360_vm0, %v4041_v27 }
 0x10d   : > { %2999 = vmatmul.msk.f32.vlgmr.msra.gmra.mxu3 %vm360_vm0, %v3815_v37  ;;  %3031 = vmatmul.msk.f32.vlgmr.msra.gmra.mxu1 %vm360_vm0, %v4041_v27  ;;  %v1152_v37 = vld [vmem:[#allocation7 + $0x358] sm:$0xff] }
 0x10e   : > { %1417 = vmatpush.msrb.mxu3 %v1152_v37  ;;  %v4095_v37 = vld [vmem:[#allocation2 + $0x1a] sm:$0xff] }
 0x10f   : > { %v4053_v34 = vpop.f32.mrf.mxu2 }
 0x110   : > { %v4055_v36 = vpop.f32.mrf.mxu3  ;;  %1418 = vmatpush.msrb.mxu3 %v1148_v21  ;;  %v1144_v21 = vld [vmem:[#allocation7 + $0x318] sm:$0xff] }
 0x111   : > { %v4057_v38 = vpop.f32.mrf.mxu0 }
 0x112   : > { %5415 = vst [vmem:[#allocation48_spill] sm:$0xff] %v4057_v38  ;;  %v4061_v41 = vpop.f32.mrf.mxu1  ;;  %1419 = vmatpush.msrb.mxu3 %v1144_v21  ;;  %v4147_v21 = vld [vmem:[#allocation2 + $0x32] sm:$0xff]  ;;  %v1575_v38 = vld [vmem:[#allocation7 + $0x470] sm:$0xff] }
 0x113   : > { %5416 = vst [vmem:[#allocation49_spill] sm:$0xff] %v4061_v41  ;;  %v4355_v41 = vld [vmem:[#allocation2 + $0x13] sm:$0xff] }
 0x114   : > { %2984 = vmatmul.msk.f32.gmra.mxu2 %vm360_vm0, %v3825_v39  ;;  %3016 = vmatmul.msk.f32.gmra.mxu0 %vm360_vm0, %v4059_v32 }
 0x115   : > { %3000 = vmatmul.msk.f32.gmra.mxu3 %vm360_vm0, %v3825_v39  ;;  %3032 = vmatmul.msk.f32.gmra.mxu1 %vm360_vm0, %v4059_v32 }
 0x116   : > { %1420 = vmatpush.msrb.mxu3 %v1140_v1  ;;  %v1135_v1 = vld [vmem:[#allocation7 + $0x2d0] sm:$0xff] }
 0x117   : > { %v4071_v46 = vpop.f32.mrf.mxu2 }
 0x118   : > { %v4073_v50 = vpop.f32.mrf.mxu3 }
 0x119   : > { %v4075_v51 = vpop.f32.mrf.mxu0 }
 0x11a   : > { %5417 = vst [vmem:[#allocation50_spill] sm:$0xff] %v4075_v51  ;;  %v4079_v11 = vpop.f32.mrf.mxu1 }
 0x11b   : > { %5418 = vst [vmem:[#allocation51_spill] sm:$0xff] %v4079_v11 }
 0x11c   : > { %2985 = vmatmul.msk.f32.gmra.mxu2 %vm360_vm0, %v3835_v40  ;;  %3017 = vmatmul.msk.f32.gmra.mxu0 %vm360_vm0, %v4077_v10 }
 0x11d   : > { %3001 = vmatmul.msk.f32.gmra.mxu3 %vm360_vm0, %v3835_v40  ;;  %3033 = vmatmul.msk.f32.gmra.mxu1 %vm360_vm0, %v4077_v10 }
 0x11f   : > { %v4089_v39 = vpop.f32.mrf.mxu2 }
 0x120   : > { %v4091_v30 = vpop.f32.mrf.mxu3 }
 0x121   : > { %v4093_v42 = vpop.f32.mrf.mxu0 }
 0x122   : > { %5419 = vst [vmem:[#allocation52_spill] sm:$0xff] %v4093_v42  ;;  %v4097_v22 = vpop.f32.mrf.mxu1 }
 0x123   : > { %5420 = vst [vmem:[#allocation53_spill] sm:$0xff] %v4097_v22  ;;  %v4251_v22 = vld [vmem:[#allocation2 + $0x62] sm:$0xff] }
 0x124   : > { %2986 = vmatmul.msk.f32.gmra.mxu2 %vm360_vm0, %v3845_v44  ;;  %3018 = vmatmul.msk.f32.gmra.mxu0 %vm360_vm0, %v4095_v37 }
 0x125   : > { %3002 = vmatmul.msk.f32.gmra.mxu3 %vm360_vm0, %v3845_v44  ;;  %3034 = vmatmul.msk.f32.gmra.mxu1 %vm360_vm0, %v4095_v37  ;;  %v1143_v44 = vld [vmem:[#allocation7 + $0x310] sm:$0xff] }
 0x126   : > { %1354 = vmatpush.msrb.mxu2 %v1143_v44 }
 0x127   : > { %v4107_v40 = vpop.f32.mrf.mxu2 }
 0x128   : > { %v4109_v13 = vpop.f32.mrf.mxu3  ;;  %1355 = vmatpush.msrb.mxu2 %v1139_v2 }
 0x129   : > { %v4111_v23 = vpop.f32.mrf.mxu0 }
 0x12a   : > { %5421 = vst [vmem:[#allocation54_spill] sm:$0xff] %v4111_v23  ;;  %v4115_v5 = vpop.f32.mrf.mxu1  ;;  %1356 = vmatpush.msrb.mxu2 %v1135_v1  ;;  %v4233_v23 = vld [vmem:[#allocation2 + $0x5a] sm:$0xff] }
 0x12b   : > { %5422 = vst [vmem:[#allocation55_spill] sm:$0xff] %v4115_v5  ;;  %v1586_v5 = vld [vmem:[#allocation7 + $0x4c8] sm:$0xff] }
 0x12c   : > { %2987 = vmatmul.msk.f32.gmra.mxu2 %vm360_vm0, %v3855_v45  ;;  %3019 = vmatmul.msk.f32.gmra.mxu0 %vm360_vm0, %v4113_v26 }
 0x12d   : > { %3003 = vmatmul.msk.f32.gmra.mxu3 %vm360_vm0, %v3855_v45  ;;  %3035 = vmatmul.msk.f32.gmra.mxu1 %vm360_vm0, %v4113_v26 }
 0x12e   : > { %1713 = vmatpush.msrb.mxu1 %v1586_v5  ;;  %v1574_v5 = vld [vmem:[#allocation7 + $0x468] sm:$0xff] }
 0x12f   : > { %v4125_v33 = vpop.f32.mrf.mxu2 }
 0x130   : > { %v4127_v53 = vpop.f32.mrf.mxu3 }
 0x131   : > { %v4129_v47 = vpop.f32.mrf.mxu0 }
 0x132   : > { %5423 = vst [vmem:[#allocation56_spill] sm:$0xff] %v4129_v47  ;;  %v4133_v25 = vpop.f32.mrf.mxu1  ;;  %v1589_v47 = vld [vmem:[#allocation7 + $0x4e0] sm:$0xff] }
 0x133   : > { %5424 = vst [vmem:[#allocation57_spill] sm:$0xff] %v4133_v25  ;;  %1647 = vmatpush.msrb.mxu0 %v1589_v47 }
 0x134   : > { %2988 = vmatmul.msk.f32.gmra.mxu2 %vm360_vm0, %v3865_v48  ;;  %3020 = vmatmul.msk.f32.gmra.mxu0 %vm360_vm0, %v4131_v29 }
 0x135   : > { %3004 = vmatmul.msk.f32.gmra.mxu3 %vm360_vm0, %v3865_v48  ;;  %3036 = vmatmul.msk.f32.gmra.mxu1 %vm360_vm0, %v4131_v29 }
 0x137   : > { %v4143_v45 = vpop.f32.mrf.mxu2 }
 0x138   : > { %v4145_v44 = vpop.f32.mrf.mxu3 }
 0x139   : > { %v4149_v15 = vpop.f32.mrf.mxu0 }
 0x13a   : > { %5425 = vst [vmem:[#allocation58_spill] sm:$0xff] %v4149_v15  ;;  %v4151_v12 = vpop.f32.mrf.mxu1  ;;  %v1131_v15 = vld [vmem:[#allocation7 + $0x2b0] sm:$0xff] }
 0x13b   : > { %5426 = vst [vmem:[#allocation59_spill] sm:$0xff] %v4151_v12  ;;  %v4183_v12 = vld [vmem:[#allocation2 + $0x42] sm:$0xff]  ;;  %1357 = vmatpush.msrb.mxu2 %v1131_v15  ;;  %v1581_v15 = vld [vmem:[#allocation7 + $0x4a0] sm:$0xff] }
 0x13c   : > { %2989 = vmatmul.msk.f32.gmra.mxu2 %vm360_vm0, %v3875_v49  ;;  %3021 = vmatmul.msk.f32.gmra.mxu0 %vm360_vm0, %v4147_v21 }
 0x13d   : > { %3005 = vmatmul.msk.f32.gmra.mxu3 %vm360_vm0, %v3875_v49  ;;  %3037 = vmatmul.msk.f32.gmra.mxu1 %vm360_vm0, %v4147_v21 }
 0x13e   : > { %1358 = vmatpush.msrb.mxu2 %v1127_v8  ;;  %v1569_v8 = vld [vmem:[#allocation7 + $0x440] sm:$0xff] }
 0x13f   : > { %v4161_v48 = vpop.f32.mrf.mxu2 }
 0x140   : > { %v4163_v60 = vpop.f32.mrf.mxu3 }
 0x141   : > { %v4167_v20 = vpop.f32.mrf.mxu0 }
 0x142   : > { %5427 = vst [vmem:[#allocation60_spill] sm:$0xff] %v4167_v20  ;;  %v4173_v49 = vpop.f32.mrf.mxu1  ;;  %v1136_v20 = vld [vmem:[#allocation7 + $0x2d8] sm:$0xff] }
 0x143   : > { %5428 = vst [vmem:[#allocation61_spill] sm:$0xff] %v4173_v49  ;;  %1421 = vmatpush.msrb.mxu3 %v1136_v20  ;;  %v4201_v20 = vld [vmem:[#allocation2 + $0x4a] sm:$0xff] }
 0x144   : > { %2990 = vmatmul.msk.f32.gmra.mxu2 %vm360_vm0, %v3885_v52  ;;  %3022 = vmatmul.msk.f32.gmra.mxu0 %vm360_vm0, %v4165_v59 }
 0x145   : > { %3006 = vmatmul.msk.f32.gmra.mxu3 %vm360_vm0, %v3885_v52  ;;  %3038 = vmatmul.msk.f32.gmra.mxu1 %vm360_vm0, %v4165_v59 }
 0x147   : > { %v4179_v2 = vpop.f32.mrf.mxu2 }
 0x148   : > { %v4181_v14 = vpop.f32.mrf.mxu3 }
 0x149   : > { %v4193_v52 = vpop.f32.mrf.mxu0 }
 0x14a   : > { %5429 = vst [vmem:[#allocation62_spill] sm:$0xff] %v4193_v52  ;;  %v4195_v1 = vpop.f32.mrf.mxu1 }
 0x14b   : > { %5430 = vst [vmem:[#allocation63_spill] sm:$0xff] %v4195_v1 }
 0x14c   : > { %2991 = vmatmul.msk.f32.gmra.mxu2 %vm360_vm0, %v3897_v56  ;;  %3023 = vmatmul.msk.f32.gmra.mxu0 %vm360_vm0, %v4183_v12 }
 0x14d   : > { %3007 = vmatmul.msk.f32.gmra.mxu3 %vm360_vm0, %v3897_v56  ;;  %3039 = vmatmul.msk.f32.gmra.mxu1 %vm360_vm0, %v4183_v12  ;;  %v1132_v56 = vld [vmem:[#allocation7 + $0x2b8] sm:$0xff] }
 0x14e   : > { %1422 = vmatpush.msrb.mxu3 %v1132_v56  ;;  %v1582_v56 = vld [vmem:[#allocation7 + $0x4a8] sm:$0xff] }
 0x14f   : > { %v4197_v49 = vpop.f32.mrf.mxu2  ;;  %1714 = vmatpush.msrb.mxu1 %v1582_v56  ;;  %v1570_v56 = vld [vmem:[#allocation7 + $0x448] sm:$0xff] }
 0x150   : > { %v4199_v9 = vpop.f32.mrf.mxu3 }
 0x151   : > { %v4213_v52 = vpop.f32.mrf.mxu0 }
 0x152   : > { %5432 = vst [vmem:[#allocation65_spill] sm:$0xff] %v4213_v52  ;;  %v4217_v25 = vpop.f32.mrf.mxu1 }
 0x153   : > { %5434 = vst [vmem:[#allocation67_spill] sm:$0xff] %v4217_v25  ;;  %v1578_v25 = vld [vmem:[#allocation7 + $0x488] sm:$0xff] }
 0x154   : > { %2992 = vmatmul.msk.f32.gmra.mxu2 %vm360_vm0, %v3915_v62  ;;  %3024 = vmatmul.msk.f32.gmra.mxu0 %vm360_vm0, %v4201_v20 }
 0x155   : > { %3008 = vmatmul.msk.f32.gmra.mxu3 %vm360_vm0, %v3915_v62  ;;  %3040 = vmatmul.msk.f32.gmra.mxu1 %vm360_vm0, %v4201_v20  ;;  %v1585_v62 = vld [vmem:[#allocation7 + $0x4c0] sm:$0xff] }
 0x156   : > { %1648 = vmatpush.msrb.mxu0 %v1585_v62  ;;  %1715 = vmatpush.msrb.mxu1 %v1578_v25  ;;  %v1573_v62 = vld [vmem:[#allocation7 + $0x460] sm:$0xff] }
 0x157   : > { %v4211_v1 = vpop.f32.mrf.mxu2 }
 0x158   : > { %5431 = vst [vmem:[#allocation64_spill] sm:$0xff] %v4211_v1  ;;  %v4215_v6 = vpop.f32.mrf.mxu3  ;;  %1649 = vmatpush.msrb.mxu0 %v1581_v15  ;;  %v1128_v15 = vld [vmem:[#allocation7 + $0x298] sm:$0xff]  ;;  %1716 = vmatpush.msrb.mxu1 %v1574_v5 }
 0x159   : > { %5433 = vst [vmem:[#allocation66_spill] sm:$0xff] %v4215_v6  ;;  %1423 = vmatpush.msrb.mxu3 %v1128_v15  ;;  %v1591_v15 = vld [vmem:[#allocation7 + $0x4f0] sm:$0xff]  ;;  %v2014_v6 = vld [vmem:[#allocation7 + $0x608] sm:$0xff] }
 0x15a   : > { %1650 = vmatpush.msrb.mxu0 %v1577_v54  ;;  %v4237_v31 = vpop.f32.mrf.mxu1  ;;  %v1565_v54 = vld [vmem:[#allocation7 + $0x420] sm:$0xff]  ;;  %1717 = vmatpush.msrb.mxu1 %v1570_v56 }
 0x15b   : > { %5438 = vst [vmem:[#allocation71_spill] sm:$0xff] %v4237_v31  ;;  %v1566_v31 = vld [vmem:[#allocation7 + $0x428] sm:$0xff]  ;;  %1777 = vmatpush.msra.mxu2 %v1591_v15  ;;  %v1588_v15 = vld [vmem:[#allocation7 + $0x4d8] sm:$0xff] }
 0x15c   : > { %2993 = vmatmul.msk.f32.gmra.mxu2 %vm360_vm0, %v3933_v4  ;;  %3025 = vmatmul.msk.f32.gmra.mxu0 %vm360_vm0, %v4219_v0 }
 0x15d   : > { %3009 = vmatmul.msk.f32.gmra.mxu3 %vm360_vm0, %v3933_v4  ;;  %3041 = vmatmul.msk.f32.gmra.mxu1 %vm360_vm0, %v4219_v0  ;;  %v4235_v4 = vpop.f32.mrf.mxu0 }
 0x15e   : > { %5437 = vst [vmem:[#allocation70_spill] sm:$0xff] %v4235_v4  ;;  %1651 = vmatpush.msrb.mxu0 %v1573_v62  ;;  %1718 = vmatpush.msrb.mxu1 %v1566_v31  ;;  %v1557_v62 = vld [vmem:[#allocation7 + $0x3e0] sm:$0xff]  ;;  %v1558_v31 = vld [vmem:[#allocation7 + $0x3e8] sm:$0xff] }
 0x15f   : > { %v4229_v47 = vpop.f32.mrf.mxu2 }
 0x160   : > { %5435 = vst [vmem:[#allocation68_spill] sm:$0xff] %v4229_v47  ;;  %v4231_v52 = vpop.f32.mrf.mxu3  ;;  %1652 = vmatpush.msrb.mxu0 %v1569_v8  ;;  %v1592_v8 = vld [vmem:[#allocation7 + $0x4f8] sm:$0xff]  ;;  %1719 = vmatpush.msrb.mxu1 %v1562_v57 }
 0x161   : > { %5436 = vst [vmem:[#allocation69_spill] sm:$0xff] %v4231_v52  ;;  %1842 = vmatpush.msra.mxu3 %v1592_v8 }
 0x162   : > { %1653 = vmatpush.msrb.mxu0 %v1565_v54  ;;  %v4259_v5 = vpop.f32.mrf.mxu1  ;;  %v1553_v54 = vld [vmem:[#allocation7 + $0x3c0] sm:$0xff]  ;;  %1720 = vmatpush.msrb.mxu1 %v1558_v31  ;;  %v1587_v31 = vld [vmem:[#allocation7 + $0x4d0] sm:$0xff] }
 0x163   : > { %5442 = vst [vmem:[#allocation75_spill] sm:$0xff] %v4259_v5  ;;  %v4269_v5 = vld [vmem:[#allocation2 + $0x6a] sm:$0xff]  ;;  %1778 = vmatpush.msra.mxu2 %v1587_v31  ;;  %1843 = vmatpush.msra.mxu3 %v1588_v15 }
 0x164   : > { %2994 = vmatmul.msk.f32.gmra.mxu2 %vm360_vm0, %v3951_v19  ;;  %3026 = vmatmul.msk.f32.gmra.mxu0 %vm360_vm0, %v4233_v23 }
 0x165   : > { %3010 = vmatmul.msk.f32.gmra.mxu3 %vm360_vm0, %v3951_v19  ;;  %3042 = vmatmul.msk.f32.gmra.mxu1 %vm360_vm0, %v4233_v23  ;;  %v1561_v19 = vld [vmem:[#allocation7 + $0x400] sm:$0xff]  ;;  %v4253_v42 = vpop.f32.mrf.mxu0 }
 0x166   : > { %5441 = vst [vmem:[#allocation74_spill] sm:$0xff] %v4253_v42  ;;  %1654 = vmatpush.msrb.mxu0 %v1561_v19  ;;  %v1554_v42 = vld [vmem:[#allocation7 + $0x3c8] sm:$0xff] }
 0x167   : > { %v4247_v25 = vpop.f32.mrf.mxu2  ;;  %1721 = vmatpush.msrb.mxu1 %v1554_v42  ;;  %v4287_v42 = vld [vmem:[#allocation2 + $0x72] sm:$0xff] }
 0x168   : > { %5439 = vst [vmem:[#allocation72_spill] sm:$0xff] %v4247_v25  ;;  %v4249_v4 = vpop.f32.mrf.mxu3  ;;  %1655 = vmatpush.msrb.mxu0 %v1557_v62  ;;  %v2018_v25 = vld [vmem:[#allocation7 + $0x628] sm:$0xff] }
 0x169   : > { %5440 = vst [vmem:[#allocation73_spill] sm:$0xff] %v4249_v4  ;;  %v2017_v4 = vld [vmem:[#allocation7 + $0x620] sm:$0xff]  ;;  %2140 = vmatpush.msra.mxu1 %v2018_v25 }
 0x16a   : > { %1656 = vmatpush.msrb.mxu0 %v1553_v54  ;;  %v2005_v25 = vld [vmem:[#allocation7 + $0x5c0] sm:$0xff] }
 0x16b   : > { %2141 = vmatpush.msra.mxu1 %v2014_v6  ;;  %v1556_v6 = vld [vmem:[#allocation7 + $0x3d8] sm:$0xff] }
 0x16c   : > { %2995 = vmatmul.msk.f32.gmra.mxu2 %vm360_vm0, %v3969_v35  ;;  %3027 = vmatmul.msk.f32.gmra.mxu0 %vm360_vm0, %v4251_v22 }
 0x16d   : > { %3011 = vmatmul.msk.f32.gmra.mxu3 %vm360_vm0, %v3969_v35  ;;  %3043 = vmatmul.msk.f32.gmra.mxu1 %vm360_vm0, %v4251_v22  ;;  %v4279_v57 = vpop.f32.mrf.mxu0  ;;  %v4281_v35 = vpop.f32.mrf.mxu1 }
 0x16e   : > { %5445 = vst [vmem:[#allocation78_spill] sm:$0xff] %v4279_v57  ;;  %v4305_v57 = vld [vmem:[#allocation2 + $0x7a] sm:$0xff]  ;;  %2075 = vmatpush.msra.mxu0 %v2017_v4 }
 0x16f   : > { %v4265_v56 = vpop.f32.mrf.mxu2  ;;  %5446 = vst [vmem:[#allocation79_spill] sm:$0xff] %v4281_v35 }
 0x170   : > { %5443 = vst [vmem:[#allocation76_spill] sm:$0xff] %v4265_v56  ;;  %v4267_v17 = vpop.f32.mrf.mxu3  ;;  %v4491_v56 = vld [vmem:[#allocation2 + $0x53] sm:$0xff] }
 0x171   : > { %5444 = vst [vmem:[#allocation77_spill] sm:$0xff] %v4267_v17  ;;  %v1559_v17 = vld [vmem:[#allocation7 + $0x3f0] sm:$0xff] }
 0x172   : > { %5473 = vst [vmem:[#allocation106_spill] sm:$0xff] %v4491_v56 }
 0x174   : > { %2996 = vmatmul.msk.f32.gmra.mxu2 %vm360_vm0, %v3987_v18  ;;  %3028 = vmatmul.msk.f32.gmra.mxu0 %vm360_vm0, %v4269_v5 }
 0x175   : > { %3012 = vmatmul.msk.f32.gmra.mxu3 %vm360_vm0, %v3987_v18  ;;  %3044 = vmatmul.msk.f32.gmra.mxu1 %vm360_vm0, %v4269_v5  ;;  %v4299_v8 = vpop.f32.mrf.mxu0  ;;  %v4303_v35 = vpop.f32.mrf.mxu1 }
 0x176   : > { %5450 = vst [vmem:[#allocation83_spill] sm:$0xff] %v4299_v8  ;;  %v1584_v8 = vld [vmem:[#allocation7 + $0x4b8] sm:$0xff] }
 0x177   : > { %v4283_v19 = vpop.f32.mrf.mxu2  ;;  %5452 = vst [vmem:[#allocation85_spill] sm:$0xff] %v4303_v35  ;;  %v4319_v35 = vld [vmem:[#allocation2 + $0x3] sm:$0xff]  ;;  %1844 = vmatpush.msra.mxu3 %v1584_v8 }
 0x178   : > { %5447 = vst [vmem:[#allocation80_spill] sm:$0xff] %v4283_v19  ;;  %v4285_v62 = vpop.f32.mrf.mxu3  ;;  %v1579_v8 = vld [vmem:[#allocation7 + $0x490] sm:$0xff]  ;;  %v1564_v19 = vld [vmem:[#allocation7 + $0x418] sm:$0xff] }
 0x179   : > { %5448 = vst [vmem:[#allocation81_spill] sm:$0xff] %v4285_v62  ;;  %v4459_v62 = vld [vmem:[#allocation2 + $0x43] sm:$0xff] }
 0x17c   : > { %2997 = vmatmul.msk.f32.gmra.mxu2 %vm360_vm0, %v4005_v43  ;;  %3029 = vmatmul.msk.f32.gmra.mxu0 %vm360_vm0, %v4287_v42 }
 0x17d   : > { %3013 = vmatmul.msk.f32.gmra.mxu3 %vm360_vm0, %v4005_v43  ;;  %3045 = vmatmul.msk.f32.gmra.mxu1 %vm360_vm0, %v4287_v42  ;;  %v1583_v43 = vld [vmem:[#allocation7 + $0x4b0] sm:$0xff]  ;;  %v4321_v11 = vpop.f32.mrf.mxu0  ;;  %v4323_v7 = vpop.f32.mrf.mxu1 }
 0x17e   : > { %1779 = vmatpush.msra.mxu2 %v1583_v43  ;;  %5455 = vst [vmem:[#allocation88_spill] sm:$0xff] %v4321_v11  ;;  %v4337_v11 = vld [vmem:[#allocation2 + $0xb] sm:$0xff] }
 0x17f   : > { %v4297_v18 = vpop.f32.mrf.mxu2  ;;  %5456 = vst [vmem:[#allocation89_spill] sm:$0xff] %v4323_v7 }
 0x180   : > { %5449 = vst [vmem:[#allocation82_spill] sm:$0xff] %v4297_v18  ;;  %v4301_v54 = vpop.f32.mrf.mxu3  ;;  %1780 = vmatpush.msra.mxu2 %v1579_v8 }
 0x181   : > { %5451 = vst [vmem:[#allocation84_spill] sm:$0xff] %v4301_v54 }
 0x182   : > { %1781 = vmatpush.msra.mxu2 %v1575_v38 }
 0x184   : > { %2998 = vmatmul.msk.f32.gmra.mxu2 %vm360_vm0, %v4023_v16  ;;  %3030 = vmatmul.msk.f32.gmra.mxu0 %vm360_vm0, %v4305_v57 }
 0x185   : > { %3014 = vmatmul.msk.f32.gmra.mxu3 %vm360_vm0, %v4023_v16  ;;  %3046 = vmatmul.msk.f32.gmra.mxu1 %vm360_vm0, %v4305_v57  ;;  %v4339_v7 = vpop.f32.mrf.mxu0  ;;  %v4345_v51 = vpop.f32.mrf.mxu1 }
 0x186   : > { %5457 = vst [vmem:[#allocation90_spill] sm:$0xff] %v4339_v7 }
 0x187   : > { %v4315_v31 = vpop.f32.mrf.mxu2  ;;  %5458 = vst [vmem:[#allocation91_spill] sm:$0xff] %v4345_v51 }
 0x188   : > { %5453 = vst [vmem:[#allocation86_spill] sm:$0xff] %v4315_v31  ;;  %v4317_v15 = vpop.f32.mrf.mxu3 }
 0x189   : > { %5454 = vst [vmem:[#allocation87_spill] sm:$0xff] %v4317_v15 }
 0x18c   : > { %3047 = vmatmul.msk.f32.vlgmr.msrb.gmra.mxu2 %vm360_vm0, %v4041_v27  ;;  %3079 = vmatmul.msk.f32.vlgmr.msrb.gmra.mxu0 %vm360_vm0, %v4319_v35 }
 0x18d   : > { %3063 = vmatmul.msk.f32.vlgmr.msrb.gmra.mxu3 %vm360_vm0, %v4041_v27  ;;  %3095 = vmatmul.msk.f32.vlgmr.msrb.gmra.mxu1 %vm360_vm0, %v4319_v35  ;;  %v1580_v27 = vld [vmem:[#allocation7 + $0x498] sm:$0xff]  ;;  %v4367_v8 = vpop.f32.mrf.mxu1 }
 0x18e   : > { %1845 = vmatpush.msra.mxu3 %v1580_v27  ;;  %5460 = vst [vmem:[#allocation93_spill] sm:$0xff] %v4367_v8 }
 0x18f   : > { %v4333_v16 = vpop.f32.mrf.mxu2 }
 0x190   : > { %v4335_v43 = vpop.f32.mrf.mxu3  ;;  %1846 = vmatpush.msra.mxu3 %v1576_v61  ;;  %v1571_v61 = vld [vmem:[#allocation7 + $0x450] sm:$0xff] }
 0x191   : > { %1782 = vmatpush.msra.mxu2 %v1571_v61 }
 0x194   : > { %3048 = vmatmul.msk.f32.gmra.mxu2 %vm360_vm0, %v4059_v32  ;;  %3080 = vmatmul.msk.f32.gmra.mxu0 %vm360_vm0, %v4337_v11 }
 0x195   : > { %3064 = vmatmul.msk.f32.gmra.mxu3 %vm360_vm0, %v4059_v32  ;;  %3096 = vmatmul.msk.f32.gmra.mxu1 %vm360_vm0, %v4337_v11  ;;  %v4365_v32 = vpop.f32.mrf.mxu0  ;;  %v4389_v38 = vpop.f32.mrf.mxu1 }
 0x196   : > { %5459 = vst [vmem:[#allocation92_spill] sm:$0xff] %v4365_v32 }
 0x197   : > { %v4351_v3 = vpop.f32.mrf.mxu2  ;;  %5462 = vst [vmem:[#allocation95_spill] sm:$0xff] %v4389_v38 }
 0x198   : > { %v4353_v7 = vpop.f32.mrf.mxu3 }
 0x19c   : > { %3049 = vmatmul.msk.f32.gmra.mxu2 %vm360_vm0, %v4077_v10  ;;  %3081 = vmatmul.msk.f32.gmra.mxu0 %vm360_vm0, %v4355_v41 }
 0x19d   : > { %3065 = vmatmul.msk.f32.gmra.mxu3 %vm360_vm0, %v4077_v10  ;;  %3097 = vmatmul.msk.f32.gmra.mxu1 %vm360_vm0, %v4355_v41  ;;  %v4385_v8 = vpop.f32.mrf.mxu0  ;;  %v4409_v55 = vpop.f32.mrf.mxu1 }
 0x19e   : > { %5461 = vst [vmem:[#allocation94_spill] sm:$0xff] %v4385_v8 }
 0x19f   : > { %v4369_v27 = vpop.f32.mrf.mxu2  ;;  %5464 = vst [vmem:[#allocation97_spill] sm:$0xff] %v4409_v55  ;;  %v1568_v55 = vld [vmem:[#allocation7 + $0x438] sm:$0xff] }
 0x1a0   : > { %v4371_v51 = vpop.f32.mrf.mxu3 }
 0x1a4   : > { %3050 = vmatmul.msk.f32.gmra.mxu2 %vm360_vm0, %v4095_v37  ;;  %3082 = vmatmul.msk.f32.gmra.mxu0 %vm360_vm0, %v4373_v63 }
 0x1a5   : > { %3066 = vmatmul.msk.f32.gmra.mxu3 %vm360_vm0, %v4095_v37  ;;  %3098 = vmatmul.msk.f32.gmra.mxu1 %vm360_vm0, %v4373_v63  ;;  %v1572_v37 = vld [vmem:[#allocation7 + $0x458] sm:$0xff]  ;;  %v4407_v24 = vpop.f32.mrf.mxu0 }
 0x1a6   : > { %1847 = vmatpush.msra.mxu3 %v1572_v37  ;;  %5463 = vst [vmem:[#allocation96_spill] sm:$0xff] %v4407_v24  ;;  %v4423_v37 = vld [vmem:[#allocation2 + $0x33] sm:$0xff]  ;;  %v1567_v24 = vld [vmem:[#allocation7 + $0x430] sm:$0xff] }
 0x1a7   : > { %v4383_v10 = vpop.f32.mrf.mxu2  ;;  %1783 = vmatpush.msra.mxu2 %v1567_v24  ;;  %v1563_v24 = vld [vmem:[#allocation7 + $0x410] sm:$0xff] }
 0x1a8   : > { %v4387_v32 = vpop.f32.mrf.mxu3  ;;  %1848 = vmatpush.msra.mxu3 %v1568_v55 }
 0x1a9   : > { %1784 = vmatpush.msra.mxu2 %v1563_v24 }
 0x1aa   : > { %1849 = vmatpush.msra.mxu3 %v1564_v19  ;;  %v4477_v19 = vld [vmem:[#allocation2 + $0x4b] sm:$0xff] }
 0x1ab   : > { %1785 = vmatpush.msra.mxu2 %v1559_v17  ;;  %v2009_v17 = vld [vmem:[#allocation7 + $0x5e0] sm:$0xff] }
 0x1ac   : > { %3051 = vmatmul.msk.f32.gmra.mxu2 %vm360_vm0, %v4113_v26  ;;  %3083 = vmatmul.msk.f32.gmra.mxu0 %vm360_vm0, %v4391_v28 }
 0x1ad   : > { %3067 = vmatmul.msk.f32.gmra.mxu3 %vm360_vm0, %v4113_v26  ;;  %3099 = vmatmul.msk.f32.gmra.mxu1 %vm360_vm0, %v4391_v28  ;;  %v4425_v15 = vpop.f32.mrf.mxu0 }
 0x1ae   : > { %5465 = vst [vmem:[#allocation98_spill] sm:$0xff] %v4425_v15  ;;  %v4441_v15 = vld [vmem:[#allocation2 + $0x3b] sm:$0xff] }
 0x1af   : > { %v4401_v8 = vpop.f32.mrf.mxu2 }
 0x1b0   : > { %v4403_v38 = vpop.f32.mrf.mxu3 }
 0x1b4   : > { %3052 = vmatmul.msk.f32.gmra.mxu2 %vm360_vm0, %v4131_v29  ;;  %3084 = vmatmul.msk.f32.gmra.mxu0 %vm360_vm0, %v4405_v58 }
 0x1b5   : > { %3068 = vmatmul.msk.f32.gmra.mxu3 %vm360_vm0, %v4131_v29  ;;  %3100 = vmatmul.msk.f32.gmra.mxu1 %vm360_vm0, %v4405_v58  ;;  %v4431_v29 = vpop.f32.mrf.mxu1  ;;  %v4451_v55 = vpop.f32.mrf.mxu0 }
 0x1b6   : > { %5466 = vst [vmem:[#allocation99_spill] sm:$0xff] %v4431_v29 }
 0x1b7   : > { %v4419_v26 = vpop.f32.mrf.mxu2  ;;  %5467 = vst [vmem:[#allocation100_spill] sm:$0xff] %v4451_v55 }
 0x1b8   : > { %v4421_v61 = vpop.f32.mrf.mxu3 }
 0x1bc   : > { %3053 = vmatmul.msk.f32.gmra.mxu2 %vm360_vm0, %v4147_v21  ;;  %3085 = vmatmul.msk.f32.gmra.mxu0 %vm360_vm0, %v4423_v37 }
 0x1bd   : > { %3069 = vmatmul.msk.f32.gmra.mxu3 %vm360_vm0, %v4147_v21  ;;  %3101 = vmatmul.msk.f32.gmra.mxu1 %vm360_vm0, %v4423_v37  ;;  %v4453_v21 = vpop.f32.mrf.mxu1  ;;  %v4471_v24 = vpop.f32.mrf.mxu0 }
 0x1be   : > { %5468 = vst [vmem:[#allocation101_spill] sm:$0xff] %v4453_v21 }
 0x1bf   : > { %v4437_v31 = vpop.f32.mrf.mxu2  ;;  %5469 = vst [vmem:[#allocation102_spill] sm:$0xff] %v4471_v24 }
 0x1c0   : > { %v4439_v54 = vpop.f32.mrf.mxu3 }
 0x1c4   : > { %3054 = vmatmul.msk.f32.gmra.mxu2 %vm360_vm0, %v4165_v59  ;;  %3086 = vmatmul.msk.f32.gmra.mxu0 %vm360_vm0, %v4441_v15 }
 0x1c5   : > { %3070 = vmatmul.msk.f32.gmra.mxu3 %vm360_vm0, %v4165_v59  ;;  %3102 = vmatmul.msk.f32.gmra.mxu1 %vm360_vm0, %v4441_v15  ;;  %v4475_v55 = vpop.f32.mrf.mxu1  ;;  %v4493_v52 = vpop.f32.mrf.mxu0 }
 0x1c6   : > { %5470 = vst [vmem:[#allocation103_spill] sm:$0xff] %v4475_v55 }
 0x1c7   : > { %v4455_v29 = vpop.f32.mrf.mxu2  ;;  %5474 = vst [vmem:[#allocation107_spill] sm:$0xff] %v4493_v52 }
 0x1c8   : > { %v4457_v18 = vpop.f32.mrf.mxu3 }
 0x1cc   : > { %3055 = vmatmul.msk.f32.gmra.mxu2 %vm360_vm0, %v4183_v12  ;;  %3087 = vmatmul.msk.f32.gmra.mxu0 %vm360_vm0, %v4459_v62 }
 0x1cd   : > { %3071 = vmatmul.msk.f32.gmra.mxu3 %vm360_vm0, %v4183_v12  ;;  %3103 = vmatmul.msk.f32.gmra.mxu1 %vm360_vm0, %v4459_v62  ;;  %v1560_v12 = vld [vmem:[#allocation7 + $0x3f8] sm:$0xff]  ;;  %v4495_v47 = vpop.f32.mrf.mxu1  ;;  %v4511_v1 = vpop.f32.mrf.mxu0 }
 0x1ce   : > { %1850 = vmatpush.msra.mxu3 %v1560_v12  ;;  %5475 = vst [vmem:[#allocation108_spill] sm:$0xff] %v4495_v47  ;;  %v2010_v12 = vld [vmem:[#allocation7 + $0x5e8] sm:$0xff] }
 0x1cf   : > { %v4469_v59 = vpop.f32.mrf.mxu2  ;;  %v2006_v47 = vld [vmem:[#allocation7 + $0x5c8] sm:$0xff]  ;;  %2142 = vmatpush.msra.mxu1 %v2010_v12  ;;  %5478 = vst [vmem:[#allocation111_spill] sm:$0xff] %v4511_v1  ;;  %v1993_v12 = vld [vmem:[#allocation7 + $0x560] sm:$0xff] }
 0x1d0   : > { %v4473_v21 = vpop.f32.mrf.mxu3  ;;  %1851 = vmatpush.msra.mxu3 %v1556_v6  ;;  %v2019_v6 = vld [vmem:[#allocation7 + $0x630] sm:$0xff] }
 0x1d1   : > { %2143 = vmatpush.msra.mxu1 %v2006_v47  ;;  %v1997_v47 = vld [vmem:[#allocation7 + $0x580] sm:$0xff] }
 0x1d4   : > { %3056 = vmatmul.msk.f32.gmra.mxu2 %vm360_vm0, %v4201_v20  ;;  %3088 = vmatmul.msk.f32.gmra.mxu0 %vm360_vm0, %v4477_v19 }
 0x1d5   : > { %3072 = vmatmul.msk.f32.gmra.mxu3 %vm360_vm0, %v4201_v20  ;;  %3104 = vmatmul.msk.f32.gmra.mxu1 %vm360_vm0, %v4477_v19  ;;  %v2013_v20 = vld [vmem:[#allocation7 + $0x600] sm:$0xff] }
 0x1d6   : > { %2076 = vmatpush.msra.mxu0 %v2013_v20  ;;  %v4517_v20 = vpop.f32.mrf.mxu1 }
 0x1d7   : > { %v4487_v24 = vpop.f32.mrf.mxu2  ;;  %5479 = vst [vmem:[#allocation112_spill] sm:$0xff] %v4517_v20  ;;  %v4527_v20 = vld [vmem:[#allocation2 + $0x63] sm:$0xff] }
 0x1d8   : > { %5471 = vst [vmem:[#allocation104_spill] sm:$0xff] %v4487_v24  ;;  %v4489_v55 = vpop.f32.mrf.mxu3  ;;  %2077 = vmatpush.msra.mxu0 %v2009_v17  ;;  %v1555_v24 = vld [vmem:[#allocation7 + $0x3d0] sm:$0xff] }
 0x1d9   : > { %5472 = vst [vmem:[#allocation105_spill] sm:$0xff] %v4489_v55  ;;  %v4509_v55 = vld [vmem:[#allocation2 + $0x5b] sm:$0xff]  ;;  %1786 = vmatpush.msra.mxu2 %v1555_v24 }
 0x1da   : > { %5477 = vst [vmem:[#allocation110_spill] sm:$0xff] %v4509_v55  ;;  %2078 = vmatpush.msra.mxu0 %v2005_v25  ;;  %v1998_v24 = vld [vmem:[#allocation7 + $0x588] sm:$0xff] }
 0x1db   : > { %v1994_v25 = vld [vmem:[#allocation7 + $0x568] sm:$0xff]  ;;  %2205 = vmatpush.msrb.mxu2 %v2019_v6  ;;  %v2016_v6 = vld [vmem:[#allocation7 + $0x618] sm:$0xff] }
 0x1dc   : > { %3057 = vmatmul.msk.f32.gmra.mxu2 %vm360_vm0, %v4219_v0  ;;  %3089 = vmatmul.msk.f32.gmra.mxu0 %vm360_vm0, %v4491_v56 }
 0x1dd   : > { %3073 = vmatmul.msk.f32.gmra.mxu3 %vm360_vm0, %v4219_v0  ;;  %3105 = vmatmul.msk.f32.gmra.mxu1 %vm360_vm0, %v4491_v56  ;;  %v2001_v0 = vld [vmem:[#allocation7 + $0x5a0] sm:$0xff]  ;;  %v2002_v56 = vld [vmem:[#allocation7 + $0x5a8] sm:$0xff] }
 0x1de   : > { %2079 = vmatpush.msra.mxu0 %v2001_v0  ;;  %2144 = vmatpush.msra.mxu1 %v2002_v56  ;;  %v1985_v56 = vld [vmem:[#allocation7 + $0x520] sm:$0xff]  ;;  %v1986_v0 = vld [vmem:[#allocation7 + $0x528] sm:$0xff] }
 0x1df   : > { %v4505_v4 = vpop.f32.mrf.mxu2 }
 0x1e0   : > { %v4507_v52 = vpop.f32.mrf.mxu3  ;;  %2080 = vmatpush.msra.mxu0 %v1997_v47  ;;  %2145 = vmatpush.msra.mxu1 %v1998_v24  ;;  %v2020_v47 = vld [vmem:[#allocation7 + $0x638] sm:$0xff]  ;;  %v4537_v24 = vpop.f32.mrf.mxu0 }
 0x1e1   : > { %5476 = vst [vmem:[#allocation109_spill] sm:$0xff] %v4507_v52  ;;  %v1990_v52 = vld [vmem:[#allocation7 + $0x548] sm:$0xff]  ;;  %2270 = vmatpush.msrb.mxu3 %v2020_v47 }
 0x1e2   : > { %2081 = vmatpush.msra.mxu0 %v1993_v12  ;;  %2146 = vmatpush.msra.mxu1 %v1994_v25  ;;  %5482 = vst [vmem:[#allocation115_spill] sm:$0xff] %v4537_v24  ;;  %v4539_v12 = vpop.f32.mrf.mxu1 }
 0x1e3   : > { %5483 = vst [vmem:[#allocation116_spill] sm:$0xff] %v4539_v12  ;;  %2271 = vmatpush.msrb.mxu3 %v2016_v6 }
 0x1e4   : > { %3058 = vmatmul.msk.f32.gmra.mxu2 %vm360_vm0, %v4233_v23  ;;  %3090 = vmatmul.msk.f32.gmra.mxu0 %vm360_vm0, %v4509_v55 }
 0x1e5   : > { %3074 = vmatmul.msk.f32.gmra.mxu3 %vm360_vm0, %v4233_v23  ;;  %3106 = vmatmul.msk.f32.gmra.mxu1 %vm360_vm0, %v4509_v55  ;;  %v1989_v23 = vld [vmem:[#allocation7 + $0x540] sm:$0xff] }
 0x1e6   : > { %2082 = vmatpush.msra.mxu0 %v1989_v23  ;;  %2147 = vmatpush.msra.mxu1 %v1990_v52 }
 0x1e7   : > { %v4523_v17 = vpop.f32.mrf.mxu2 }
 0x1e8   : > { %5480 = vst [vmem:[#allocation113_spill] sm:$0xff] %v4523_v17  ;;  %v4525_v1 = vpop.f32.mrf.mxu3  ;;  %v1982_v17 = vld [vmem:[#allocation7 + $0x508] sm:$0xff]  ;;  %2083 = vmatpush.msra.mxu0 %v1985_v56  ;;  %2148 = vmatpush.msra.mxu1 %v1986_v0  ;;  %v4557_v23 = vpop.f32.mrf.mxu0  ;;  %v2015_v0 = vld [vmem:[#allocation7 + $0x610] sm:$0xff] }
 0x1e9   : > { %5481 = vst [vmem:[#allocation114_spill] sm:$0xff] %v4525_v1  ;;  %v1981_v1 = vld [vmem:[#allocation7 + $0x500] sm:$0xff]  ;;  %2206 = vmatpush.msrb.mxu2 %v2015_v0 }
 0x1ea   : > { %2084 = vmatpush.msra.mxu0 %v1981_v1  ;;  %2149 = vmatpush.msra.mxu1 %v1982_v17  ;;  %5484 = vst [vmem:[#allocation117_spill] sm:$0xff] %v4557_v23  ;;  %v4561_v1 = vpop.f32.mrf.mxu1  ;;  %v4563_v17 = vld [vmem:[#allocation2 + $0x73] sm:$0xff] }
 0x1eb   : > { %5485 = vst [vmem:[#allocation118_spill] sm:$0xff] %v4561_v1  ;;  %v4577_v1 = vld [vmem:[#allocation2 + $0x7b] sm:$0xff] }
 0x1ec   : > { %3059 = vmatmul.msk.f32.gmra.mxu2 %vm360_vm0, %v4251_v22  ;;  %3091 = vmatmul.msk.f32.gmra.mxu0 %vm360_vm0, %v4527_v20  ;;  %5487 = vst [vmem:[#allocation120_spill] sm:$0xff] %v4577_v1 }
 0x1ed   : > { %3075 = vmatmul.msk.f32.gmra.mxu3 %vm360_vm0, %v4251_v22  ;;  %3107 = vmatmul.msk.f32.gmra.mxu1 %vm360_vm0, %v4527_v20  ;;  %v4545_v22 = vld [vmem:[#allocation2 + $0x6b] sm:$0xff] }
 0x1ef   : > { %v4541_v25 = vpop.f32.mrf.mxu2 }
 0x1f0   : > { %v4543_v55 = vpop.f32.mrf.mxu3  ;;  %v4579_v23 = vpop.f32.mrf.mxu0 }
 0x1f1   : > { %5488 = vst [vmem:[#allocation121_spill] sm:$0xff] %v4579_v23  ;;  %v4595_v23 = vld [vmem:[#allocation2 + $0x4] sm:$0xff] }
 0x1f2   : > { %v4581_v12 = vpop.f32.mrf.mxu1 }
 0x1f3   : > { %5489 = vst [vmem:[#allocation122_spill] sm:$0xff] %v4581_v12  ;;  %v2012_v12 = vld [vmem:[#allocation7 + $0x5f8] sm:$0xff] }
 0x1f4   : > { %3060 = vmatmul.msk.f32.gmra.mxu2 %vm360_vm0, %v4269_v5  ;;  %3092 = vmatmul.msk.f32.gmra.mxu0 %vm360_vm0, %v4545_v22 }
 0x1f5   : > { %3076 = vmatmul.msk.f32.gmra.mxu3 %vm360_vm0, %v4269_v5  ;;  %3108 = vmatmul.msk.f32.gmra.mxu1 %vm360_vm0, %v4545_v22 }
 0x1f6   : > { %2272 = vmatpush.msrb.mxu3 %v2012_v12  ;;  %v1062_v12 = vadd.f32 %v4335_v43, %v4055_v36  ;;  %v1000_v36 = vadd.f32 %v4351_v3, %v4071_v46  ;;  %v1003_v3 = vadd.f32 %v4369_v27, %v4089_v39  ;;  %v1071_v39 = vadd.f32 %v4387_v32, %v4109_v13  ;;  %v1999_v13 = vld [vmem:[#allocation7 + $0x590] sm:$0xff] }
 0x1f7   : > { %v4555_v52 = vpop.f32.mrf.mxu2  ;;  %v1009_v32 = vadd.f32 %v4401_v8, %v4125_v33  ;;  %v1077_v8 = vadd.f32 %v4421_v61, %v4145_v44  ;;  %v1080_v44 = vadd.f32 %v4439_v54, %v4163_v60  ;;  %v1991_v60 = vld [vmem:[#allocation7 + $0x550] sm:$0xff]  ;;  %v1083_v54 = vadd.f32 %v4457_v18, %v4181_v14 }
 0x1f8   : > { %v4559_v56 = vpop.f32.mrf.mxu3  ;;  %v4597_v24 = vpop.f32.mrf.mxu0  ;;  %v1021_v14 = vadd.f32 %v4469_v59, %v4197_v49  ;;  %v5503_v49 = vld [vmem:[#allocation64_spill] sm:$0xff] }
 0x1f9   : > { %5492 = vst [vmem:[#allocation125_spill] sm:$0xff] %v4597_v24 }
 0x1fc   : > { %3061 = vmatmul.msk.f32.gmra.mxu2 %vm360_vm0, %v4287_v42  ;;  %3093 = vmatmul.msk.f32.gmra.mxu0 %vm360_vm0, %v4563_v17 }
 0x1fd   : > { %3077 = vmatmul.msk.f32.gmra.mxu3 %vm360_vm0, %v4287_v42  ;;  %3109 = vmatmul.msk.f32.gmra.mxu1 %vm360_vm0, %v4563_v17  ;;  %v2011_v42 = vld [vmem:[#allocation7 + $0x5f0] sm:$0xff] }
 0x1fe   : > { %2207 = vmatpush.msrb.mxu2 %v2011_v42  ;;  %v997_v42 = vadd.f32 %v4333_v16, %v4053_v34  ;;  %v2008_v34 = vld [vmem:[#allocation7 + $0x5d8] sm:$0xff]  ;;  %v1065_v16 = vadd.f32 %v4353_v7, %v4073_v50  ;;  %v1068_v7 = vadd.f32 %v4371_v51, %v4091_v30  ;;  %v1006_v51 = vadd.f32 %v4383_v10, %v4107_v40 }
 0x1ff   : > { %v4573_v5 = vpop.f32.mrf.mxu2  ;;  %2273 = vmatpush.msrb.mxu3 %v2008_v34  ;;  %v2000_v40 = vld [vmem:[#allocation7 + $0x598] sm:$0xff]  ;;  %v1074_v10 = vadd.f32 %v4403_v38, %v4127_v53  ;;  %v1012_v53 = vadd.f32 %v4419_v26, %v4143_v45 }
 0x200   : > { %v4575_v47 = vpop.f32.mrf.mxu3 }
 0x201   : > { %5486 = vst [vmem:[#allocation119_spill] sm:$0xff] %v4575_v47  ;;  %v4617_v47 = vld [vmem:[#allocation2 + $0xc] sm:$0xff] }
 0x204   : > { %3062 = vmatmul.msk.f32.gmra.mxu2 %vm360_vm0, %v4305_v57  ;;  %3094 = vmatmul.msk.f32.gmra.mxu0 %vm360_vm0, %v4577_v1 }
 0x205   : > { %3078 = vmatmul.msk.f32.gmra.mxu3 %vm360_vm0, %v4305_v57  ;;  %3110 = vmatmul.msk.f32.gmra.mxu1 %vm360_vm0, %v4577_v1  ;;  %v4603_v57 = vpop.f32.mrf.mxu1 }
 0x206   : > { %5493 = vst [vmem:[#allocation126_spill] sm:$0xff] %v4603_v57  ;;  %v2007_v57 = vld [vmem:[#allocation7 + $0x5d0] sm:$0xff] }
 0x207   : > { %v4591_v0 = vpop.f32.mrf.mxu2  ;;  %2208 = vmatpush.msrb.mxu2 %v2007_v57 }
 0x208   : > { %5490 = vst [vmem:[#allocation123_spill] sm:$0xff] %v4591_v0  ;;  %v4593_v6 = vpop.f32.mrf.mxu3 }
 0x209   : > { %5491 = vst [vmem:[#allocation124_spill] sm:$0xff] %v4593_v6 }
 0x20c   : > { %3111 = vmatmul.msk.f32.vlgmr.msra.gmra.mxu2 %vm360_vm0, %v4319_v35  ;;  %3143 = vmatmul.msk.f32.vlgmr.msra.gmra.mxu0 %vm360_vm0, %v4595_v23 }
 0x20d   : > { %3127 = vmatmul.msk.f32.vlgmr.msra.gmra.mxu3 %vm360_vm0, %v4319_v35  ;;  %3159 = vmatmul.msk.f32.vlgmr.msra.gmra.mxu1 %vm360_vm0, %v4595_v23  ;;  %v4629_v35 = vpop.f32.mrf.mxu0  ;;  %v4633_v43 = vpop.f32.mrf.mxu1 }
 0x20e   : > { %5494 = vst [vmem:[#allocation127_spill] sm:$0xff] %v4629_v35 }
 0x20f   : > { %v1360_v24 = vpop.f32.mrf.mxu2  ;;  %5495 = vst [vmem:[#allocation128_spill] sm:$0xff] %v4633_v43 }
 0x210   : > { %v4613_v6 = vadd.f32 %v1360_v24, %v997_v42  ;;  %v1425_v0 = vpop.f32.mrf.mxu3 }
 0x211   : > { %v4615_v1 = vadd.f32 %v1425_v0, %v1062_v12  ;;  %v4639_v12 = vld [vmem:[#allocation2 + $0x14] sm:$0xff] }
 0x214   : > { %3112 = vmatmul.msk.f32.gmra.mxu2 %vm360_vm0, %v4337_v11  ;;  %3144 = vmatmul.msk.f32.gmra.mxu0 %vm360_vm0, %v4617_v47 }
 0x215   : > { %3128 = vmatmul.msk.f32.gmra.mxu3 %vm360_vm0, %v4337_v11  ;;  %3160 = vmatmul.msk.f32.gmra.mxu1 %vm360_vm0, %v4617_v47  ;;  %v4653_v50 = vpop.f32.mrf.mxu0 }
 0x216   : > { %5496 = vst [vmem:[#allocation129_spill] sm:$0xff] %v4653_v50 }
 0x217   : > { %v1363_v24 = vpop.f32.mrf.mxu2 }
 0x218   : > { %v4635_v0 = vadd.f32 %v1363_v24, %v1000_v36  ;;  %v1428_v11 = vpop.f32.mrf.mxu3  ;;  %v4657_v36 = vpop.f32.mrf.mxu1  ;;  %v2003_v24 = vld [vmem:[#allocation7 + $0x5b0] sm:$0xff] }
 0x219   : > { %v4637_v42 = vadd.f32 %v1428_v11, %v1065_v16  ;;  %5497 = vst [vmem:[#allocation130_spill] sm:$0xff] %v4657_v36  ;;  %2209 = vmatpush.msrb.mxu2 %v2003_v24  ;;  %v2004_v11 = vld [vmem:[#allocation7 + $0x5b8] sm:$0xff]  ;;  %v5513_v36 = vld [vmem:[#allocation110_spill] sm:$0xff] }
 0x21a   : > { %2274 = vmatpush.msrb.mxu3 %v2004_v11 }
 0x21b   : > { %2210 = vmatpush.msrb.mxu2 %v1999_v13 }
 0x21c   : > { %3113 = vmatmul.msk.f32.gmra.mxu2 %vm360_vm0, %v4355_v41  ;;  %3145 = vmatmul.msk.f32.gmra.mxu0 %vm360_vm0, %v4639_v12 }
 0x21d   : > { %3129 = vmatmul.msk.f32.gmra.mxu3 %vm360_vm0, %v4355_v41  ;;  %3161 = vmatmul.msk.f32.gmra.mxu1 %vm360_vm0, %v4639_v12  ;;  %v4661_v41 = vld [vmem:[#allocation2 + $0x1c] sm:$0xff] }
 0x21e   : > { %2275 = vmatpush.msrb.mxu3 %v2000_v40 }
 0x21f   : > { %v1366_v46 = vpop.f32.mrf.mxu2 }
 0x220   : > { %v4655_v57 = vadd.f32 %v1366_v46, %v1003_v3  ;;  %v1431_v34 = vpop.f32.mrf.mxu3  ;;  %v4679_v46 = vld [vmem:[#allocation2 + $0x24] sm:$0xff] }
 0x221   : > { %v4659_v16 = vadd.f32 %v1431_v34, %v1068_v7  ;;  %v4681_v34 = vpop.f32.mrf.mxu0 }
 0x222   : > { %5498 = vst [vmem:[#allocation131_spill] sm:$0xff] %v4681_v34  ;;  %v1983_v34 = vld [vmem:[#allocation7 + $0x510] sm:$0xff] }
 0x224   : > { %3114 = vmatmul.msk.f32.gmra.mxu2 %vm360_vm0, %v4373_v63  ;;  %3146 = vmatmul.msk.f32.gmra.mxu0 %vm360_vm0, %v4661_v41 }
 0x225   : > { %3130 = vmatmul.msk.f32.gmra.mxu3 %vm360_vm0, %v4373_v63  ;;  %3162 = vmatmul.msk.f32.gmra.mxu1 %vm360_vm0, %v4661_v41  ;;  %v4683_v63 = vpop.f32.mrf.mxu1 }
 0x226   : > { %5499 = vst [vmem:[#allocation132_spill] sm:$0xff] %v4683_v63  ;;  %v4829_v63 = vld [vmem:[#allocation2 + $0x5c] sm:$0xff] }
 0x227   : > { %v1369_v30 = vpop.f32.mrf.mxu2 }
 0x228   : > { %v4675_v27 = vadd.f32 %v1369_v30, %v1006_v51  ;;  %v1434_v3 = vpop.f32.mrf.mxu3 }
 0x229   : > { %v4677_v7 = vadd.f32 %v1434_v3, %v1071_v39  ;;  %v4703_v30 = vpop.f32.mrf.mxu0 }
 0x22a   : > { %5500 = vst [vmem:[#allocation133_spill] sm:$0xff] %v4703_v30  ;;  %v5508_v30 = vld [vmem:[#allocation106_spill] sm:$0xff] }
 0x22c   : > { %3115 = vmatmul.msk.f32.gmra.mxu2 %vm360_vm0, %v4391_v28  ;;  %3147 = vmatmul.msk.f32.gmra.mxu0 %vm360_vm0, %v4679_v46 }
 0x22d   : > { %3131 = vmatmul.msk.f32.gmra.mxu3 %vm360_vm0, %v4391_v28  ;;  %3163 = vmatmul.msk.f32.gmra.mxu1 %vm360_vm0, %v4679_v46  ;;  %v4701_v28 = vld [vmem:[#allocation2 + $0x2c] sm:$0xff]  ;;  %v4709_v33 = vpop.f32.mrf.mxu1 }
 0x22e   : > { %5501 = vst [vmem:[#allocation134_spill] sm:$0xff] %v4709_v33  ;;  %v4807_v33 = vld [vmem:[#allocation2 + $0x54] sm:$0xff] }
 0x22f   : > { %v1372_v24 = vpop.f32.mrf.mxu2 }
 0x230   : > { %v4697_v11 = vadd.f32 %v1372_v24, %v1009_v32  ;;  %v1437_v51 = vpop.f32.mrf.mxu3  ;;  %v4723_v32 = vld [vmem:[#allocation2 + $0x34] sm:$0xff]  ;;  %v1996_v24 = vld [vmem:[#allocation7 + $0x578] sm:$0xff] }
 0x231   : > { %v4699_v39 = vadd.f32 %v1437_v51, %v1074_v10  ;;  %v1995_v10 = vld [vmem:[#allocation7 + $0x570] sm:$0xff]  ;;  %v4735_v45 = vpop.f32.mrf.mxu0  ;;  %2276 = vmatpush.msrb.mxu3 %v1996_v24 }
 0x232   : > { %2211 = vmatpush.msrb.mxu2 %v1995_v10 }
 0x234   : > { %3116 = vmatmul.msk.f32.gmra.mxu2 %vm360_vm0, %v4405_v58  ;;  %3148 = vmatmul.msk.f32.gmra.mxu0 %vm360_vm0, %v4701_v28 }
 0x235   : > { %3132 = vmatmul.msk.f32.gmra.mxu3 %vm360_vm0, %v4405_v58  ;;  %3164 = vmatmul.msk.f32.gmra.mxu1 %vm360_vm0, %v4701_v28  ;;  %v1015_v58 = vadd.f32 %v4437_v31, %v4161_v48  ;;  %v4739_v26 = vpop.f32.mrf.mxu1  ;;  %v1018_v48 = vadd.f32 %v4455_v29, %v4179_v2  ;;  %v1086_v2 = vadd.f32 %v4473_v21, %v4199_v9  ;;  %v1988_v9 = vld [vmem:[#allocation7 + $0x538] sm:$0xff]  ;;  %v5504_v21 = vld [vmem:[#allocation104_spill] sm:$0xff] }
 0x236   : > { %2212 = vmatpush.msrb.mxu2 %v1991_v60  ;;  %v4785_v60 = vld [vmem:[#allocation2 + $0x4c] sm:$0xff]  ;;  %v1024_v59 = vadd.f32 %v5504_v21, %v5503_v49 }
 0x237   : > { %v1375_v38 = vpop.f32.mrf.mxu2  ;;  %v5511_v21 = vld [vmem:[#allocation69_spill] sm:$0xff] }
 0x238   : > { %v4719_v3 = vadd.f32 %v1375_v38, %v1012_v53  ;;  %v1440_v13 = vpop.f32.mrf.mxu3 }
 0x239   : > { %v4721_v40 = vadd.f32 %v1440_v13, %v1077_v8  ;;  %v4745_v8 = vld [vmem:[#allocation2 + $0x3c] sm:$0xff]  ;;  %v4759_v38 = vpop.f32.mrf.mxu0 }
 0x23c   : > { %3117 = vmatmul.msk.f32.gmra.mxu2 %vm360_vm0, %v4423_v37  ;;  %3149 = vmatmul.msk.f32.gmra.mxu0 %vm360_vm0, %v4723_v32 }
 0x23d   : > { %3133 = vmatmul.msk.f32.gmra.mxu3 %vm360_vm0, %v4423_v37  ;;  %3165 = vmatmul.msk.f32.gmra.mxu1 %vm360_vm0, %v4723_v32  ;;  %v4763_v24 = vpop.f32.mrf.mxu1 }
 0x23f   : > { %v1378_v61 = vpop.f32.mrf.mxu2 }
 0x240   : > { %v4741_v51 = vadd.f32 %v1378_v61, %v1015_v58  ;;  %v1443_v53 = vpop.f32.mrf.mxu3  ;;  %v4767_v58 = vld [vmem:[#allocation2 + $0x44] sm:$0xff] }
 0x241   : > { %v4743_v37 = vadd.f32 %v1443_v53, %v1080_v44  ;;  %v1992_v44 = vld [vmem:[#allocation7 + $0x558] sm:$0xff] }
 0x242   : > { %2277 = vmatpush.msrb.mxu3 %v1992_v44 }
 0x244   : > { %3118 = vmatmul.msk.f32.gmra.mxu2 %vm360_vm0, %v4441_v15  ;;  %3150 = vmatmul.msk.f32.gmra.mxu0 %vm360_vm0, %v4745_v8 }
 0x245   : > { %3134 = vmatmul.msk.f32.gmra.mxu3 %vm360_vm0, %v4441_v15  ;;  %3166 = vmatmul.msk.f32.gmra.mxu1 %vm360_vm0, %v4745_v8 }
 0x246   : > { %2278 = vmatpush.msrb.mxu3 %v1988_v9  ;;  %v5510_v9 = vld [vmem:[#allocation68_spill] sm:$0xff] }
 0x247   : > { %v1381_v31 = vpop.f32.mrf.mxu2  ;;  %v1027_v49 = vadd.f32 %v4505_v4, %v5510_v9  ;;  %v5514_v4 = vld [vmem:[#allocation72_spill] sm:$0xff]  ;;  %v5515_v9 = vld [vmem:[#allocation113_spill] sm:$0xff] }
 0x248   : > { %v4761_v13 = vadd.f32 %v1381_v31, %v1018_v48  ;;  %v1446_v10 = vpop.f32.mrf.mxu3  ;;  %v4787_v48 = vpop.f32.mrf.mxu0  ;;  %v5505_v31 = vld [vmem:[#allocation66_spill] sm:$0xff] }
 0x249   : > { %v4765_v15 = vadd.f32 %v1446_v10, %v1083_v54  ;;  %v1987_v54 = vld [vmem:[#allocation7 + $0x530] sm:$0xff]  ;;  %v5506_v10 = vld [vmem:[#allocation105_spill] sm:$0xff] }
 0x24a   : > { %2213 = vmatpush.msrb.mxu2 %v1987_v54  ;;  %v1089_v44 = vadd.f32 %v5506_v10, %v5505_v31 }
 0x24c   : > { %3119 = vmatmul.msk.f32.gmra.mxu2 %vm360_vm0, %v4459_v62  ;;  %3151 = vmatmul.msk.f32.gmra.mxu0 %vm360_vm0, %v4767_v58 }
 0x24d   : > { %3135 = vmatmul.msk.f32.gmra.mxu3 %vm360_vm0, %v4459_v62  ;;  %3167 = vmatmul.msk.f32.gmra.mxu1 %vm360_vm0, %v4767_v58  ;;  %v4789_v62 = vpop.f32.mrf.mxu1 }
 0x24e   : > { %5502 = vst [vmem:[#allocation135_spill] sm:$0xff] %v4789_v62  ;;  %2214 = vmatpush.msrb.mxu2 %v1983_v34  ;;  %v5517_v34 = vld [vmem:[#allocation73_spill] sm:$0xff] }
 0x24f   : > { %v1384_v18 = vpop.f32.mrf.mxu2 }
 0x250   : > { %v4781_v29 = vadd.f32 %v1384_v18, %v1021_v14  ;;  %v1449_v61 = vpop.f32.mrf.mxu3 }
 0x251   : > { %v4783_v53 = vadd.f32 %v1449_v61, %v1086_v2 }
 0x254   : > { %3120 = vmatmul.msk.f32.gmra.mxu2 %vm360_vm0, %v4477_v19  ;;  %3152 = vmatmul.msk.f32.gmra.mxu0 %vm360_vm0, %v4785_v60 }
 0x255   : > { %3136 = vmatmul.msk.f32.gmra.mxu3 %vm360_vm0, %v4477_v19  ;;  %3168 = vmatmul.msk.f32.gmra.mxu1 %vm360_vm0, %v4785_v60  ;;  %v4809_v19 = vpop.f32.mrf.mxu0  ;;  %v4815_v54 = vpop.f32.mrf.mxu1 }
 0x256   : > { %5507 = vst [vmem:[#allocation64_spill] sm:$0xff] %v4809_v19  ;;  %v5532_v19 = vld [vmem:[#allocation120_spill] sm:$0xff] }
 0x257   : > { %v1387_v14 = vpop.f32.mrf.mxu2  ;;  %5509 = vst [vmem:[#allocation104_spill] sm:$0xff] %v4815_v54 }
 0x258   : > { %v4803_v2 = vadd.f32 %v1387_v14, %v1024_v59  ;;  %v1452_v18 = vpop.f32.mrf.mxu3  ;;  %v5512_v59 = vld [vmem:[#allocation109_spill] sm:$0xff] }
 0x259   : > { %v4805_v61 = vadd.f32 %v1452_v18, %v1089_v44  ;;  %v1092_v31 = vadd.f32 %v5512_v59, %v5511_v21  ;;  %v5518_v59 = vld [vmem:[#allocation114_spill] sm:$0xff] }
 0x25c   : > { %3121 = vmatmul.msk.f32.gmra.mxu2 %vm360_vm0, %v5508_v30  ;;  %3153 = vmatmul.msk.f32.gmra.mxu0 %vm360_vm0, %v4807_v33 }
 0x25d   : > { %3137 = vmatmul.msk.f32.gmra.mxu3 %vm360_vm0, %v5508_v30  ;;  %3169 = vmatmul.msk.f32.gmra.mxu1 %vm360_vm0, %v4807_v33  ;;  %v1984_v30 = vld [vmem:[#allocation7 + $0x518] sm:$0xff]  ;;  %v4841_v21 = vpop.f32.mrf.mxu0 }
 0x25e   : > { %5516 = vst [vmem:[#allocation66_spill] sm:$0xff] %v4841_v21  ;;  %2279 = vmatpush.msrb.mxu3 %v1984_v30  ;;  %v5520_v30 = vld [vmem:[#allocation76_spill] sm:$0xff] }
 0x25f   : > { %v1390_v10 = vpop.f32.mrf.mxu2 }
 0x260   : > { %v4825_v44 = vadd.f32 %v1390_v10, %v1027_v49  ;;  %v1455_v14 = vpop.f32.mrf.mxu3  ;;  %v1030_v49 = vadd.f32 %v5515_v9, %v5514_v4  ;;  %v4845_v10 = vpop.f32.mrf.mxu1  ;;  %v1033_v4 = vadd.f32 %v4541_v25, %v5520_v30  ;;  %v5521_v9 = vld [vmem:[#allocation77_spill] sm:$0xff]  ;;  %v5524_v25 = vld [vmem:[#allocation80_spill] sm:$0xff] }
 0x261   : > { %v4827_v18 = vadd.f32 %v1455_v14, %v1092_v31  ;;  %v1095_v31 = vadd.f32 %v5518_v59, %v5517_v34  ;;  %5519 = vst [vmem:[#allocation105_spill] sm:$0xff] %v4845_v10  ;;  %v1036_v30 = vadd.f32 %v4555_v52, %v5524_v25  ;;  %v2503_v52 = vld [vmem:[#allocation8 + $0x70] sm:$0xff] }
 0x262   : > { %v5529_v25 = vld [vmem:[#allocation84_spill] sm:$0xff] }
 0x264   : > { %3122 = vmatmul.msk.f32.gmra.mxu2 %vm360_vm0, %v5513_v36  ;;  %3154 = vmatmul.msk.f32.gmra.mxu0 %vm360_vm0, %v4829_v63 }
 0x265   : > { %3138 = vmatmul.msk.f32.gmra.mxu3 %vm360_vm0, %v5513_v36  ;;  %3170 = vmatmul.msk.f32.gmra.mxu1 %vm360_vm0, %v4829_v63  ;;  %v4851_v36 = vld [vmem:[#allocation2 + $0x64] sm:$0xff]  ;;  %v4865_v34 = vpop.f32.mrf.mxu0 }
 0x266   : > { %5522 = vst [vmem:[#allocation106_spill] sm:$0xff] %v4865_v34  ;;  %v4891_v34 = vld [vmem:[#allocation2 + $0x74] sm:$0xff] }
 0x267   : > { %v1393_v14 = vpop.f32.mrf.mxu2 }
 0x268   : > { %v4847_v50 = vadd.f32 %v1393_v14, %v1030_v49  ;;  %v1458_v43 = vpop.f32.mrf.mxu3  ;;  %v4869_v14 = vpop.f32.mrf.mxu1 }
 0x269   : > { %v4849_v35 = vadd.f32 %v1458_v43, %v1095_v31  ;;  %v1098_v43 = vadd.f32 %v4543_v55, %v5521_v9  ;;  %5523 = vst [vmem:[#allocation68_spill] sm:$0xff] %v4869_v14  ;;  %v2504_v55 = vld [vmem:[#allocation8 + $0x78] sm:$0xff] }
 0x26a   : > { %2521 = vmatpush.msrb.mxu0 %v2504_v55 }
 0x26c   : > { %3123 = vmatmul.msk.f32.gmra.mxu2 %vm360_vm0, %v4527_v20  ;;  %3155 = vmatmul.msk.f32.gmra.mxu0 %vm360_vm0, %v4851_v36 }
 0x26d   : > { %3139 = vmatmul.msk.f32.gmra.mxu3 %vm360_vm0, %v4527_v20  ;;  %3171 = vmatmul.msk.f32.gmra.mxu1 %vm360_vm0, %v4851_v36  ;;  %v4873_v20 = vld [vmem:[#allocation2 + $0x6c] sm:$0xff]  ;;  %v4893_v21 = vpop.f32.mrf.mxu0 }
 0x26e   : > { %5526 = vst [vmem:[#allocation69_spill] sm:$0xff] %v4893_v21  ;;  %2522 = vmatpush.msrb.mxu0 %v2503_v52  ;;  %v2502_v52 = vld [vmem:[#allocation8 + $0x68] sm:$0xff] }
 0x26f   : > { %v1396_v49 = vpop.f32.mrf.mxu2 }
 0x270   : > { %v4867_v59 = vadd.f32 %v1396_v49, %v1033_v4  ;;  %v1461_v31 = vpop.f32.mrf.mxu3  ;;  %v5525_v4 = vld [vmem:[#allocation81_spill] sm:$0xff]  ;;  %v4895_v54 = vpop.f32.mrf.mxu1  ;;  %2523 = vmatpush.msrb.mxu0 %v2502_v52 }
 0x271   : > { %v4871_v10 = vadd.f32 %v1461_v31, %v1098_v43  ;;  %v1101_v9 = vadd.f32 %v4559_v56, %v5525_v4  ;;  %5527 = vst [vmem:[#allocation109_spill] sm:$0xff] %v4895_v54  ;;  %v5528_v56 = vld [vmem:[#allocation82_spill] sm:$0xff]  ;;  %v4913_v54 = vld [vmem:[#allocation2 + $0x7c] sm:$0xff] }
 0x272   : > { %v1039_v55 = vadd.f32 %v4573_v5, %v5528_v56  ;;  %v5534_v56 = vld [vmem:[#allocation86_spill] sm:$0xff] }
 0x274   : > { %3124 = vmatmul.msk.f32.gmra.mxu2 %vm360_vm0, %v4545_v22  ;;  %3156 = vmatmul.msk.f32.gmra.mxu0 %vm360_vm0, %v4873_v20 }
 0x275   : > { %3140 = vmatmul.msk.f32.gmra.mxu3 %vm360_vm0, %v4545_v22  ;;  %3172 = vmatmul.msk.f32.gmra.mxu1 %vm360_vm0, %v4873_v20  ;;  %v2520_v22 = vld [vmem:[#allocation8 + $0xf8] sm:$0xff]  ;;  %v4915_v21 = vpop.f32.mrf.mxu0 }
 0x276   : > { %2586 = vmatpush.msrb.mxu1 %v2520_v22  ;;  %5531 = vst [vmem:[#allocation110_spill] sm:$0xff] %v4915_v21 }
 0x277   : > { %v1399_v43 = vpop.f32.mrf.mxu2 }
 0x278   : > { %v4887_v49 = vadd.f32 %v1399_v43, %v1036_v30  ;;  %v1464_v31 = vpop.f32.mrf.mxu3  ;;  %v5530_v30 = vld [vmem:[#allocation119_spill] sm:$0xff]  ;;  %v4921_v5 = vpop.f32.mrf.mxu1 }
 0x279   : > { %v4889_v14 = vadd.f32 %v1464_v31, %v1101_v9  ;;  %v1104_v4 = vadd.f32 %v5530_v30, %v5529_v25  ;;  %5533 = vst [vmem:[#allocation72_spill] sm:$0xff] %v4921_v5  ;;  %v5536_v30 = vld [vmem:[#allocation87_spill] sm:$0xff] }
 0x27a   : > { %v2518_v5 = vld [vmem:[#allocation8 + $0xe8] sm:$0xff] }
 0x27c   : > { %3125 = vmatmul.msk.f32.gmra.mxu2 %vm360_vm0, %v4563_v17  ;;  %3157 = vmatmul.msk.f32.gmra.mxu0 %vm360_vm0, %v4891_v34 }
 0x27d   : > { %3141 = vmatmul.msk.f32.gmra.mxu3 %vm360_vm0, %v4563_v17  ;;  %3173 = vmatmul.msk.f32.gmra.mxu1 %vm360_vm0, %v4891_v34  ;;  %v2519_v17 = vld [vmem:[#allocation8 + $0xf0] sm:$0xff] }
 0x27e   : > { %2587 = vmatpush.msrb.mxu1 %v2519_v17 }
 0x27f   : > { %v1402_v9 = vpop.f32.mrf.mxu2 }
 0x280   : > { %v4909_v43 = vadd.f32 %v1402_v9, %v1039_v55  ;;  %v1467_v31 = vpop.f32.mrf.mxu3  ;;  %v5535_v55 = vld [vmem:[#allocation123_spill] sm:$0xff]  ;;  %2588 = vmatpush.msrb.mxu1 %v2518_v5  ;;  %v2500_v5 = vld [vmem:[#allocation8 + $0x58] sm:$0xff] }
 0x281   : > { %v4911_v22 = vadd.f32 %v1467_v31, %v1104_v4  ;;  %v1042_v25 = vadd.f32 %v5535_v55, %v5534_v56  ;;  %v5537_v4 = vld [vmem:[#allocation124_spill] sm:$0xff] }
 0x282   : > { %v1107_v9 = vadd.f32 %v5537_v4, %v5536_v30 }
 0x284   : > { %3126 = vmatmul.msk.f32.gmra.mxu2 %vm360_vm0, %v5532_v19  ;;  %3158 = vmatmul.msk.f32.gmra.mxu0 %vm360_vm0, %v4913_v54 }
 0x285   : > { %3142 = vmatmul.msk.f32.gmra.mxu3 %vm360_vm0, %v5532_v19  ;;  %3174 = vmatmul.msk.f32.gmra.mxu1 %vm360_vm0, %v4913_v54  ;;  %v2501_v19 = vld [vmem:[#allocation8 + $0x60] sm:$0xff] }
 0x286   : > { %2524 = vmatpush.msrb.mxu0 %v2501_v19 }
 0x287   : > { %v1405_v31 = vpop.f32.mrf.mxu2 }
 0x288   : > { %v4931_v17 = vadd.f32 %v1405_v31, %v1042_v25  ;;  %v1470_v21 = vpop.f32.mrf.mxu3  ;;  %2525 = vmatpush.msrb.mxu0 %v2500_v5  ;;  %v4961_v31 = vpop.f32.mrf.mxu1 }
 0x289   : > { %v4933_v62 = vadd.f32 %v1470_v21, %v1107_v9  ;;  %v2517_v21 = vld [vmem:[#allocation8 + $0xe0] sm:$0xff]  ;;  %v4957_v9 = vpop.f32.mrf.mxu0 }
 0x28a   : > { %2589 = vmatpush.msrb.mxu1 %v2517_v21 }
 0x28c   : > { %3175 = vmatmul.msk.f32.vlgmr.msrb.gmra.mxu2 %vm360_vm0, %v4595_v23 }
 0x28d   : > { %3191 = vmatmul.msk.f32.vlgmr.msrb.gmra.mxu3 %vm360_vm0, %v4595_v23 }
 0x28f   : > { %v1788_v52 = vpop.f32.mrf.mxu2 }
 0x290   : > { %v4940_v56 = vadd.f32 %v1788_v52, %v4613_v6  ;;  %v1853_v55 = vpop.f32.mrf.mxu3 }
 0x291   : > { %v4943_v25 = vadd.f32 %v1853_v55, %v4615_v1  ;;  %v2516_v1 = vld [vmem:[#allocation8 + $0xd8] sm:$0xff]  ;;  %v2515_v55 = vld [vmem:[#allocation8 + $0xd0] sm:$0xff]  ;;  %v4973_v21 = vpop.f32.mrf.mxu0 }
 0x292   : > { %2590 = vmatpush.msrb.mxu1 %v2516_v1  ;;  %v2514_v1 = vld [vmem:[#allocation8 + $0xc8] sm:$0xff] }
 0x294   : > { %3176 = vmatmul.msk.f32.gmra.mxu2 %vm360_vm0, %v4617_v47  ;;  %2591 = vmatpush.msrb.mxu1 %v2515_v55  ;;  %v2513_v55 = vld [vmem:[#allocation8 + $0xc0] sm:$0xff] }
 0x295   : > { %3192 = vmatmul.msk.f32.gmra.mxu3 %vm360_vm0, %v4617_v47  ;;  %v2499_v47 = vld [vmem:[#allocation8 + $0x50] sm:$0xff] }
 0x296   : > { %2526 = vmatpush.msrb.mxu0 %v2499_v47  ;;  %2592 = vmatpush.msrb.mxu1 %v2514_v1  ;;  %v2512_v1 = vld [vmem:[#allocation8 + $0xb8] sm:$0xff] }
 0x297   : > { %v1791_v23 = vpop.f32.mrf.mxu2 }
 0x298   : > { %v4950_v30 = vadd.f32 %v1791_v23, %v4635_v0  ;;  %v1856_v6 = vpop.f32.mrf.mxu3  ;;  %v4975_v23 = vpop.f32.mrf.mxu1  ;;  %2593 = vmatpush.msrb.mxu1 %v2513_v55 }
 0x299   : > { %v4953_v4 = vadd.f32 %v1856_v6, %v4637_v42 }
 0x29a   : > { %2594 = vmatpush.msrb.mxu1 %v2512_v1 }
 0x29c   : > { %3177 = vmatmul.msk.f32.gmra.mxu2 %vm360_vm0, %v4639_v12 }
 0x29d   : > { %3193 = vmatmul.msk.f32.gmra.mxu3 %vm360_vm0, %v4639_v12  ;;  %v2498_v12 = vld [vmem:[#allocation8 + $0x48] sm:$0xff] }
 0x29e   : > { %2527 = vmatpush.msrb.mxu0 %v2498_v12 }
 0x29f   : > { %v1794_v0 = vpop.f32.mrf.mxu2 }
 0x2a0   : > { %v4964_v19 = vadd.f32 %v1794_v0, %v4655_v57  ;;  %v1859_v42 = vpop.f32.mrf.mxu3  ;;  %v4995_v12 = vpop.f32.mrf.mxu1 }
 0x2a1   : > { %v4967_v52 = vadd.f32 %v1859_v42, %v4659_v16  ;;  %v4990_v42 = vpop.f32.mrf.mxu0 }
 0x2a4   : > { %3178 = vmatmul.msk.f32.gmra.mxu2 %vm360_vm0, %v4661_v41 }
 0x2a5   : > { %3194 = vmatmul.msk.f32.gmra.mxu3 %vm360_vm0, %v4661_v41  ;;  %v2497_v41 = vld [vmem:[#allocation8 + $0x40] sm:$0xff] }
 0x2a6   : > { %2528 = vmatpush.msrb.mxu0 %v2497_v41 }
 0x2a7   : > { %v1797_v5 = vpop.f32.mrf.mxu2 }
 0x2a8   : > { %v4978_v57 = vadd.f32 %v1797_v5, %v4675_v27  ;;  %v1862_v16 = vpop.f32.mrf.mxu3 }
 0x2a9   : > { %v4981_v6 = vadd.f32 %v1862_v16, %v4677_v7  ;;  %v5007_v41 = vpop.f32.mrf.mxu0 }
 0x2ac   : > { %3179 = vmatmul.msk.f32.gmra.mxu2 %vm360_vm0, %v4679_v46 }
 0x2ad   : > { %3195 = vmatmul.msk.f32.gmra.mxu3 %vm360_vm0, %v4679_v46  ;;  %v2496_v46 = vld [vmem:[#allocation8 + $0x38] sm:$0xff] }
 0x2ae   : > { %2529 = vmatpush.msrb.mxu0 %v2496_v46  ;;  %v2511_v46 = vld [vmem:[#allocation8 + $0xb0] sm:$0xff] }
 0x2af   : > { %v1800_v47 = vpop.f32.mrf.mxu2  ;;  %2595 = vmatpush.msrb.mxu1 %v2511_v46 }
 0x2b0   : > { %v4988_v0 = vadd.f32 %v1800_v47, %v4697_v11  ;;  %v1865_v27 = vpop.f32.mrf.mxu3  ;;  %v5009_v47 = vpop.f32.mrf.mxu1 }
 0x2b1   : > { %v4993_v7 = vadd.f32 %v1865_v27, %v4699_v39 }
 0x2b4   : > { %3180 = vmatmul.msk.f32.gmra.mxu2 %vm360_vm0, %v4701_v28 }
 0x2b5   : > { %3196 = vmatmul.msk.f32.gmra.mxu3 %vm360_vm0, %v4701_v28  ;;  %v2495_v28 = vld [vmem:[#allocation8 + $0x30] sm:$0xff] }
 0x2b6   : > { %2530 = vmatpush.msrb.mxu0 %v2495_v28 }
 0x2b7   : > { %v1803_v11 = vpop.f32.mrf.mxu2 }
 0x2b8   : > { %v5002_v5 = vadd.f32 %v1803_v11, %v4719_v3  ;;  %v1868_v16 = vpop.f32.mrf.mxu3  ;;  %v5023_v11 = vpop.f32.mrf.mxu0 }
 0x2b9   : > { %v5005_v39 = vadd.f32 %v1868_v16, %v4721_v40  ;;  %5538 = vst [vmem:[#allocation113_spill] sm:$0xff] %v5023_v11  ;;  %v5027_v16 = vpop.f32.mrf.mxu1  ;;  %v5565_v11 = vld [vmem:[#allocation95_spill] sm:$0xff] }
 0x2ba   : > { %5539 = vst [vmem:[#allocation73_spill] sm:$0xff] %v5027_v16 }
 0x2bc   : > { %3181 = vmatmul.msk.f32.gmra.mxu2 %vm360_vm0, %v4723_v32 }
 0x2bd   : > { %3197 = vmatmul.msk.f32.gmra.mxu3 %vm360_vm0, %v4723_v32  ;;  %v2494_v32 = vld [vmem:[#allocation8 + $0x28] sm:$0xff] }
 0x2be   : > { %2531 = vmatpush.msrb.mxu0 %v2494_v32 }
 0x2bf   : > { %v1806_v3 = vpop.f32.mrf.mxu2 }
 0x2c0   : > { %v5016_v27 = vadd.f32 %v1806_v3, %v4741_v51  ;;  %v1871_v40 = vpop.f32.mrf.mxu3  ;;  %v2510_v3 = vld [vmem:[#allocation8 + $0xa8] sm:$0xff] }
 0x2c1   : > { %v5019_v55 = vadd.f32 %v1871_v40, %v4743_v37  ;;  %2596 = vmatpush.msrb.mxu1 %v2510_v3  ;;  %v5039_v40 = vpop.f32.mrf.mxu0  ;;  %v5041_v32 = vpop.f32.mrf.mxu1 }
 0x2c2   : > { %5540 = vst [vmem:[#allocation114_spill] sm:$0xff] %v5039_v40 }
 0x2c3   : > { %5541 = vst [vmem:[#allocation76_spill] sm:$0xff] %v5041_v32  ;;  %v5559_v32 = vld [vmem:[#allocation93_spill] sm:$0xff] }
 0x2c4   : > { %3182 = vmatmul.msk.f32.gmra.mxu2 %vm360_vm0, %v4745_v8 }
 0x2c5   : > { %3198 = vmatmul.msk.f32.gmra.mxu3 %vm360_vm0, %v4745_v8  ;;  %v2493_v8 = vld [vmem:[#allocation8 + $0x20] sm:$0xff] }
 0x2c6   : > { %2532 = vmatpush.msrb.mxu0 %v2493_v8 }
 0x2c7   : > { %v1809_v51 = vpop.f32.mrf.mxu2 }
 0x2c8   : > { %v5030_v1 = vadd.f32 %v1809_v51, %v4761_v13  ;;  %v1874_v37 = vpop.f32.mrf.mxu3 }
 0x2c9   : > { %v5033_v28 = vadd.f32 %v1874_v37, %v4765_v15  ;;  %v2509_v37 = vld [vmem:[#allocation8 + $0xa0] sm:$0xff] }
 0x2ca   : > { %2597 = vmatpush.msrb.mxu1 %v2509_v37  ;;  %v5061_v37 = vpop.f32.mrf.mxu1 }
 0x2cb   : > { %5543 = vst [vmem:[#allocation80_spill] sm:$0xff] %v5061_v37 }
 0x2cc   : > { %3183 = vmatmul.msk.f32.gmra.mxu2 %vm360_vm0, %v4767_v58 }
 0x2cd   : > { %3199 = vmatmul.msk.f32.gmra.mxu3 %vm360_vm0, %v4767_v58  ;;  %v2492_v58 = vld [vmem:[#allocation8 + $0x18] sm:$0xff] }
 0x2ce   : > { %2533 = vmatpush.msrb.mxu0 %v2492_v58 }
 0x2cf   : > { %v1812_v46 = vpop.f32.mrf.mxu2 }
 0x2d0   : > { %v5044_v13 = vadd.f32 %v1812_v46, %v4781_v29  ;;  %v1877_v15 = vpop.f32.mrf.mxu3  ;;  %v5056_v46 = vpop.f32.mrf.mxu0 }
 0x2d1   : > { %v5047_v51 = vadd.f32 %v1877_v15, %v4783_v53  ;;  %5542 = vst [vmem:[#allocation77_spill] sm:$0xff] %v5056_v46  ;;  %v2508_v15 = vld [vmem:[#allocation8 + $0x98] sm:$0xff] }
 0x2d2   : > { %2598 = vmatpush.msrb.mxu1 %v2508_v15  ;;  %v5075_v15 = vpop.f32.mrf.mxu1 }
 0x2d3   : > { %5545 = vst [vmem:[#allocation82_spill] sm:$0xff] %v5075_v15 }
 0x2d4   : > { %3184 = vmatmul.msk.f32.gmra.mxu2 %vm360_vm0, %v4785_v60 }
 0x2d5   : > { %3200 = vmatmul.msk.f32.gmra.mxu3 %vm360_vm0, %v4785_v60  ;;  %v2491_v60 = vld [vmem:[#allocation8 + $0x10] sm:$0xff] }
 0x2d6   : > { %2534 = vmatpush.msrb.mxu0 %v2491_v60 }
 0x2d7   : > { %v1815_v3 = vpop.f32.mrf.mxu2 }
 0x2d8   : > { %v5054_v8 = vadd.f32 %v1815_v3, %v4803_v2  ;;  %v1880_v29 = vpop.f32.mrf.mxu3  ;;  %v5073_v37 = vpop.f32.mrf.mxu0 }
 0x2d9   : > { %v5059_v53 = vadd.f32 %v1880_v29, %v4805_v61  ;;  %v2507_v29 = vld [vmem:[#allocation8 + $0x90] sm:$0xff]  ;;  %5544 = vst [vmem:[#allocation81_spill] sm:$0xff] %v5073_v37 }
 0x2da   : > { %2599 = vmatpush.msrb.mxu1 %v2507_v29  ;;  %v2489_v29 = vld [vmem:[#allocation8] sm:$0xff] }
 0x2dc   : > { %3185 = vmatmul.msk.f32.gmra.mxu2 %vm360_vm0, %v4807_v33 }
 0x2dd   : > { %3201 = vmatmul.msk.f32.gmra.mxu3 %vm360_vm0, %v4807_v33  ;;  %v2490_v33 = vld [vmem:[#allocation8 + $0x8] sm:$0xff] }
 0x2de   : > { %2535 = vmatpush.msrb.mxu0 %v2490_v33 }
 0x2df   : > { %v1818_v2 = vpop.f32.mrf.mxu2 }
 0x2e0   : > { %v5068_v58 = vadd.f32 %v1818_v2, %v4825_v44  ;;  %v1883_v3 = vpop.f32.mrf.mxu3  ;;  %2536 = vmatpush.msrb.mxu0 %v2489_v29  ;;  %v2086_v15 = vpop.f32.mrf.mxu0 }
 0x2e1   : > { %v5071_v61 = vadd.f32 %v1883_v3, %v4827_v18  ;;  %v2506_v3 = vld [vmem:[#allocation8 + $0x88] sm:$0xff] }
 0x2e2   : > { %2600 = vmatpush.msrb.mxu1 %v2506_v3 }
 0x2e4   : > { %3186 = vmatmul.msk.f32.gmra.mxu2 %vm360_vm0, %v4829_v63 }
 0x2e5   : > { %3202 = vmatmul.msk.f32.gmra.mxu3 %vm360_vm0, %v4829_v63  ;;  %v2151_v63 = vpop.f32.mrf.mxu1 }
 0x2e7   : > { %v1821_v44 = vpop.f32.mrf.mxu2 }
 0x2e8   : > { %v5082_v60 = vadd.f32 %v1821_v44, %v4847_v50  ;;  %v1886_v18 = vpop.f32.mrf.mxu3  ;;  %v2089_v3 = vpop.f32.mrf.mxu0 }
 0x2e9   : > { %v5085_v2 = vadd.f32 %v1886_v18, %v4849_v35  ;;  %v2505_v18 = vld [vmem:[#allocation8 + $0x80] sm:$0xff] }
 0x2ea   : > { %2601 = vmatpush.msrb.mxu1 %v2505_v18 }
 0x2ec   : > { %3187 = vmatmul.msk.f32.gmra.mxu2 %vm360_vm0, %v4851_v36 }
 0x2ed   : > { %3203 = vmatmul.msk.f32.gmra.mxu3 %vm360_vm0, %v4851_v36  ;;  %v2154_v36 = vpop.f32.mrf.mxu1 }
 0x2ef   : > { %v1824_v33 = vpop.f32.mrf.mxu2 }
 0x2f0   : > { %v5092_v50 = vadd.f32 %v1824_v33, %v4867_v59  ;;  %v1889_v44 = vpop.f32.mrf.mxu3  ;;  %v2092_v18 = vpop.f32.mrf.mxu0 }
 0x2f1   : > { %v5095_v35 = vadd.f32 %v1889_v44, %v4871_v10 }
 0x2f2   : > { %5546 = vst [vmem:[#allocation84_spill] sm:$0xff] %v5092_v50 }
 0x2f3   : > { %5547 = vst [vmem:[#allocation119_spill] sm:$0xff] %v5095_v35 }
 0x2f4   : > { %3188 = vmatmul.msk.f32.gmra.mxu2 %vm360_vm0, %v4873_v20 }
 0x2f5   : > { %3204 = vmatmul.msk.f32.gmra.mxu3 %vm360_vm0, %v4873_v20 }
 0x2f7   : > { %v1827_v29 = vpop.f32.mrf.mxu2 }
 0x2f8   : > { %v5102_v37 = vadd.f32 %v1827_v29, %v4887_v49  ;;  %v1892_v59 = vpop.f32.mrf.mxu3  ;;  %v2157_v49 = vpop.f32.mrf.mxu1  ;;  %v5552_v29 = vld [vmem:[#allocation14_spill] sm:$0xff] }
 0x2f9   : > { %v5105_v33 = vadd.f32 %v1892_v59, %v4889_v14  ;;  %v5553_v59 = vld [vmem:[#allocation46_spill] sm:$0xff]  ;;  %v5133_v35 = vpop.f32.mrf.mxu0 }
 0x2fa   : > { %5548 = vst [vmem:[#allocation120_spill] sm:$0xff] %v5102_v37 }
 0x2fb   : > { %5549 = vst [vmem:[#allocation86_spill] sm:$0xff] %v5105_v33 }
 0x2fc   : > { %3189 = vmatmul.msk.f32.gmra.mxu2 %vm360_vm0, %v4891_v34 }
 0x2fd   : > { %3205 = vmatmul.msk.f32.gmra.mxu3 %vm360_vm0, %v4891_v34  ;;  %v867_v34 = vadd.f32 %v5553_v59, %v5552_v29 }
 0x2ff   : > { %v1830_v10 = vpop.f32.mrf.mxu2 }
 0x300   : > { %v5112_v20 = vadd.f32 %v1830_v10, %v4909_v43  ;;  %v1895_v44 = vpop.f32.mrf.mxu3  ;;  %v5555_v10 = vld [vmem:[#allocation15_spill] sm:$0xff]  ;;  %v5136_v50 = vpop.f32.mrf.mxu1 }
 0x301   : > { %v5115_v46 = vadd.f32 %v1895_v44, %v4911_v22  ;;  %v5558_v44 = vld [vmem:[#allocation92_spill] sm:$0xff] }
 0x302   : > { %5550 = vst [vmem:[#allocation123_spill] sm:$0xff] %v5112_v20  ;;  %v5556_v20 = vld [vmem:[#allocation47_spill] sm:$0xff] }
 0x303   : > { %5551 = vst [vmem:[#allocation87_spill] sm:$0xff] %v5115_v46  ;;  %v932_v37 = vadd.f32 %v5556_v20, %v5555_v10  ;;  %v1473_v46 = vadd.f32 %v5558_v44, %v867_v34  ;;  %v5561_v20 = vld [vmem:[#allocation48_spill] sm:$0xff]  ;;  %v5562_v34 = vld [vmem:[#allocation19_spill] sm:$0xff]  ;;  %v5563_v44 = vld [vmem:[#allocation49_spill] sm:$0xff] }
 0x304   : > { %3190 = vmatmul.msk.f32.gmra.mxu2 %vm360_vm0, %v4913_v54 }
 0x305   : > { %3206 = vmatmul.msk.f32.gmra.mxu3 %vm360_vm0, %v4913_v54  ;;  %v1474_v40 = vadd.f32 %v5559_v32, %v932_v37  ;;  %v1901_v54 = vadd.f32 %v4735_v45, %v1473_v46  ;;  %v935_v32 = vadd.f32 %v5563_v44, %v5562_v34  ;;  %v5570_v34 = vld [vmem:[#allocation96_spill] sm:$0xff] }
 0x307   : > { %v1833_v14 = vpop.f32.mrf.mxu2 }
 0x308   : > { %v5124_v33 = vadd.f32 %v1833_v14, %v4931_v17  ;;  %v1898_v43 = vpop.f32.mrf.mxu3  ;;  %v1902_v17 = vadd.f32 %v4739_v26, %v1474_v40  ;;  %v2329_v14 = vadd.f32 %v2086_v15, %v1901_v54  ;;  %v1478_v26 = vadd.f32 %v5565_v11, %v935_v32 }
 0x309   : > { %v5129_v22 = vadd.f32 %v1898_v43, %v4933_v62 }
 0x30a   : > { %5554 = vst [vmem:[#allocation124_spill] sm:$0xff] %v5124_v33  ;;  %v2330_v29 = vadd.f32 %v2151_v63, %v1902_v17  ;;  %v5560_v33 = vld [vmem:[#allocation18_spill] sm:$0xff]  ;;  %v2393_v46 = vmul.f32 %v2329_v14, %v2329_v14 }
 0x30b   : > { %5557 = vst [vmem:[#allocation14_spill] sm:$0xff] %v5129_v22  ;;  %v870_v10 = vadd.f32 %v5561_v20, %v5560_v33  ;;  %v5564_v22 = vld [vmem:[#allocation94_spill] sm:$0xff]  ;;  %v1906_v33 = vadd.f32 %v4763_v24, %v1478_v26  ;;  %v5151_v20 = vpop.f32.mrf.mxu1 }
 0x30c   : > { %v2394_v40 = vmul.f32 %v2330_v29, %v2330_v29  ;;  %v5566_v14 = vld [vmem:[#allocation22_spill] sm:$0xff] }
 0x30d   : > { %v1477_v45 = vadd.f32 %v5564_v22, %v870_v10  ;;  %v5567_v10 = vld [vmem:[#allocation50_spill] sm:$0xff] }
 0x30e   : > { %v873_v11 = vadd.f32 %v5567_v10, %v5566_v14 }
 0x30f   : > { %v2216_v59 = vpop.f32.mrf.mxu2  ;;  %v1905_v63 = vadd.f32 %v4759_v38, %v1477_v45  ;;  %v5568_v38 = vld [vmem:[#allocation23_spill] sm:$0xff] }
 0x310   : > { %v2331_v62 = vadd.f32 %v2216_v59, %v4940_v56  ;;  %v2281_v43 = vpop.f32.mrf.mxu3  ;;  %v5149_v56 = vpop.f32.mrf.mxu0  ;;  %v1481_v44 = vadd.f32 %v5570_v34, %v873_v11 }
 0x311   : > { %v2332_v37 = vadd.f32 %v2281_v43, %v4943_v25  ;;  %v2333_v59 = vadd.f32 %v2089_v3, %v1905_v63  ;;  %v2334_v25 = vadd.f32 %v2154_v36, %v1906_v33 }
 0x312   : > { %v2425_v16 = vmul.f32 %v2331_v62, %v2331_v62  ;;  %v1909_v26 = vadd.f32 %v4787_v48, %v1481_v44  ;;  %v5576_v48 = vld [vmem:[#allocation53_spill] sm:$0xff] }
 0x313   : > { %v2426_v15 = vmul.f32 %v2332_v37, %v2332_v37  ;;  %v2395_v3 = vmul.f32 %v2333_v59, %v2333_v59  ;;  %v5571_v37 = vld [vmem:[#allocation97_spill] sm:$0xff]  ;;  %v2396_v36 = vmul.f32 %v2334_v25, %v2334_v25  ;;  %v5574_v59 = vld [vmem:[#allocation52_spill] sm:$0xff]  ;;  %v2166_v10 = vpop.f32.mrf.mxu1 }
 0x314   : > { %v2457_v54 = vadd.f32 %v2425_v16, %v2393_v46  ;;  %v5569_v16 = vld [vmem:[#allocation51_spill] sm:$0xff] }
 0x315   : > { %v2458_v17 = vadd.f32 %v2426_v15, %v2394_v40  ;;  %v938_v43 = vadd.f32 %v5569_v16, %v5568_v38  ;;  %v5572_v15 = vld [vmem:[#allocation135_spill] sm:$0xff]  ;;  %v5577_v16 = vld [vmem:[#allocation98_spill] sm:$0xff] }
 0x316   : > { %2537 = vmatmul.f32.vlgmr.msrb.gmra.mxu0 %v2457_v54  ;;  %v2337_v54 = vadd.f32 %v2092_v18, %v1909_v26 }
 0x317   : > { %2602 = vmatmul.f32.vlgmr.msrb.gmra.mxu1 %v2458_v17  ;;  %v2219_v22 = vpop.f32.mrf.mxu2  ;;  %v1482_v45 = vadd.f32 %v5571_v37, %v938_v43 }
 0x318   : > { %v2335_v29 = vadd.f32 %v2219_v22, %v4950_v30  ;;  %v2284_v62 = vpop.f32.mrf.mxu3  ;;  %v5163_v17 = vpop.f32.mrf.mxu0  ;;  %v5573_v22 = vld [vmem:[#allocation26_spill] sm:$0xff]  ;;  %v2397_v43 = vmul.f32 %v2337_v54, %v2337_v54 }
 0x319   : > { %v2336_v24 = vadd.f32 %v2284_v62, %v4953_v4  ;;  %v1910_v63 = vadd.f32 %v5572_v15, %v1482_v45  ;;  %v876_v14 = vadd.f32 %v5574_v59, %v5573_v22  ;;  %v5581_v15 = vld [vmem:[#allocation30_spill] sm:$0xff]  ;;  %v5584_v22 = vld [vmem:[#allocation55_spill] sm:$0xff] }
 0x31a   : > { %v2427_v32 = vmul.f32 %v2335_v29, %v2335_v29  ;;  %v5575_v29 = vld [vmem:[#allocation27_spill] sm:$0xff] }
 0x31b   : > { %v2428_v46 = vmul.f32 %v2336_v24, %v2336_v24  ;;  %v2338_v33 = vadd.f32 %v2157_v49, %v1910_v63  ;;  %v941_v62 = vadd.f32 %v5576_v48, %v5575_v29  ;;  %v1485_v18 = vadd.f32 %v5577_v16, %v876_v14  ;;  %v5578_v24 = vld [vmem:[#allocation99_spill] sm:$0xff]  ;;  %v5582_v63 = vld [vmem:[#allocation54_spill] sm:$0xff]  ;;  %v2169_v48 = vpop.f32.mrf.mxu1 }
 0x31c   : > { %v2459_v40 = vadd.f32 %v2427_v32, %v2395_v3  ;;  %v5579_v32 = vld [vmem:[#allocation64_spill] sm:$0xff] }
 0x31d   : > { %v2460_v30 = vadd.f32 %v2428_v46, %v2396_v36  ;;  %v1486_v34 = vadd.f32 %v5578_v24, %v941_v62  ;;  %v2398_v44 = vmul.f32 %v2338_v33, %v2338_v33  ;;  %v1913_v37 = vadd.f32 %v5579_v32, %v1485_v18  ;;  %v5580_v36 = vld [vmem:[#allocation104_spill] sm:$0xff] }
 0x31e   : > { %2540 = vmatmul.f32.gmra.mxu0 %v2459_v40 }
 0x31f   : > { %2605 = vmatmul.f32.gmra.mxu1 %v2460_v30  ;;  %v2222_v4 = vpop.f32.mrf.mxu2  ;;  %v1914_v46 = vadd.f32 %v5580_v36, %v1486_v34  ;;  %v2341_v26 = vadd.f32 %v5133_v35, %v1913_v37  ;;  %v879_v30 = vadd.f32 %v5582_v63, %v5581_v15  ;;  %v5589_v37 = vld [vmem:[#allocation34_spill] sm:$0xff] }
 0x320   : > { %v2339_v25 = vadd.f32 %v2222_v4, %v4964_v19  ;;  %v2287_v11 = vpop.f32.mrf.mxu3  ;;  %v5583_v4 = vld [vmem:[#allocation31_spill] sm:$0xff]  ;;  %v2104_v14 = vpop.f32.mrf.mxu0  ;;  %v5593_v63 = vld [vmem:[#allocation102_spill] sm:$0xff] }
 0x321   : > { %v2340_v38 = vadd.f32 %v2287_v11, %v4967_v52  ;;  %v2342_v40 = vadd.f32 %v5136_v50, %v1914_v46  ;;  %v944_v59 = vadd.f32 %v5584_v22, %v5583_v4  ;;  %v5585_v11 = vld [vmem:[#allocation100_spill] sm:$0xff]  ;;  %v2399_v35 = vmul.f32 %v2341_v26, %v2341_v26  ;;  %v5586_v50 = vld [vmem:[#allocation101_spill] sm:$0xff]  ;;  %v5591_v26 = vld [vmem:[#allocation35_spill] sm:$0xff] }
 0x322   : > { %v2429_v49 = vmul.f32 %v2339_v25, %v2339_v25  ;;  %v1489_v29 = vadd.f32 %v5585_v11, %v879_v30 }
 0x323   : > { %v2430_v3 = vmul.f32 %v2340_v38, %v2340_v38  ;;  %v1490_v38 = vadd.f32 %v5586_v50, %v944_v59  ;;  %v2400_v16 = vmul.f32 %v2342_v40, %v2342_v40  ;;  %v5592_v40 = vld [vmem:[#allocation57_spill] sm:$0xff] }
 0x324   : > { %v2461_v45 = vadd.f32 %v2429_v49, %v2397_v43  ;;  %v5587_v43 = vld [vmem:[#allocation66_spill] sm:$0xff] }
 0x325   : > { %v2462_v19 = vadd.f32 %v2430_v3, %v2398_v44  ;;  %v1917_v49 = vadd.f32 %v5587_v43, %v1489_v29  ;;  %v2172_v29 = vpop.f32.mrf.mxu1  ;;  %v5598_v43 = vld [vmem:[#allocation58_spill] sm:$0xff] }
 0x326   : > { %2543 = vmatmul.f32.gmra.mxu0 %v2461_v45  ;;  %v5590_v45 = vld [vmem:[#allocation56_spill] sm:$0xff] }
 0x327   : > { %2608 = vmatmul.f32.gmra.mxu1 %v2462_v19  ;;  %v2225_v52 = vpop.f32.mrf.mxu2  ;;  %v2345_v3 = vadd.f32 %v5149_v56, %v1917_v49  ;;  %v882_v36 = vadd.f32 %v5590_v45, %v5589_v37 }
 0x328   : > { %v2343_v54 = vadd.f32 %v2225_v52, %v4978_v57  ;;  %v2290_v33 = vpop.f32.mrf.mxu3  ;;  %v5588_v57 = vld [vmem:[#allocation105_spill] sm:$0xff]  ;;  %v947_v52 = vadd.f32 %v5592_v40, %v5591_v26  ;;  %v2107_v22 = vpop.f32.mrf.mxu0 }
 0x329   : > { %v2344_v25 = vadd.f32 %v2290_v33, %v4981_v6  ;;  %v1918_v34 = vadd.f32 %v5588_v57, %v1490_v38  ;;  %v1493_v30 = vadd.f32 %v5593_v63, %v882_v36  ;;  %v5594_v33 = vld [vmem:[#allocation103_spill] sm:$0xff]  ;;  %v5603_v26 = vld [vmem:[#allocation69_spill] sm:$0xff] }
 0x32a   : > { %v2431_v62 = vmul.f32 %v2343_v54, %v2343_v54  ;;  %v2401_v54 = vmul.f32 %v2345_v3, %v2345_v3  ;;  %v1494_v4 = vadd.f32 %v5594_v33, %v947_v52 }
 0x32b   : > { %v2432_v18 = vmul.f32 %v2344_v25, %v2344_v25  ;;  %v2346_v6 = vadd.f32 %v5151_v20, %v1918_v34  ;;  %v5595_v25 = vld [vmem:[#allocation106_spill] sm:$0xff]  ;;  %v5599_v34 = vld [vmem:[#allocation39_spill] sm:$0xff] }
 0x32c   : > { %v2463_v24 = vadd.f32 %v2431_v62, %v2399_v35  ;;  %v1921_v11 = vadd.f32 %v5595_v25, %v1493_v30 }
 0x32d   : > { %v2464_v44 = vadd.f32 %v2432_v18, %v2400_v16  ;;  %v2402_v20 = vmul.f32 %v2346_v6, %v2346_v6  ;;  %v5597_v18 = vld [vmem:[#allocation38_spill] sm:$0xff] }
 0x32e   : > { %2546 = vmatmul.f32.gmra.mxu0 %v2463_v24  ;;  %v2349_v38 = vadd.f32 %v5163_v17, %v1921_v11  ;;  %v885_v49 = vadd.f32 %v5598_v43, %v5597_v18  ;;  %v5602_v17 = vld [vmem:[#allocation108_spill] sm:$0xff] }
 0x32f   : > { %2611 = vmatmul.f32.gmra.mxu1 %v2464_v44  ;;  %v2228_v32 = vpop.f32.mrf.mxu2  ;;  %v5600_v44 = vld [vmem:[#allocation59_spill] sm:$0xff]  ;;  %v5610_v18 = vld [vmem:[#allocation112_spill] sm:$0xff] }
 0x330   : > { %v2347_v46 = vadd.f32 %v2228_v32, %v4988_v0  ;;  %v2293_v19 = vpop.f32.mrf.mxu3  ;;  %v5596_v0 = vld [vmem:[#allocation68_spill] sm:$0xff]  ;;  %v950_v3 = vadd.f32 %v5600_v44, %v5599_v34  ;;  %v5601_v32 = vld [vmem:[#allocation107_spill] sm:$0xff]  ;;  %v2403_v45 = vmul.f32 %v2349_v38, %v2349_v38 }
 0x331   : > { %v2348_v15 = vadd.f32 %v2293_v19, %v4993_v7  ;;  %v1922_v62 = vadd.f32 %v5596_v0, %v1494_v4  ;;  %v1497_v37 = vadd.f32 %v5601_v32, %v885_v49  ;;  %v5605_v4 = vld [vmem:[#allocation42_spill] sm:$0xff]  ;;  %v5608_v0 = vld [vmem:[#allocation61_spill] sm:$0xff]  ;;  %v5609_v38 = vld [vmem:[#allocation111_spill] sm:$0xff] }
 0x332   : > { %v2433_v56 = vmul.f32 %v2347_v46, %v2347_v46  ;;  %v1498_v46 = vadd.f32 %v5602_v17, %v950_v3  ;;  %v5612_v44 = vld [vmem:[#allocation72_spill] sm:$0xff] }
 0x333   : > { %v2434_v59 = vmul.f32 %v2348_v15, %v2348_v15  ;;  %v2350_v7 = vadd.f32 %v2166_v10, %v1922_v62  ;;  %v1925_v40 = vadd.f32 %v5603_v26, %v1497_v37  ;;  %v5604_v15 = vld [vmem:[#allocation109_spill] sm:$0xff] }
 0x334   : > { %v2465_v35 = vadd.f32 %v2433_v56, %v2401_v54  ;;  %v1926_v63 = vadd.f32 %v5604_v15, %v1498_v46  ;;  %v2175_v56 = vpop.f32.mrf.mxu1  ;;  %v5615_v26 = vld [vmem:[#allocation17_spill] sm:$0xff] }
 0x335   : > { %v2466_v50 = vadd.f32 %v2434_v59, %v2402_v20  ;;  %v2404_v10 = vmul.f32 %v2350_v7, %v2350_v7  ;;  %v2353_v54 = vadd.f32 %v2104_v14, %v1925_v40  ;;  %v5606_v20 = vld [vmem:[#allocation60_spill] sm:$0xff]  ;;  %v5616_v40 = vld [vmem:[#allocation63_spill] sm:$0xff] }
 0x336   : > { %2549 = vmatmul.f32.gmra.mxu0 %v2465_v35  ;;  %v2354_v33 = vadd.f32 %v2169_v48, %v1926_v63  ;;  %v888_v59 = vadd.f32 %v5606_v20, %v5605_v4  ;;  %v5607_v35 = vld [vmem:[#allocation43_spill] sm:$0xff] }
 0x337   : > { %2614 = vmatmul.f32.gmra.mxu1 %v2466_v50  ;;  %v2231_v16 = vpop.f32.mrf.mxu2  ;;  %v953_v62 = vadd.f32 %v5608_v0, %v5607_v35  ;;  %v5617_v63 = vld [vmem:[#allocation115_spill] sm:$0xff] }
 0x338   : > { %v2351_v24 = vadd.f32 %v2231_v16, %v5002_v5  ;;  %v2296_v57 = vpop.f32.mrf.mxu3  ;;  %v2110_v5 = vpop.f32.mrf.mxu0  ;;  %v1501_v7 = vadd.f32 %v5609_v38, %v888_v59  ;;  %v2405_v16 = vmul.f32 %v2353_v54, %v2353_v54  ;;  %v2406_v48 = vmul.f32 %v2354_v33, %v2354_v33 }
 0x339   : > { %v2352_v6 = vadd.f32 %v2296_v57, %v5005_v39  ;;  %v1502_v43 = vadd.f32 %v5610_v18, %v953_v62  ;;  %v5620_v62 = vld [vmem:[#allocation65_spill] sm:$0xff] }
 0x33a   : > { %v2435_v36 = vmul.f32 %v2351_v24, %v2351_v24  ;;  %v5611_v24 = vld [vmem:[#allocation110_spill] sm:$0xff] }
 0x33b   : > { %v2436_v19 = vmul.f32 %v2352_v6, %v2352_v6  ;;  %v1929_v57 = vadd.f32 %v5611_v24, %v1501_v7  ;;  %v1930_v3 = vadd.f32 %v5612_v44, %v1502_v43 }
 0x33c   : > { %v2467_v52 = vadd.f32 %v2435_v36, %v2403_v45  ;;  %v5613_v45 = vld [vmem:[#allocation16_spill] sm:$0xff]  ;;  %v5614_v36 = vld [vmem:[#allocation62_spill] sm:$0xff]  ;;  %v2178_v46 = vpop.f32.mrf.mxu1 }
 0x33d   : > { %v2468_v30 = vadd.f32 %v2436_v19, %v2404_v10  ;;  %v2357_v6 = vadd.f32 %v2107_v22, %v1929_v57  ;;  %v2358_v32 = vadd.f32 %v2172_v29, %v1930_v3  ;;  %v891_v17 = vadd.f32 %v5614_v36, %v5613_v45  ;;  %v5618_v29 = vld [vmem:[#allocation116_spill] sm:$0xff]  ;;  %v5626_v36 = vld [vmem:[#allocation70_spill] sm:$0xff] }
 0x33e   : > { %2552 = vmatmul.f32.gmra.mxu0 %v2467_v52  ;;  %v956_v52 = vadd.f32 %v5616_v40, %v5615_v26  ;;  %v5625_v45 = vld [vmem:[#allocation24_spill] sm:$0xff]  ;;  %v5627_v26 = vld [vmem:[#allocation25_spill] sm:$0xff]  ;;  %v5628_v40 = vld [vmem:[#allocation71_spill] sm:$0xff] }
 0x33f   : > { %2617 = vmatmul.f32.gmra.mxu1 %v2468_v30  ;;  %v2234_v39 = vpop.f32.mrf.mxu2  ;;  %v1505_v30 = vadd.f32 %v5617_v63, %v891_v17  ;;  %v2407_v22 = vmul.f32 %v2357_v6, %v2357_v6  ;;  %v897_v17 = vadd.f32 %v5626_v36, %v5625_v45 }
 0x340   : > { %v2355_v25 = vadd.f32 %v2234_v39, %v5016_v27  ;;  %v2299_v11 = vpop.f32.mrf.mxu3  ;;  %v2113_v37 = vpop.f32.mrf.mxu0  ;;  %v1506_v33 = vadd.f32 %v5618_v29, %v956_v52  ;;  %v2408_v39 = vmul.f32 %v2358_v32, %v2358_v32  ;;  %v962_v52 = vadd.f32 %v5628_v40, %v5627_v26 }
 0x341   : > { %v2356_v50 = vadd.f32 %v2299_v11, %v5019_v55  ;;  %v1933_v20 = vadd.f32 %v4957_v9, %v1505_v30 }
 0x342   : > { %v2437_v14 = vmul.f32 %v2355_v25, %v2355_v25  ;;  %v1934_v25 = vadd.f32 %v4961_v31, %v1506_v33 }
 0x343   : > { %v2438_v49 = vmul.f32 %v2356_v50, %v2356_v50  ;;  %v2361_v11 = vadd.f32 %v2110_v5, %v1933_v20 }
 0x344   : > { %v2469_v34 = vadd.f32 %v2437_v14, %v2405_v16  ;;  %v2362_v35 = vadd.f32 %v2175_v56, %v1934_v25  ;;  %v5621_v16 = vld [vmem:[#allocation21_spill] sm:$0xff]  ;;  %v5622_v14 = vld [vmem:[#allocation67_spill] sm:$0xff]  ;;  %v2181_v5 = vpop.f32.mrf.mxu1  ;;  %v5624_v56 = vld [vmem:[#allocation118_spill] sm:$0xff] }
 0x345   : > { %v2470_v27 = vadd.f32 %v2438_v49, %v2406_v48  ;;  %v959_v18 = vadd.f32 %v5622_v14, %v5621_v16  ;;  %v5623_v48 = vld [vmem:[#allocation117_spill] sm:$0xff]  ;;  %v2409_v49 = vmul.f32 %v2361_v11, %v2361_v11  ;;  %v5632_v11 = vld [vmem:[#allocation74_spill] sm:$0xff] }
 0x346   : > { %2555 = vmatmul.f32.gmra.mxu0 %v2469_v34  ;;  %v2410_v34 = vmul.f32 %v2362_v35, %v2362_v35 }
 0x347   : > { %2620 = vmatmul.f32.gmra.mxu1 %v2470_v27  ;;  %v2237_v55 = vpop.f32.mrf.mxu2  ;;  %v1510_v57 = vadd.f32 %v5624_v56, %v959_v18  ;;  %v5636_v18 = vld [vmem:[#allocation126_spill] sm:$0xff] }
 0x348   : > { %v2359_v10 = vadd.f32 %v2237_v55, %v5030_v1  ;;  %v2302_v19 = vpop.f32.mrf.mxu3  ;;  %v2116_v43 = vpop.f32.mrf.mxu0 }
 0x349   : > { %v2360_v15 = vadd.f32 %v2302_v19, %v5033_v28  ;;  %v5619_v28 = vld [vmem:[#allocation20_spill] sm:$0xff] }
 0x34a   : > { %v2439_v54 = vmul.f32 %v2359_v10, %v2359_v10  ;;  %v894_v50 = vadd.f32 %v5620_v62, %v5619_v28  ;;  %v5633_v62 = vld [vmem:[#allocation29_spill] sm:$0xff] }
 0x34b   : > { %v2440_v4 = vmul.f32 %v2360_v15, %v2360_v15  ;;  %v5629_v15 = vld [vmem:[#allocation121_spill] sm:$0xff] }
 0x34c   : > { %v2471_v59 = vadd.f32 %v2439_v54, %v2407_v22  ;;  %v1509_v31 = vadd.f32 %v5623_v48, %v894_v50  ;;  %v1513_v63 = vadd.f32 %v5629_v15, %v897_v17  ;;  %v5634_v50 = vld [vmem:[#allocation75_spill] sm:$0xff] }
 0x34d   : > { %v2472_v1 = vadd.f32 %v2440_v4, %v2408_v39  ;;  %v2184_v39 = vpop.f32.mrf.mxu1 }
 0x34e   : > { %2558 = vmatmul.f32.gmra.mxu0 %v2471_v59  ;;  %v1937_v3 = vadd.f32 %v4973_v21, %v1509_v31  ;;  %v1941_v33 = vadd.f32 %v4990_v42, %v1513_v63  ;;  %v5644_v63 = vld [vmem:[#allocation73_spill] sm:$0xff] }
 0x34f   : > { %2623 = vmatmul.f32.gmra.mxu1 %v2472_v1  ;;  %v2240_v0 = vpop.f32.mrf.mxu2  ;;  %v5631_v1 = vld [vmem:[#allocation28_spill] sm:$0xff] }
 0x350   : > { %v2363_v38 = vadd.f32 %v2240_v0, %v5044_v13  ;;  %v2305_v7 = vpop.f32.mrf.mxu3  ;;  %v1938_v13 = vadd.f32 %v4975_v23, %v1510_v57  ;;  %v2365_v32 = vadd.f32 %v2113_v37, %v1937_v3  ;;  %v5630_v37 = vld [vmem:[#allocation122_spill] sm:$0xff]  ;;  %v2119_v54 = vpop.f32.mrf.mxu0  ;;  %v2369_v59 = vadd.f32 %v2116_v43, %v1941_v33 }
 0x351   : > { %v2364_v9 = vadd.f32 %v2305_v7, %v5047_v51  ;;  %v1514_v22 = vadd.f32 %v5630_v37, %v962_v52  ;;  %v900_v35 = vadd.f32 %v5632_v11, %v5631_v1  ;;  %v5635_v7 = vld [vmem:[#allocation125_spill] sm:$0xff]  ;;  %v5638_v3 = vld [vmem:[#allocation78_spill] sm:$0xff] }
 0x352   : > { %v2441_v24 = vmul.f32 %v2363_v38, %v2363_v38  ;;  %v2366_v55 = vadd.f32 %v2178_v46, %v1938_v13  ;;  %v2411_v23 = vmul.f32 %v2365_v32, %v2365_v32  ;;  %v965_v38 = vadd.f32 %v5634_v50, %v5633_v62  ;;  %v5639_v32 = vld [vmem:[#allocation33_spill] sm:$0xff]  ;;  %v5652_v62 = vld [vmem:[#allocation130_spill] sm:$0xff] }
 0x353   : > { %v2442_v44 = vmul.f32 %v2364_v9, %v2364_v9  ;;  %v1517_v16 = vadd.f32 %v5635_v7, %v900_v35  ;;  %v5643_v52 = vld [vmem:[#allocation113_spill] sm:$0xff]  ;;  %v5653_v7 = vld [vmem:[#allocation114_spill] sm:$0xff] }
 0x354   : > { %v2473_v27 = vadd.f32 %v2441_v24, %v2409_v49  ;;  %v2412_v46 = vmul.f32 %v2366_v55, %v2366_v55  ;;  %v1518_v43 = vadd.f32 %v5636_v18, %v965_v38  ;;  %v5640_v55 = vld [vmem:[#allocation79_spill] sm:$0xff]  ;;  %v5651_v11 = vld [vmem:[#allocation129_spill] sm:$0xff] }
 0x355   : > { %v2474_v6 = vadd.f32 %v2442_v44, %v2410_v34  ;;  %v1945_v31 = vadd.f32 %v5007_v41, %v1517_v16  ;;  %v2187_v57 = vpop.f32.mrf.mxu1  ;;  %v5637_v44 = vld [vmem:[#allocation32_spill] sm:$0xff]  ;;  %v968_v41 = vadd.f32 %v5640_v55, %v5639_v32 }
 0x356   : > { %2561 = vmatmul.f32.gmra.mxu0 %v2473_v27  ;;  %v903_v27 = vadd.f32 %v5638_v3, %v5637_v44 }
 0x357   : > { %2626 = vmatmul.f32.gmra.mxu1 %v2474_v6  ;;  %v2243_v51 = vpop.f32.mrf.mxu2  ;;  %v2373_v56 = vadd.f32 %v2119_v54, %v1945_v31  ;;  %v5646_v54 = vld [vmem:[#allocation83_spill] sm:$0xff] }
 0x358   : > { %v2367_v10 = vadd.f32 %v2243_v51, %v5054_v8  ;;  %v2308_v19 = vpop.f32.mrf.mxu3  ;;  %v1942_v8 = vadd.f32 %v4995_v12, %v1514_v22  ;;  %v2413_v12 = vmul.f32 %v2369_v59, %v2369_v59  ;;  %v5649_v59 = vld [vmem:[#allocation85_spill] sm:$0xff] }
 0x359   : > { %v2368_v21 = vadd.f32 %v2308_v19, %v5059_v53  ;;  %v2415_v36 = vmul.f32 %v2373_v56, %v2373_v56 }
 0x35a   : > { %v2443_v30 = vmul.f32 %v2367_v10, %v2367_v10  ;;  %v2370_v25 = vadd.f32 %v2181_v5, %v1942_v8  ;;  %v1946_v5 = vadd.f32 %v5009_v47, %v1518_v43  ;;  %v5641_v47 = vld [vmem:[#allocation127_spill] sm:$0xff]  ;;  %v5642_v10 = vld [vmem:[#allocation128_spill] sm:$0xff] }
 0x35b   : > { %v2444_v29 = vmul.f32 %v2368_v21, %v2368_v21  ;;  %v1521_v45 = vadd.f32 %v5641_v47, %v903_v27  ;;  %v1522_v19 = vadd.f32 %v5642_v10, %v968_v41  ;;  %v5660_v27 = vld [vmem:[#allocation86_spill] sm:$0xff]  ;;  %v5662_v47 = vld [vmem:[#allocation132_spill] sm:$0xff]  ;;  %v5663_v10 = vld [vmem:[#allocation77_spill] sm:$0xff] }
 0x35c   : > { %v2475_v4 = vadd.f32 %v2443_v30, %v2411_v23  ;;  %v2414_v9 = vmul.f32 %v2370_v25, %v2370_v25  ;;  %v2374_v34 = vadd.f32 %v2184_v39, %v1946_v5  ;;  %v5647_v39 = vld [vmem:[#allocation84_spill] sm:$0xff] }
 0x35d   : > { %v2476_v20 = vadd.f32 %v2444_v29, %v2412_v46  ;;  %v1949_v21 = vadd.f32 %v5643_v52, %v1521_v45  ;;  %v1950_v23 = vadd.f32 %v5644_v63, %v1522_v19  ;;  %v5645_v46 = vld [vmem:[#allocation36_spill] sm:$0xff]  ;;  %v2190_v33 = vpop.f32.mrf.mxu1 }
 0x35e   : > { %2564 = vmatmul.f32.gmra.mxu0 %v2475_v4  ;;  %v2416_v26 = vmul.f32 %v2374_v34, %v2374_v34  ;;  %v906_v29 = vadd.f32 %v5646_v54, %v5645_v46  ;;  %v5656_v5 = vld [vmem:[#allocation88_spill] sm:$0xff]  ;;  %v5658_v34 = vld [vmem:[#allocation41_spill] sm:$0xff] }
 0x35f   : > { %2629 = vmatmul.f32.gmra.mxu1 %v2476_v20  ;;  %v2246_v53 = vpop.f32.mrf.mxu2  ;;  %v2378_v37 = vadd.f32 %v2187_v57, %v1950_v23  ;;  %v5648_v20 = vld [vmem:[#allocation37_spill] sm:$0xff] }
 0x360   : > { %v2371_v0 = vadd.f32 %v2246_v53, %v5068_v58  ;;  %v2311_v28 = vpop.f32.mrf.mxu3  ;;  %v2122_v58 = vpop.f32.mrf.mxu0  ;;  %v971_v25 = vadd.f32 %v5649_v59, %v5648_v20  ;;  %v5650_v53 = vld [vmem:[#allocation119_spill] sm:$0xff]  ;;  %v1525_v35 = vadd.f32 %v5651_v11, %v906_v29  ;;  %v5668_v54 = vld [vmem:[#allocation45_spill] sm:$0xff] }
 0x361   : > { %v2372_v42 = vadd.f32 %v2311_v28, %v5071_v61  ;;  %v2377_v30 = vadd.f32 %v2122_v58, %v1949_v21  ;;  %v2418_v38 = vmul.f32 %v2378_v37, %v2378_v37  ;;  %v5669_v29 = vld [vmem:[#allocation91_spill] sm:$0xff] }
 0x362   : > { %v2445_v14 = vmul.f32 %v2371_v0, %v2371_v0  ;;  %v1526_v50 = vadd.f32 %v5652_v62, %v971_v25  ;;  %v1953_v16 = vadd.f32 %v5653_v7, %v1525_v35 }
 0x363   : > { %v2446_v48 = vmul.f32 %v2372_v42, %v2372_v42  ;;  %v2417_v0 = vmul.f32 %v2377_v30, %v2377_v30  ;;  %v5666_v30 = vld [vmem:[#allocation90_spill] sm:$0xff] }
 0x364   : > { %v2477_v49 = vadd.f32 %v2445_v14, %v2413_v12  ;;  %v5654_v14 = vld [vmem:[#allocation76_spill] sm:$0xff] }
 0x365   : > { %v2478_v24 = vadd.f32 %v2446_v48, %v2414_v9  ;;  %v1954_v18 = vadd.f32 %v5654_v14, %v1526_v50  ;;  %v2193_v41 = vpop.f32.mrf.mxu1 }
 0x366   : > { %2567 = vmatmul.f32.gmra.mxu0 %v2477_v49  ;;  %v5655_v49 = vld [vmem:[#allocation40_spill] sm:$0xff] }
 0x367   : > { %2632 = vmatmul.f32.gmra.mxu1 %v2478_v24  ;;  %v2249_v61 = vpop.f32.mrf.mxu2  ;;  %v2382_v48 = vadd.f32 %v2190_v33, %v1954_v18  ;;  %v909_v58 = vadd.f32 %v5656_v5, %v5655_v49  ;;  %v5657_v24 = vld [vmem:[#allocation120_spill] sm:$0xff]  ;;  %v977_v33 = vadd.f32 %v5669_v29, %v5668_v54 }
 0x368   : > { %v2375_v13 = vadd.f32 %v2249_v61, %v5082_v60  ;;  %v2314_v6 = vpop.f32.mrf.mxu3  ;;  %v2125_v22 = vpop.f32.mrf.mxu0  ;;  %v5659_v61 = vld [vmem:[#allocation89_spill] sm:$0xff] }
 0x369   : > { %v2376_v51 = vadd.f32 %v2314_v6, %v5085_v2  ;;  %v2381_v9 = vadd.f32 %v2125_v22, %v1953_v16  ;;  %v974_v44 = vadd.f32 %v5659_v61, %v5658_v34  ;;  %v5661_v6 = vld [vmem:[#allocation131_spill] sm:$0xff] }
 0x36a   : > { %v2447_v17 = vmul.f32 %v2375_v13, %v2375_v13  ;;  %v1529_v32 = vadd.f32 %v5661_v6, %v909_v58  ;;  %v5667_v22 = vld [vmem:[#allocation123_spill] sm:$0xff] }
 0x36b   : > { %v2448_v40 = vmul.f32 %v2376_v51, %v2376_v51  ;;  %v2419_v55 = vmul.f32 %v2381_v9, %v2381_v9  ;;  %v1530_v45 = vadd.f32 %v5662_v47, %v974_v44 }
 0x36c   : > { %v2479_v15 = vadd.f32 %v2447_v17, %v2415_v36  ;;  %v2420_v36 = vmul.f32 %v2382_v48, %v2382_v48  ;;  %v1957_v19 = vadd.f32 %v5663_v10, %v1529_v32 }
 0x36d   : > { %v2480_v60 = vadd.f32 %v2448_v40, %v2416_v26  ;;  %v5664_v40 = vld [vmem:[#allocation80_spill] sm:$0xff]  ;;  %v2196_v50 = vpop.f32.mrf.mxu1 }
 0x36e   : > { %2570 = vmatmul.f32.gmra.mxu0 %v2479_v15  ;;  %v1958_v52 = vadd.f32 %v5664_v40, %v1530_v45 }
 0x36f   : > { %2635 = vmatmul.f32.gmra.mxu1 %v2480_v60  ;;  %v2252_v2 = vpop.f32.mrf.mxu2  ;;  %v5665_v60 = vld [vmem:[#allocation44_spill] sm:$0xff] }
 0x370   : > { %v2379_v4 = vadd.f32 %v2252_v2, %v5647_v39  ;;  %v2317_v8 = vpop.f32.mrf.mxu3  ;;  %v2128_v3 = vpop.f32.mrf.mxu0  ;;  %v2386_v63 = vadd.f32 %v2193_v41, %v1958_v52  ;;  %v912_v37 = vadd.f32 %v5666_v30, %v5665_v60  ;;  %v5670_v39 = vld [vmem:[#allocation87_spill] sm:$0xff] }
 0x371   : > { %v2380_v1 = vadd.f32 %v2317_v8, %v5650_v53  ;;  %v2385_v15 = vadd.f32 %v2128_v3, %v1957_v19  ;;  %v5671_v8 = vld [vmem:[#allocation133_spill] sm:$0xff]  ;;  %v5672_v53 = vld [vmem:[#allocation134_spill] sm:$0xff] }
 0x372   : > { %v2449_v28 = vmul.f32 %v2379_v4, %v2379_v4  ;;  %v1533_v20 = vadd.f32 %v5671_v8, %v912_v37  ;;  %v2422_v11 = vmul.f32 %v2386_v63, %v2386_v63 }
 0x373   : > { %v2450_v42 = vmul.f32 %v2380_v1, %v2380_v1  ;;  %v2421_v59 = vmul.f32 %v2385_v15, %v2385_v15  ;;  %v1534_v1 = vadd.f32 %v5672_v53, %v977_v33 }
 0x374   : > { %v2481_v12 = vadd.f32 %v2449_v28, %v2417_v0  ;;  %v5673_v28 = vld [vmem:[#allocation81_spill] sm:$0xff] }
 0x375   : > { %v2482_v43 = vadd.f32 %v2450_v42, %v2418_v38  ;;  %v1961_v62 = vadd.f32 %v5673_v28, %v1533_v20  ;;  %v5674_v42 = vld [vmem:[#allocation82_spill] sm:$0xff] }
 0x376   : > { %2573 = vmatmul.f32.gmra.mxu0 %v2481_v12  ;;  %v1962_v7 = vadd.f32 %v5674_v42, %v1534_v1 }
 0x377   : > { %2638 = vmatmul.f32.gmra.mxu1 %v2482_v43  ;;  %v2255_v31 = vpop.f32.mrf.mxu2  ;;  %v5675_v43 = vld [vmem:[#allocation124_spill] sm:$0xff] }
 0x378   : > { %v2383_v56 = vadd.f32 %v2255_v31, %v5657_v24  ;;  %v2320_v57 = vpop.f32.mrf.mxu3  ;;  %v2131_v35 = vpop.f32.mrf.mxu0  ;;  %v2390_v14 = vadd.f32 %v2196_v50, %v1962_v7  ;;  %v5676_v31 = vld [vmem:[#allocation14_spill] sm:$0xff] }
 0x379   : > { %v2384_v13 = vadd.f32 %v2320_v57, %v5660_v27  ;;  %v2389_v12 = vadd.f32 %v2131_v35, %v1961_v62 }
 0x37a   : > { %v2451_v51 = vmul.f32 %v2383_v56, %v2383_v56  ;;  %v2424_v24 = vmul.f32 %v2390_v14, %v2390_v14 }
 0x37b   : > { %v2452_v17 = vmul.f32 %v2384_v13, %v2384_v13  ;;  %v2423_v5 = vmul.f32 %v2389_v12, %v2389_v12 }
 0x37c   : > { %v2483_v26 = vadd.f32 %v2451_v51, %v2419_v55 }
 0x37d   : > { %v2484_v21 = vadd.f32 %v2452_v17, %v2420_v36 }
 0x37e   : > { %2576 = vmatmul.f32.gmra.mxu0 %v2483_v26 }
 0x37f   : > { %2641 = vmatmul.f32.gmra.mxu1 %v2484_v21  ;;  %v2258_v23 = vpop.f32.mrf.mxu2 }
 0x380   : > { %v2387_v2 = vadd.f32 %v2258_v23, %v5667_v22  ;;  %v2323_v46 = vpop.f32.mrf.mxu3 }
 0x381   : > { %v2388_v4 = vadd.f32 %v2323_v46, %v5670_v39 }
 0x382   : > { %v2453_v25 = vmul.f32 %v2387_v2, %v2387_v2 }
 0x383   : > { %v2454_v0 = vmul.f32 %v2388_v4, %v2388_v4 }
 0x384   : > { %v2485_v38 = vadd.f32 %v2453_v25, %v2421_v59 }
 0x385   : > { %v2486_v16 = vadd.f32 %v2454_v0, %v2422_v11 }
 0x386   : > { %2579 = vmatmul.f32.gmra.mxu0 %v2485_v38 }
 0x387   : > { %2644 = vmatmul.f32.gmra.mxu1 %v2486_v16  ;;  %v2261_v18 = vpop.f32.mrf.mxu2 }
 0x388   : > { %v2391_v9 = vadd.f32 %v2261_v18, %v5675_v43  ;;  %v2326_v48 = vpop.f32.mrf.mxu3 }
 0x389   : > { %v2392_v49 = vadd.f32 %v2326_v48, %v5676_v31 }
 0x38a   : > { %v2455_v58 = vmul.f32 %v2391_v9, %v2391_v9 }
 0x38b   : > { %v2456_v56 = vmul.f32 %v2392_v49, %v2392_v49 }
 0x38c   : > { %v2487_v57 = vadd.f32 %v2455_v58, %v2423_v5 }
 0x38d   : > { %v2488_v34 = vadd.f32 %v2456_v56, %v2424_v24 }
 0x38e   : > { %2582 = vmatmul.f32.gmra.mxu0 %v2487_v57 }
 0x38f   : > { %2647 = vmatmul.f32.gmra.mxu1 %v2488_v34 }
 0x393   : > { %v2538_v61 = vpop.f32.mrf.mxu0 }
 0x394   : > { %v2539_v44 = vadd.f32 1e-14, %v2538_v61  ;;  %v2603_v3 = vpop.f32.mrf.mxu1 }
 0x396   : > { %v2604_v27 = vadd.f32 %v2603_v3, %v2539_v44 }
 0x398   : > { %3316 = vlog2.f32 %v2604_v27 }
 0x39b   : > { %v2541_v13 = vpop.f32.mrf.mxu0 }
 0x39c   : > { %v2542_v6 = vadd.f32 1e-14, %v2541_v13  ;;  %v2606_v32 = vpop.f32.mrf.mxu1 }
 0x39e   : > { %v3317_v55 = vpop.eup %3316  ;;  %v2607_v41 = vadd.f32 %v2606_v32, %v2542_v6 }
 0x39f   : > { %v2652_v51 = vmul.f32 0.6931472, %v3317_v55 }
 0x3a0   : > { %3318 = vlog2.f32 %v2607_v41 }
 0x3a1   : > { %2683 = vxpose.xlu0.b32.start [1/16] %v2652_v51, 128 }
 0x3a3   : > { %v2544_v47 = vpop.f32.mrf.mxu0 }
 0x3a4   : > { %v2545_v45 = vadd.f32 1e-14, %v2544_v47  ;;  %v2609_v36 = vpop.f32.mrf.mxu1 }
 0x3a6   : > { %v3319_v17 = vpop.eup %3318  ;;  %v2610_v10 = vadd.f32 %v2609_v36, %v2545_v45 }
 0x3a7   : > { %v2654_v19 = vmul.f32 0.6931472, %v3319_v17 }
 0x3a8   : > { %3320 = vlog2.f32 %v2610_v10 }
 0x3a9   : > { %2684 = vxpose.xlu0.b32.cont [2/16] %v2654_v19, 128 }
 0x3ab   : > { %v2547_v26 = vpop.f32.mrf.mxu0 }
 0x3ac   : > { %v2548_v40 = vadd.f32 1e-14, %v2547_v26  ;;  %v2612_v52 = vpop.f32.mrf.mxu1 }
 0x3ae   : > { %v3321_v21 = vpop.eup %3320  ;;  %v2613_v15 = vadd.f32 %v2612_v52, %v2548_v40 }
 0x3af   : > { %v2656_v63 = vmul.f32 0.6931472, %v3321_v21 }
 0x3b0   : > { %3322 = vlog2.f32 %v2613_v15 }
 0x3b1   : > { %2685 = vxpose.xlu0.b32.cont [3/16] %v2656_v63, 128 }
 0x3b3   : > { %v2550_v23 = vpop.f32.mrf.mxu0 }
 0x3b4   : > { %v2551_v60 = vadd.f32 1e-14, %v2550_v23  ;;  %v2615_v30 = vpop.f32.mrf.mxu1 }
 0x3b6   : > { %v3323_v37 = vpop.eup %3322  ;;  %v2616_v22 = vadd.f32 %v2615_v30, %v2551_v60 }
 0x3b7   : > { %v2658_v2 = vmul.f32 0.6931472, %v3323_v37 }
 0x3b8   : > { %3324 = vlog2.f32 %v2616_v22 }
 0x3b9   : > { %2686 = vxpose.xlu0.b32.cont [4/16] %v2658_v2, 128 }
 0x3bb   : > { %v2553_v46 = vpop.f32.mrf.mxu0 }
 0x3bc   : > { %v2554_v54 = vadd.f32 1e-14, %v2553_v46  ;;  %v2618_v29 = vpop.f32.mrf.mxu1 }
 0x3be   : > { %v3325_v33 = vpop.eup %3324  ;;  %v2619_v39 = vadd.f32 %v2618_v29, %v2554_v54 }
 0x3bf   : > { %v2660_v4 = vmul.f32 0.6931472, %v3325_v33 }
 0x3c0   : > { %3326 = vlog2.f32 %v2619_v39 }
 0x3c1   : > { %2687 = vxpose.xlu0.b32.cont [5/16] %v2660_v4, 128 }
 0x3c3   : > { %v2556_v8 = vpop.f32.mrf.mxu0 }
 0x3c4   : > { %v2557_v20 = vadd.f32 1e-14, %v2556_v8  ;;  %v2621_v59 = vpop.f32.mrf.mxu1 }
 0x3c6   : > { %v3327_v25 = vpop.eup %3326  ;;  %v2622_v53 = vadd.f32 %v2621_v59, %v2557_v20 }
 0x3c7   : > { %v2662_v1 = vmul.f32 0.6931472, %v3327_v25 }
 0x3c8   : > { %3328 = vlog2.f32 %v2622_v53 }
 0x3c9   : > { %2688 = vxpose.xlu0.b32.cont [6/16] %v2662_v1, 128 }
 0x3cb   : > { %v2559_v11 = vpop.f32.mrf.mxu0 }
 0x3cc   : > { %v2560_v35 = vadd.f32 1e-14, %v2559_v11  ;;  %v2624_v0 = vpop.f32.mrf.mxu1 }
 0x3ce   : > { %v3329_v28 = vpop.eup %3328  ;;  %v2625_v62 = vadd.f32 %v2624_v0, %v2560_v35 }
 0x3cf   : > { %v2664_v50 = vmul.f32 0.6931472, %v3329_v28 }
 0x3d0   : > { %3330 = vlog2.f32 %v2625_v62 }
 0x3d1   : > { %2689 = vxpose.xlu0.b32.cont [7/16] %v2664_v50, 128 }
 0x3d3   : > { %v2562_v38 = vpop.f32.mrf.mxu0 }
 0x3d4   : > { %v2563_v42 = vadd.f32 1e-14, %v2562_v38  ;;  %v2627_v7 = vpop.f32.mrf.mxu1 }
 0x3d6   : > { %v3331_v16 = vpop.eup %3330  ;;  %v2628_v12 = vadd.f32 %v2627_v7, %v2563_v42 }
 0x3d7   : > { %v2666_v14 = vmul.f32 0.6931472, %v3331_v16 }
 0x3d8   : > { %3332 = vlog2.f32 %v2628_v12 }
 0x3d9   : > { %2690 = vxpose.xlu0.b32.cont [8/16] %v2666_v14, 128 }
 0x3db   : > { %v2565_v18 = vpop.f32.mrf.mxu0 }
 0x3dc   : > { %v2566_v43 = vadd.f32 1e-14, %v2565_v18  ;;  %v2630_v9 = vpop.f32.mrf.mxu1 }
 0x3de   : > { %v3333_v48 = vpop.eup %3332  ;;  %v2631_v31 = vadd.f32 %v2630_v9, %v2566_v43 }
 0x3df   : > { %v2668_v49 = vmul.f32 0.6931472, %v3333_v48 }
 0x3e0   : > { %3334 = vlog2.f32 %v2631_v31 }
 0x3e1   : > { %2691 = vxpose.xlu0.b32.cont [9/16] %v2668_v49, 128 }
 0x3e3   : > { %v2568_v5 = vpop.f32.mrf.mxu0 }
 0x3e4   : > { %v2569_v58 = vadd.f32 1e-14, %v2568_v5  ;;  %v2633_v24 = vpop.f32.mrf.mxu1 }
 0x3e6   : > { %v3335_v56 = vpop.eup %3334  ;;  %v2634_v57 = vadd.f32 %v2633_v24, %v2569_v58 }
 0x3e7   : > { %v2670_v34 = vmul.f32 0.6931472, %v3335_v56 }
 0x3e8   : > { %3336 = vlog2.f32 %v2634_v57 }
 0x3e9   : > { %2692 = vxpose.xlu0.b32.cont [10/16] %v2670_v34, 128 }
 0x3eb   : > { %v2571_v61 = vpop.f32.mrf.mxu0 }
 0x3ec   : > { %v2572_v44 = vadd.f32 1e-14, %v2571_v61  ;;  %v2636_v3 = vpop.f32.mrf.mxu1 }
 0x3ee   : > { %v3337_v27 = vpop.eup %3336  ;;  %v2637_v13 = vadd.f32 %v2636_v3, %v2572_v44 }
 0x3ef   : > { %v2672_v6 = vmul.f32 0.6931472, %v3337_v27 }
 0x3f0   : > { %3338 = vlog2.f32 %v2637_v13 }
 0x3f1   : > { %2693 = vxpose.xlu0.b32.cont [11/16] %v2672_v6, 128 }
 0x3f3   : > { %v2574_v32 = vpop.f32.mrf.mxu0 }
 0x3f4   : > { %v2575_v55 = vadd.f32 1e-14, %v2574_v32  ;;  %v2639_v41 = vpop.f32.mrf.mxu1 }
 0x3f6   : > { %v3339_v51 = vpop.eup %3338  ;;  %v2640_v47 = vadd.f32 %v2639_v41, %v2575_v55 }
 0x3f7   : > { %v2674_v45 = vmul.f32 0.6931472, %v3339_v51 }
 0x3f8   : > { %3340 = vlog2.f32 %v2640_v47 }
 0x3f9   : > { %2694 = vxpose.xlu0.b32.cont [12/16] %v2674_v45, 128 }
 0x3fb   : > { %v2577_v36 = vpop.f32.mrf.mxu0 }
 0x3fc   : > { %v2578_v17 = vadd.f32 1e-14, %v2577_v36  ;;  %v2642_v10 = vpop.f32.mrf.mxu1 }
 0x3fe   : > { %v3341_v19 = vpop.eup %3340  ;;  %v2643_v26 = vadd.f32 %v2642_v10, %v2578_v17 }
 0x3ff   : > { %v2676_v40 = vmul.f32 0.6931472, %v3341_v19 }
 0x400   : > { %3342 = vlog2.f32 %v2643_v26 }
 0x401   : > { %2695 = vxpose.xlu0.b32.cont [13/16] %v2676_v40, 128 }
 0x403   : > { %v2580_v52 = vpop.f32.mrf.mxu0 }
 0x404   : > { %v2581_v21 = vadd.f32 1e-14, %v2580_v52  ;;  %v2645_v15 = vpop.f32.mrf.mxu1 }
 0x406   : > { %v3343_v63 = vpop.eup %3342  ;;  %v2646_v23 = vadd.f32 %v2645_v15, %v2581_v21 }
 0x407   : > { %v2678_v60 = vmul.f32 0.6931472, %v3343_v63 }
 0x408   : > { %3344 = vlog2.f32 %v2646_v23 }
 0x409   : > { %2696 = vxpose.xlu0.b32.cont [14/16] %v2678_v60, 128 }
 0x40b   : > { %v2583_v30 = vpop.f32.mrf.mxu0 }
 0x40c   : > { %v2584_v37 = vadd.f32 1e-14, %v2583_v30  ;;  %v2648_v22 = vpop.f32.mrf.mxu1 }
 0x40e   : > { %v3345_v2 = vpop.eup %3344  ;;  %v2649_v46 = vadd.f32 %v2648_v22, %v2584_v37 }
 0x40f   : > { %v2680_v54 = vmul.f32 0.6931472, %v3345_v2 }
 0x410   : > { %3346 = vlog2.f32 %v2649_v46 }
 0x411   : > { %2697 = vxpose.xlu0.b32.cont [15/16] %v2680_v54, 128 }
 0x416   : > { %v3347_v29 = vpop.eup %3346 }
 0x417   : > { %v2682_v33 = vmul.f32 0.6931472, %v3347_v29 }
 0x419   : > { %2698 = vxpose.xlu0.b32.end [16/16] %v2682_v33, 128 }
 0x445   : > { %v2699_v39 = vpop.trf.xlu0 }
 0x446   : > { %2716 = vst.msk [vmem:[%s5307_s25] sm:$0xff] %vm2715_vm1, %v2699_v39 }
 0x44d   : > { %v2700_v4 = vpop.trf.xlu0 }
 0x44e   : > { %2717 = vst.msk [vmem:[%s5307_s25 + $0x8] sm:$0xff] %vm2715_vm1, %v2700_v4 }
 0x455   : > { %v2701_v8 = vpop.trf.xlu0 }
 0x456   : > { %2718 = vst.msk [vmem:[%s5307_s25 + $0x10] sm:$0xff] %vm2715_vm1, %v2701_v8 }
 0x45d   : > { %v2702_v20 = vpop.trf.xlu0 }
 0x45e   : > { %2719 = vst.msk [vmem:[%s5307_s25 + $0x18] sm:$0xff] %vm2715_vm1, %v2702_v20 }
 0x465   : > { %v2703_v59 = vpop.trf.xlu0 }
 0x466   : > { %2720 = vst.msk [vmem:[%s5307_s25 + $0x20] sm:$0xff] %vm2715_vm1, %v2703_v59 }
 0x46d   : > { %v2704_v25 = vpop.trf.xlu0 }
 0x46e   : > { %2721 = vst.msk [vmem:[%s5307_s25 + $0x28] sm:$0xff] %vm2715_vm1, %v2704_v25 }
 0x475   : > { %v2705_v53 = vpop.trf.xlu0 }
 0x476   : > { %2722 = vst.msk [vmem:[%s5307_s25 + $0x30] sm:$0xff] %vm2715_vm1, %v2705_v53 }
 0x47d   : > { %v2706_v1 = vpop.trf.xlu0 }
 0x47e   : > { %2723 = vst.msk [vmem:[%s5307_s25 + $0x38] sm:$0xff] %vm2715_vm1, %v2706_v1 }
 0x485   : > { %v2707_v11 = vpop.trf.xlu0 }
 0x486   : > { %2724 = vst.msk [vmem:[%s5307_s25 + $0x40] sm:$0xff] %vm2715_vm1, %v2707_v11 }
 0x48d   : > { %v2708_v35 = vpop.trf.xlu0 }
 0x48e   : > { %2725 = vst.msk [vmem:[%s5307_s25 + $0x48] sm:$0xff] %vm2715_vm1, %v2708_v35 }
 0x495   : > { %v2709_v0 = vpop.trf.xlu0 }
 0x496   : > { %2726 = vst.msk [vmem:[%s5307_s25 + $0x50] sm:$0xff] %vm2715_vm1, %v2709_v0 }
 0x49d   : > { %v2710_v28 = vpop.trf.xlu0 }
 0x49e   : > { %2727 = vst.msk [vmem:[%s5307_s25 + $0x58] sm:$0xff] %vm2715_vm1, %v2710_v28 }
 0x4a5   : > { %v2711_v62 = vpop.trf.xlu0 }
 0x4a6   : > { %2728 = vst.msk [vmem:[%s5307_s25 + $0x60] sm:$0xff] %vm2715_vm1, %v2711_v62 }
 0x4ad   : > { %v2712_v50 = vpop.trf.xlu0 }
 0x4ae   : > { %2729 = vst.msk [vmem:[%s5307_s25 + $0x68] sm:$0xff] %vm2715_vm1, %v2712_v50 }
 0x4b5   : > { %v2713_v38 = vpop.trf.xlu0 }
 0x4b6   : > { %2730 = vst.msk [vmem:[%s5307_s25 + $0x70] sm:$0xff] %vm2715_vm1, %v2713_v38 }
 0x4bd   : > { %v2714_v42 = vpop.trf.xlu0 }
 0x4be   : > { %2731 = vst.msk [vmem:[%s5307_s25 + $0x78] sm:$0xff] %vm2715_vm1, %v2714_v42 }
 0x4bf PF: > { %s21_s20 = sadd.s32 1, %s3530_s20   ;;  %s5677_s15 = smov %s3514_s16 }
 0x4c0   : > { %p18_p2 = scmp.ge.s32.totalorder %s21_s20, 4   ;;  %s5678_s16 = smov %s3518_s17 }
 0x4c1   : > { %s5679_s17 = smov %s3641_s29  ;;  %s5680_s18 = smov %s3526_s19 }
 0x4c2   : > { %s5681_s19 = smov %s5683_s13  ;;  %20 = sbr.rel (!%p18_p2) target bundleno = 9 (0x9), region = 97 }
 0x4c7   :  { %2759 = vsyncpa [#allocation4], 1 }
 0x4c8   :  { %2761 = vsyncpa [#allocation4 + $0x1], 1 }
 0x4c9   :  { %2762 = vsyncpa [#allocation6], 1 }
 0x4ca   :  { %2764 = vsyncpa [#allocation6 + $0x1], 1 }
 0x4cb   :  { %2765 = vsyncpa [#allocation9], 1 }

</bundles_post_ra>
